<compile_context>
chip_gen: v5e
topology: v5e:2x2
jax: 0.10.0
libtpu: 0.0.40
codegen_flags: <defaults>
</compile_context>

<pallas_src>
import jax
import jax.numpy as jnp
from jax.experimental import pallas as pl
from jax.experimental.pallas import tpu as pltpu

IN_FEATURES = 28 * 28      # 784
OUT_FEATURES = 10
HEAD_PAD = 128             # pad final output width 10 -> 128 lanes
LB_MAX = 4                 # hidden layers fused per grid step (fits v5e default VMEM)


def _make_fused_mlp_kernel(L, Lb):
    """Build the kernel body for L hidden layers processed Lb at a time.

    Refs:
      x_ref   : (B, 784)       f32   flattened input (same block every step)
      w_ref   : (Lb, 784, 784) bf16  hidden weights for layers [g*Lb, g*Lb+Lb)
      b_ref   : (Lb, 1, 784)   f32   hidden biases for those layers
      wh_ref  : (784, 128)     bf16  head weight, zero-padded from (784, 10)
      bh_ref  : (1, 128)       f32   head bias,  zero-padded from (1, 10)
      o_ref   : (B, 128)       f32   logits (lane-dense; sliced to 10 outside)
      act_ref : (B, 784)       bf16  VMEM-resident activation across layers
    """
    needs_mask = (L % Lb) != 0  # last grid step may contain zero-padded layers

    def kernel(x_ref, w_ref, b_ref, wh_ref, bh_ref, o_ref, act_ref):
        g = pl.program_id(0)

        def run_layer(j, inp_bf16):
            # h = relu(inp @ W + b); bf16 MXU inputs, f32 accumulation.
            h = jnp.dot(inp_bf16, w_ref[j], preferred_element_type=jnp.float32)
            h = jnp.maximum(h + b_ref[j], 0.0)
            act_ref[...] = h.astype(act_ref.dtype)

        for j in range(Lb):
            valid = (g * Lb + j < L) if needs_mask else None
            if j == 0:
                # First sub-layer of the block: input is x on grid step 0,
                # the resident activation otherwise.
                cond_first = (g == 0)
                cond_rest = (g > 0)
                if valid is not None:
                    cond_first = jnp.logical_and(valid, cond_first)
                    cond_rest = jnp.logical_and(valid, cond_rest)

                @pl.when(cond_first)
                def _(j=j):
                    run_layer(j, x_ref[...].astype(jnp.bfloat16))

                @pl.when(cond_rest)
                def _(j=j):
                    run_layer(j, act_ref[...])
            else:
                if valid is None:
                    run_layer(j, act_ref[...])
                else:
                    @pl.when(valid)
                    def _(j=j):
                        run_layer(j, act_ref[...])

        # Final 784->10 head (padded to 128 lanes) fused into the last step.
        @pl.when(g == pl.num_programs(0) - 1)
        def _():
            logits = jnp.dot(act_ref[...], wh_ref[...],
                             preferred_element_type=jnp.float32) + bh_ref[...]
            o_ref[...] = logits.astype(o_ref.dtype)

    return kernel


def fused_mlp(x, w_stack, b_stack, w_head, b_head, lb_max=LB_MAX):
    """x:(B,784)f32 (B multiple of 8), w_stack:(L,784,784)bf16,
    b_stack:(L,1,784)f32, w_head:(784,128)bf16, b_head:(1,128)f32
    -> (B,128) f32 padded logits."""
    B, K = x.shape
    L, Kw, H = w_stack.shape
    assert K == IN_FEATURES and Kw == K and H == K and L >= 1
    assert B % 8 == 0
    assert b_stack.shape == (L, 1, K)
    assert w_head.shape == (K, HEAD_PAD) and b_head.shape == (1, HEAD_PAD)

    Lb = min(lb_max, L)
    G = pl.cdiv(L, Lb)
    Lg = G * Lb
    if Lg != L:
        # Zero-pad the layer stack; padded layers are skipped via pl.when.
        w_stack = jnp.pad(w_stack, ((0, Lg - L), (0, 0), (0, 0)))
        b_stack = jnp.pad(b_stack, ((0, Lg - L), (0, 0), (0, 0)))

    flops = 2 * B * K * K * L + 2 * B * K * HEAD_PAD
    bytes_accessed = (x.size * 4 + L * K * K * 2 + L * K * 4
                      + w_head.size * 2 + b_head.size * 4 + B * HEAD_PAD * 4)

    return pl.pallas_call(
        _make_fused_mlp_kernel(L, Lb),
        out_shape=jax.ShapeDtypeStruct((B, HEAD_PAD), jnp.float32),
        grid_spec=pltpu.PrefetchScalarGridSpec(
            num_scalar_prefetch=0,
            grid=(G,),
            in_specs=[
                pl.BlockSpec((B, K), lambda g: (0, 0)),          # x (DMA'd once)
                pl.BlockSpec((Lb, K, K), lambda g: (g, 0, 0)),   # W block (pipelined)
                pl.BlockSpec((Lb, 1, K), lambda g: (g, 0, 0)),   # b block
                pl.BlockSpec((K, HEAD_PAD), lambda g: (0, 0)),   # W_head
                pl.BlockSpec((1, HEAD_PAD), lambda g: (0, 0)),   # b_head
            ],
            out_specs=pl.BlockSpec((B, HEAD_PAD), lambda g: (0, 0)),
            scratch_shapes=[pltpu.VMEM((B, K), jnp.bfloat16)],   # activation
        ),
        compiler_params=pltpu.CompilerParams(
            dimension_semantics=("arbitrary",),  # layer blocks are sequential
        ),
        cost_estimate=pl.CostEstimate(
            flops=flops, transcendentals=0, bytes_accessed=bytes_accessed),
    )(x, w_stack, b_stack, w_head, b_head)


def init_mlp_params(key, num_layers, in_features=IN_FEATURES,
                    out_features=OUT_FEATURES):
    """PyTorch-style init U(-1/sqrt(fan_in), 1/sqrt(fan_in)); weights stored
    pre-transposed (in, out) and cast to bf16; biases kept f32."""
    assert num_layers >= 2, "need at least one hidden layer plus the head"
    L = num_layers - 1
    bound = 1.0 / jnp.sqrt(jnp.float32(in_features))

    ws, bs = [], []
    for _ in range(L):
        key, kw, kb = jax.random.split(key, 3)
        ws.append(jax.random.uniform(kw, (in_features, in_features),
                                     jnp.float32, minval=-bound, maxval=bound))
        bs.append(jax.random.uniform(kb, (1, in_features),
                                     jnp.float32, minval=-bound, maxval=bound))
    w_stack = jnp.stack(ws, axis=0).astype(jnp.bfloat16)         # (L, 784, 784)
    b_stack = jnp.stack(bs, axis=0).reshape(L, 1, in_features)   # (L, 1, 784) f32

    key, kw, kb = jax.random.split(key, 3)
    w_head = jax.random.uniform(kw, (in_features, out_features), jnp.float32,
                                minval=-bound, maxval=bound).astype(jnp.bfloat16)
    b_head = jax.random.uniform(kb, (1, out_features), jnp.float32,
                                minval=-bound, maxval=bound)
    # Zero-pad the head to 128 output lanes for a lane-dense (unmasked) store.
    w_head_p = jnp.zeros((in_features, HEAD_PAD), jnp.bfloat16)
    w_head_p = w_head_p.at[:, :out_features].set(w_head)
    b_head_p = jnp.zeros((1, HEAD_PAD), jnp.float32)
    b_head_p = b_head_p.at[:, :out_features].set(b_head)

    return dict(w_stack=w_stack, b_stack=b_stack,
                w_head=w_head_p, b_head=b_head_p,
                w_head_raw=w_head, b_head_raw=b_head)


def mlp_forward(x, params):
    B = x.shape[0]
    x = x.reshape(B, -1).astype(jnp.float32)   # torch.flatten(x, start_dim=1)
    # Pad the batch to a multiple of 8 rows (f32 sublane alignment); the extra
    # rows ride for free on the weight stream and are sliced off below.
    Bp = max(8, ((B + 7) // 8) * 8)
    if Bp != B:
        x = jnp.pad(x, ((0, Bp - B), (0, 0)))
    out = fused_mlp(x, params["w_stack"], params["b_stack"],
                    params["w_head"], params["b_head"])
    return out[:B, :OUT_FEATURES]


if __name__ == "__main__":
    key = jax.random.PRNGKey(0)
    k_params, k_x = jax.random.split(key)

    num_layers = 3  # 2 hidden (784->784 + ReLU) + final (784->10)
    params = init_mlp_params(k_params, num_layers)

    # Small batch, MNIST-like NCHW input.
    x = jax.random.normal(k_x, (2, 1, 28, 28), jnp.float32)

    out = jax.block_until_ready(mlp_forward(x, params))
    assert out.shape == (2, OUT_FEATURES)

    # Pure-JAX reference with identical bf16-weight / f32-accumulate numerics.
    ref = x.reshape(2, -1)
    for l in range(params["w_stack"].shape[0]):
        ref = jnp.dot(ref.astype(jnp.bfloat16), params["w_stack"][l],
                      preferred_element_type=jnp.float32)
        ref = jnp.maximum(ref + params["b_stack"][l], 0.0)
    ref = jnp.dot(ref.astype(jnp.bfloat16), params["w_head_raw"],
                  preferred_element_type=jnp.float32) + params["b_head_raw"]

    assert jnp.allclose(out, ref, atol=5e-3, rtol=5e-3), (
        float(jnp.max(jnp.abs(out - ref))))

    print("KERNEL_OK")
</pallas_src>

<mosaic_0001>
module attributes {stable_mosaic.version = 11 : i64} {
  func.func @kernel(%arg0: i32, %arg1: memref<8x784xf32, #tpu.memory_space<vmem>>, %arg2: memref<2x784x784xbf16, #tpu.memory_space<vmem>>, %arg3: memref<2x1x784xf32, #tpu.memory_space<vmem>>, %arg4: memref<784x128xbf16, #tpu.memory_space<vmem>>, %arg5: memref<1x128xf32, #tpu.memory_space<vmem>>, %arg6: memref<8x128xf32, #tpu.memory_space<vmem>>, %arg7: memref<8x784xbf16, #tpu.memory_space<vmem>>) attributes {dimension_semantics = [#tpu.dimension_semantics<arbitrary>], iteration_bounds = array<i64: 1>, scalar_prefetch = 0 : i64, scratch_operands = 1 : i64, tpu.core_type = #tpu.core_type<tc>, window_params = [{pipeline_mode = #tpu.pipeline_mode<synchronous>, transform_indices = @transform_0, window_bounds = array<i64: 8, 784>}, {transform_indices = @transform_1, window_bounds = array<i64: 2, 784, 784>}, {transform_indices = @transform_2, window_bounds = array<i64: 2, 1, 784>}, {pipeline_mode = #tpu.pipeline_mode<synchronous>, transform_indices = @transform_3, window_bounds = array<i64: 784, 128>}, {pipeline_mode = #tpu.pipeline_mode<synchronous>, transform_indices = @transform_4, window_bounds = array<i64: 1, 128>}, {pipeline_mode = #tpu.pipeline_mode<synchronous>, transform_indices = @transform_5, window_bounds = array<i64: 8, 128>}]} {
    %c0_i32 = arith.constant 0 : i32
    %0 = arith.cmpi eq, %arg0, %c0_i32 : i32
    %c0_i32_0 = arith.constant 0 : i32
    %1 = arith.cmpi sgt, %arg0, %c0_i32_0 : i32
    %2 = arith.extui %0 : i1 to i32
    %c0_i32_1 = arith.constant 0 : i32
    %3 = arith.cmpi ne, %2, %c0_i32_1 : i32
    scf.if %3 {
      %c0_14 = arith.constant 0 : index
      %c0_15 = arith.constant 0 : index
      %21 = vector.load %arg1[%c0_14, %c0_15] : memref<8x784xf32, #tpu.memory_space<vmem>>, vector<8x784xf32>
      %22 = arith.truncf %21 : vector<8x784xf32> to vector<8x784xbf16>
      %c0_16 = arith.constant 0 : index
      %c0_17 = arith.constant 0 : index
      %c0_18 = arith.constant 0 : index
      %23 = vector.load %arg2[%c0_16, %c0_17, %c0_18] : memref<2x784x784xbf16, #tpu.memory_space<vmem>>, vector<1x784x784xbf16>
      %24 = vector.shape_cast %23 : vector<1x784x784xbf16> to vector<784x784xbf16>
      %cst_19 = arith.constant dense<0.000000e+00> : vector<8x784xf32>
      %25 = tpu.matmul %22, %24, %cst_19 {dimension_numbers = #tpu.dot_dimension_numbers<[1], [0], [0], [1], [0, 0, 1, 1], [], []>} : vector<8x784xbf16>, vector<784x784xbf16>, vector<8x784xf32> -> vector<8x784xf32>
      %c0_20 = arith.constant 0 : index
      %c0_21 = arith.constant 0 : index
      %c0_22 = arith.constant 0 : index
      %26 = vector.load %arg3[%c0_20, %c0_21, %c0_22] : memref<2x1x784xf32, #tpu.memory_space<vmem>>, vector<1x1x784xf32>
      %27 = vector.shape_cast %26 : vector<1x1x784xf32> to vector<1x784xf32>
      %28 = vector.broadcast %27 : vector<1x784xf32> to vector<8x784xf32>
      %29 = arith.addf %25, %28 : vector<8x784xf32>
      %cst_23 = arith.constant 0.000000e+00 : f32
      %30 = vector.broadcast %cst_23 : f32 to vector<8x784xf32>
      %31 = arith.maximumf %29, %30 : vector<8x784xf32>
      %32 = arith.truncf %31 : vector<8x784xf32> to vector<8x784xbf16>
      %c0_24 = arith.constant 0 : index
      %c0_25 = arith.constant 0 : index
      %33 = vector.load %arg7[%c0_24, %c0_25] : memref<8x784xbf16, #tpu.memory_space<vmem>>, vector<8x784xbf16>
      tpu.vector_store %arg7[%c0_24, %c0_25], %32 {strides = array<i32>} : memref<8x784xbf16, #tpu.memory_space<vmem>>, vector<8x784xbf16>,
    } else {
    }
    %4 = arith.extui %1 : i1 to i32
    %c0_i32_2 = arith.constant 0 : i32
    %5 = arith.cmpi ne, %4, %c0_i32_2 : i32
    scf.if %5 {
      %c0_14 = arith.constant 0 : index
      %c0_15 = arith.constant 0 : index
      %21 = vector.load %arg7[%c0_14, %c0_15] : memref<8x784xbf16, #tpu.memory_space<vmem>>, vector<8x784xbf16>
      %c0_16 = arith.constant 0 : index
      %c0_17 = arith.constant 0 : index
      %c0_18 = arith.constant 0 : index
      %22 = vector.load %arg2[%c0_16, %c0_17, %c0_18] : memref<2x784x784xbf16, #tpu.memory_space<vmem>>, vector<1x784x784xbf16>
      %23 = vector.shape_cast %22 : vector<1x784x784xbf16> to vector<784x784xbf16>
      %cst_19 = arith.constant dense<0.000000e+00> : vector<8x784xf32>
      %24 = tpu.matmul %21, %23, %cst_19 {dimension_numbers = #tpu.dot_dimension_numbers<[1], [0], [0], [1], [0, 0, 1, 1], [], []>} : vector<8x784xbf16>, vector<784x784xbf16>, vector<8x784xf32> -> vector<8x784xf32>
      %c0_20 = arith.constant 0 : index
      %c0_21 = arith.constant 0 : index
      %c0_22 = arith.constant 0 : index
      %25 = vector.load %arg3[%c0_20, %c0_21, %c0_22] : memref<2x1x784xf32, #tpu.memory_space<vmem>>, vector<1x1x784xf32>
      %26 = vector.shape_cast %25 : vector<1x1x784xf32> to vector<1x784xf32>
      %27 = vector.broadcast %26 : vector<1x784xf32> to vector<8x784xf32>
      %28 = arith.addf %24, %27 : vector<8x784xf32>
      %cst_23 = arith.constant 0.000000e+00 : f32
      %29 = vector.broadcast %cst_23 : f32 to vector<8x784xf32>
      %30 = arith.maximumf %28, %29 : vector<8x784xf32>
      %31 = arith.truncf %30 : vector<8x784xf32> to vector<8x784xbf16>
      %c0_24 = arith.constant 0 : index
      %c0_25 = arith.constant 0 : index
      %32 = vector.load %arg7[%c0_24, %c0_25] : memref<8x784xbf16, #tpu.memory_space<vmem>>, vector<8x784xbf16>
      tpu.vector_store %arg7[%c0_24, %c0_25], %31 {strides = array<i32>} : memref<8x784xbf16, #tpu.memory_space<vmem>>, vector<8x784xbf16>,
    } else {
    }
    %c0 = arith.constant 0 : index
    %c0_3 = arith.constant 0 : index
    %6 = vector.load %arg7[%c0, %c0_3] : memref<8x784xbf16, #tpu.memory_space<vmem>>, vector<8x784xbf16>
    %c1 = arith.constant 1 : index
    %c0_4 = arith.constant 0 : index
    %c0_5 = arith.constant 0 : index
    %7 = vector.load %arg2[%c1, %c0_4, %c0_5] : memref<2x784x784xbf16, #tpu.memory_space<vmem>>, vector<1x784x784xbf16>
    %8 = vector.shape_cast %7 : vector<1x784x784xbf16> to vector<784x784xbf16>
    %cst = arith.constant dense<0.000000e+00> : vector<8x784xf32>
    %9 = tpu.matmul %6, %8, %cst {dimension_numbers = #tpu.dot_dimension_numbers<[1], [0], [0], [1], [0, 0, 1, 1], [], []>} : vector<8x784xbf16>, vector<784x784xbf16>, vector<8x784xf32> -> vector<8x784xf32>
    %c1_6 = arith.constant 1 : index
    %c0_7 = arith.constant 0 : index
    %c0_8 = arith.constant 0 : index
    %10 = vector.load %arg3[%c1_6, %c0_7, %c0_8] : memref<2x1x784xf32, #tpu.memory_space<vmem>>, vector<1x1x784xf32>
    %11 = vector.shape_cast %10 : vector<1x1x784xf32> to vector<1x784xf32>
    %12 = vector.broadcast %11 : vector<1x784xf32> to vector<8x784xf32>
    %13 = arith.addf %9, %12 : vector<8x784xf32>
    %cst_9 = arith.constant 0.000000e+00 : f32
    %14 = vector.broadcast %cst_9 : f32 to vector<8x784xf32>
    %15 = arith.maximumf %13, %14 : vector<8x784xf32>
    %16 = arith.truncf %15 : vector<8x784xf32> to vector<8x784xbf16>
    %c0_10 = arith.constant 0 : index
    %c0_11 = arith.constant 0 : index
    %17 = vector.load %arg7[%c0_10, %c0_11] : memref<8x784xbf16, #tpu.memory_space<vmem>>, vector<8x784xbf16>
    tpu.vector_store %arg7[%c0_10, %c0_11], %16 {strides = array<i32>} : memref<8x784xbf16, #tpu.memory_space<vmem>>, vector<8x784xbf16>,
    %c0_i32_12 = arith.constant 0 : i32
    %18 = arith.cmpi eq, %arg0, %c0_i32_12 : i32
    %19 = arith.extui %18 : i1 to i32
    %c0_i32_13 = arith.constant 0 : i32
    %20 = arith.cmpi ne, %19, %c0_i32_13 : i32
    scf.if %20 {
      %c0_14 = arith.constant 0 : index
      %c0_15 = arith.constant 0 : index
      %21 = vector.load %arg7[%c0_14, %c0_15] : memref<8x784xbf16, #tpu.memory_space<vmem>>, vector<8x784xbf16>
      %c0_16 = arith.constant 0 : index
      %c0_17 = arith.constant 0 : index
      %22 = vector.load %arg4[%c0_16, %c0_17] : memref<784x128xbf16, #tpu.memory_space<vmem>>, vector<784x128xbf16>
      %cst_18 = arith.constant dense<0.000000e+00> : vector<8x128xf32>
      %23 = tpu.matmul %21, %22, %cst_18 {dimension_numbers = #tpu.dot_dimension_numbers<[1], [0], [0], [1], [0, 0, 1, 1], [], []>} : vector<8x784xbf16>, vector<784x128xbf16>, vector<8x128xf32> -> vector<8x128xf32>
      %c0_19 = arith.constant 0 : index
      %c0_20 = arith.constant 0 : index
      %24 = vector.load %arg5[%c0_19, %c0_20] : memref<1x128xf32, #tpu.memory_space<vmem>>, vector<1x128xf32>
      %25 = vector.broadcast %24 : vector<1x128xf32> to vector<8x128xf32>
      %26 = arith.addf %23, %25 : vector<8x128xf32>
      %c0_21 = arith.constant 0 : index
      %c0_22 = arith.constant 0 : index
      %27 = vector.load %arg6[%c0_21, %c0_22] : memref<8x128xf32, #tpu.memory_space<vmem>>, vector<8x128xf32>
      tpu.vector_store %arg6[%c0_21, %c0_22], %26 {strides = array<i32>} : memref<8x128xf32, #tpu.memory_space<vmem>>, vector<8x128xf32>,
    } else {
    }
    return
  }
  func.func @transform_0(%arg0: i32) -> (i32, i32) {
    %c0_i32 = arith.constant 0 : i32
    %c0_i32_0 = arith.constant 0 : i32
    %c0_i32_1 = arith.constant 0 : i32
    return %c0_i32, %c0_i32_0 : i32, i32
  }
  func.func @transform_1(%arg0: i32) -> (i32, i32, i32) {
    %c0_i32 = arith.constant 0 : i32
    %c0_i32_0 = arith.constant 0 : i32
    %c0_i32_1 = arith.constant 0 : i32
    return %arg0, %c0_i32, %c0_i32_0 : i32, i32, i32
  }
  func.func @transform_2(%arg0: i32) -> (i32, i32, i32) {
    %c0_i32 = arith.constant 0 : i32
    %c0_i32_0 = arith.constant 0 : i32
    %c0_i32_1 = arith.constant 0 : i32
    return %arg0, %c0_i32, %c0_i32_0 : i32, i32, i32
  }
  func.func @transform_3(%arg0: i32) -> (i32, i32) {
    %c0_i32 = arith.constant 0 : i32
    %c0_i32_0 = arith.constant 0 : i32
    %c0_i32_1 = arith.constant 0 : i32
    return %c0_i32, %c0_i32_0 : i32, i32
  }
  func.func @transform_4(%arg0: i32) -> (i32, i32) {
    %c0_i32 = arith.constant 0 : i32
    %c0_i32_0 = arith.constant 0 : i32
    %c0_i32_1 = arith.constant 0 : i32
    return %c0_i32, %c0_i32_0 : i32, i32
  }
  func.func @transform_5(%arg0: i32) -> (i32, i32) {
    %c0_i32 = arith.constant 0 : i32
    %c0_i32_0 = arith.constant 0 : i32
    %c0_i32_1 = arith.constant 0 : i32
    return %c0_i32, %c0_i32_0 : i32, i32
  }
}

</mosaic_0001>

<bundles_post_ra>
// kernel: tpu_custom_call.1
= control target key start
LH: loop header
LB: loop body
LE: loop exit
PB: predicated region body
PF: predicated region fallthrough
CT: control target
= control target key end

     0   :  { %10 = vsyncpa [#allocation4], 0  ;;  %s15169_s0 = inlined_call_operand.hbm [shape: f32[8,784], index: 0, kind: input, shape index: {}]   ;;  %s15170_s1 = inlined_call_operand.hbm [shape: bf16[2,784,784], index: 1, kind: input, shape index: {}]   ;;  %s15171_s2 = inlined_call_operand.hbm [shape: f32[2,1,784], index: 2, kind: input, shape index: {}]   ;;  %s15172_s3 = inlined_call_operand.hbm [shape: bf16[784,128], index: 3, kind: input, shape index: {}]   ;;  %s15173_s4 = inlined_call_operand.hbm [shape: f32[1,128], index: 4, kind: input, shape index: {}]   ;;  %s15174_s5 = inlined_call_operand.hbm [shape: f32[8,128], index: 5, kind: output, shape index: {}]  }
   0x1   :  { %11 = vsyncpa [#allocation7], 0 }
   0x2   :  { %12 = vsyncpa [#allocation10], 0  ;;  %s29_s20 = sshll.u32 %s15170_s1, 4  ;;  %s30_s20 = int_to_ptr.hbm [resolvable:$true] %s29_s20 }
   0x3   :  { %13 = vsyncpa [#allocation5], 0  ;;  %s14783_s21 = smov [#allocation6]   ;;  %s55_s25 = sshll.u32 %s15172_s3, 4  ;;  %s56_s25 = int_to_ptr.hbm [resolvable:$true] %s55_s25 }
   0x4   :  { %s31_s22 = sshll.u32 %s14783_s21, 4  ;;  %s14784_s26 = smov 448   ;;  %s32_s22 = int_to_ptr.vmem [resolvable:$true] %s31_s22 }
   0x5   :  { %s14785_s27 = smov 28   ;;  %s14786_s28 = smov [#allocation9]  }
   0x6   :  { %37 = dma.hbm_to_vmem [thread:$0]  %s30_s20, 87808, %s32_s22, [#allocation7], %s14784_s26, %s14784_s26, %s14785_s27  }
   0x7   :  { %s57_s29 = sshll.u32 %s14786_s28, 4  ;;  %s14787_s30 = smov 64   ;;  %s58_s29 = int_to_ptr.vmem [resolvable:$true] %s57_s29 }
   0x8   :  { %s14788_s6 = smov 4   ;;  %s19_s8 = sshll.u32 %s15169_s0, 4  ;;  %s20_s8 = int_to_ptr.hbm [resolvable:$true] %s19_s8 }
   0x9   :  { %63 = dma.hbm_to_vmem [thread:$0]  %s56_s25, 6272, %s58_s29, [#allocation10], %s14787_s30, %s14787_s30, %s14788_s6  }
   0xa   :  { %s14789_s9 = smov [#allocation3]   ;;  %s42_s12 = sshll.u32 %s15171_s2, 4  ;;  %s43_s12 = int_to_ptr.hbm [resolvable:$true] %s42_s12 }
   0xb   :  { %s21_s10 = sshll.u32 %s14789_s9, 4  ;;  %s14790_s13 = smov [#allocation8]   ;;  %s22_s10 = int_to_ptr.vmem [resolvable:$true] %s21_s10 }
   0xc   :  { %24 = dma.hbm_to_vmem [thread:$0]  %s20_s8, 896, %s22_s10, [#allocation4]  }
   0xd   :  { %s44_s14 = sshll.u32 %s14790_s13, 4  ;;  %s14791_s15 = smov 112   ;;  %s45_s14 = int_to_ptr.vmem [resolvable:$true] %s44_s14 }
   0xe   :  { %s14792_s16 = smov 7   ;;  %s69_s0 = sshll.u32 %s15173_s4, 4  ;;  %s70_s0 = int_to_ptr.hbm [resolvable:$true] %s69_s0 }
   0xf   :  { %50 = dma.hbm_to_vmem [thread:$0]  %s43_s12, 224, %s45_s14, [#allocation7], %s14791_s15, %s14791_s15, %s14792_s16  }
  0x10   :  { %s14793_s19 = smov [#allocation11]  }
  0x11   :  { %s71_s20 = sshll.u32 %s14793_s19, 4  ;;  %s72_s20 = int_to_ptr.vmem [resolvable:$true] %s71_s20 }
  0x12   :  { %74 = dma.hbm_to_vmem [thread:$0]  %s70_s0, 16, %s72_s20, [#allocation10]  }
  0x13   :  { %14775 = dma.done.wait [#allocation4], 896  }
  0x14   :  { %14776 = vsyncadd [#allocation4], 4294966400 }
  0x15   :  { %14777 = dma.done.wait [#allocation7], 88032  }
  0x16   :  { %14778 = vsyncadd [#allocation7], 4294879264 }
  0x17   :  { %14779 = dma.done.wait [#allocation10], 6288  }
  0x18   :  { %14780 = vsyncadd [#allocation10], 4294961008  ;;  %v9402_v0 = vld [vmem:[#allocation6 + $0x188] sm:$0xf]  ;;  %v13590_v1 = vld [vmem:[#allocation6 + $0x1a0] sm:$0xf0] }
  0x19   :  { %v9626_v2 = vld [vmem:[#allocation6 + $0x348] sm:$0xf]  ;;  %v9403_v3 = vor.u32 %v13590_v1, %v9402_v0  ;;  %v13646_v4 = vld [vmem:[#allocation6 + $0x360] sm:$0xf0]  ;;  %v9374_v11 = vld [vmem:[#allocation6 + $0x150] sm:$0xf] }
  0x1a   :  { %v9850_v5 = vld [vmem:[#allocation6 + $0x508] sm:$0xf]  ;;  %v13702_v6 = vld [vmem:[#allocation6 + $0x520] sm:$0xf0]  ;;  %v9627_v7 = vor.u32 %v13646_v4, %v9626_v2  ;;  %v13583_v13 = vld [vmem:[#allocation6 + $0x168] sm:$0xf0] }
  0x1b   :  { %v9851_v8 = vor.u32 %v13702_v6, %v9850_v5  ;;  %v10074_v9 = vld [vmem:[#allocation6 + $0x6c8] sm:$0xf]  ;;  %v13758_v10 = vld [vmem:[#allocation6 + $0x6e0] sm:$0xf0]  ;;  %2291 = vmatpush.bf16.msra.mxu0 %v9403_v3  ;;  %v9598_v14 = vld [vmem:[#allocation6 + $0x310] sm:$0xf]  ;;  %v9375_v16 = vor.u32 %v13583_v13, %v9374_v11 }
  0x1c   :  { %v10075_v12 = vor.u32 %v13758_v10, %v10074_v9  ;;  %v13639_v15 = vld [vmem:[#allocation6 + $0x328] sm:$0xf0]  ;;  %2304 = vmatpush.bf16.msra.mxu1 %v9627_v7  ;;  %v9822_v18 = vld [vmem:[#allocation6 + $0x4d0] sm:$0xf]  ;;  %v9346_v23 = vld [vmem:[#allocation6 + $0x118] sm:$0xf] }
  0x1d   :  { %2317 = vmatpush.bf16.msra.mxu2 %v9851_v8  ;;  %v9599_v17 = vor.u32 %v13639_v15, %v9598_v14  ;;  %v13695_v19 = vld [vmem:[#allocation6 + $0x4e8] sm:$0xf0]  ;;  %v10046_v20 = vld [vmem:[#allocation6 + $0x690] sm:$0xf]  ;;  %v13576_v24 = vld [vmem:[#allocation6 + $0x130] sm:$0xf0] }
  0x1e   :  { %2330 = vmatpush.bf16.msra.mxu3 %v10075_v12  ;;  %v9823_v21 = vor.u32 %v13695_v19, %v9822_v18  ;;  %v13751_v22 = vld [vmem:[#allocation6 + $0x6a8] sm:$0xf0]  ;;  %v9570_v26 = vld [vmem:[#allocation6 + $0x2d8] sm:$0xf]  ;;  %v13632_v27 = vld [vmem:[#allocation6 + $0x2f0] sm:$0xf0]  ;;  %v9347_v29 = vor.u32 %v13576_v24, %v9346_v23 }
  0x1f   :  { %v10047_v25 = vor.u32 %v13751_v22, %v10046_v20  ;;  %v9794_v28 = vld [vmem:[#allocation6 + $0x498] sm:$0xf]  ;;  %2292 = vmatpush.bf16.msra.mxu0 %v9375_v16  ;;  %v13688_v30 = vld [vmem:[#allocation6 + $0x4b0] sm:$0xf0]  ;;  %v9571_v33 = vor.u32 %v13632_v27, %v9570_v26  ;;  %v9318_v35 = vld [vmem:[#allocation6 + $0xe0] sm:$0xf] }
  0x20   :  { %v10018_v31 = vld [vmem:[#allocation6 + $0x658] sm:$0xf]  ;;  %v13744_v32 = vld [vmem:[#allocation6 + $0x670] sm:$0xf0]  ;;  %2305 = vmatpush.bf16.msra.mxu1 %v9599_v17  ;;  %v9795_v34 = vor.u32 %v13688_v30, %v9794_v28  ;;  %v13569_v36 = vld [vmem:[#allocation6 + $0xf8] sm:$0xf0] }
  0x21   :  { %2318 = vmatpush.bf16.msra.mxu2 %v9823_v21  ;;  %v9542_v37 = vld [vmem:[#allocation6 + $0x2a0] sm:$0xf]  ;;  %v10019_v38 = vor.u32 %v13744_v32, %v10018_v31  ;;  %v13625_v39 = vld [vmem:[#allocation6 + $0x2b8] sm:$0xf0]  ;;  %v9319_v44 = vor.u32 %v13569_v36, %v9318_v35  ;;  %v9290_v47 = vld [vmem:[#allocation6 + $0xa8] sm:$0xf] }
  0x22   :  { %2331 = vmatpush.bf16.msra.mxu3 %v10047_v25  ;;  %v9766_v40 = vld [vmem:[#allocation6 + $0x460] sm:$0xf]  ;;  %v13681_v41 = vld [vmem:[#allocation6 + $0x478] sm:$0xf0]  ;;  %v9543_v45 = vor.u32 %v13625_v39, %v9542_v37  ;;  %v13562_v48 = vld [vmem:[#allocation6 + $0xc0] sm:$0xf0] }
  0x23   :  { %v9990_v42 = vld [vmem:[#allocation6 + $0x620] sm:$0xf]  ;;  %v13737_v43 = vld [vmem:[#allocation6 + $0x638] sm:$0xf0]  ;;  %2293 = vmatpush.bf16.msra.mxu0 %v9347_v29  ;;  %v9767_v46 = vor.u32 %v13681_v41, %v9766_v40  ;;  %v9514_v49 = vld [vmem:[#allocation6 + $0x268] sm:$0xf]  ;;  %v9291_v56 = vor.u32 %v13562_v48, %v9290_v47 }
  0x24   :  { %2306 = vmatpush.bf16.msra.mxu1 %v9571_v33  ;;  %v9991_v50 = vor.u32 %v13737_v43, %v9990_v42  ;;  %v13618_v51 = vld [vmem:[#allocation6 + $0x280] sm:$0xf0]  ;;  %v9738_v52 = vld [vmem:[#allocation6 + $0x428] sm:$0xf]  ;;  %v9262_v59 = vld [vmem:[#allocation6 + $0x70] sm:$0xf] }
  0x25   :  { %2319 = vmatpush.bf16.msra.mxu2 %v9795_v34  ;;  %v13674_v53 = vld [vmem:[#allocation6 + $0x440] sm:$0xf0]  ;;  %v9962_v54 = vld [vmem:[#allocation6 + $0x5e8] sm:$0xf]  ;;  %v9515_v57 = vor.u32 %v13618_v51, %v9514_v49  ;;  %v13555_v60 = vld [vmem:[#allocation6 + $0x88] sm:$0xf0] }
  0x26   :  { %2332 = vmatpush.bf16.msra.mxu3 %v10019_v38  ;;  %v13730_v55 = vld [vmem:[#allocation6 + $0x600] sm:$0xf0]  ;;  %v9739_v58 = vor.u32 %v13674_v53, %v9738_v52  ;;  %v9486_v61 = vld [vmem:[#allocation6 + $0x230] sm:$0xf]  ;;  %v13611_v63 = vld [vmem:[#allocation6 + $0x248] sm:$0xf0]  ;;  %v9263_v4 = vor.u32 %v13555_v60, %v9262_v59 }
  0x27   :  { %2294 = vmatpush.bf16.msra.mxu0 %v9319_v44  ;;  %v9963_v62 = vor.u32 %v13730_v55, %v9962_v54  ;;  %v9710_v0 = vld [vmem:[#allocation6 + $0x3f0] sm:$0xf]  ;;  %v13667_v1 = vld [vmem:[#allocation6 + $0x408] sm:$0xf0]  ;;  %v9487_v5 = vor.u32 %v13611_v63, %v9486_v61  ;;  %v9234_v7 = vld [vmem:[#allocation6 + $0x38] sm:$0xf] }
  0x28   :  { %2307 = vmatpush.bf16.msra.mxu1 %v9543_v45  ;;  %v9934_v2 = vld [vmem:[#allocation6 + $0x5b0] sm:$0xf]  ;;  %v13723_v3 = vld [vmem:[#allocation6 + $0x5c8] sm:$0xf0]  ;;  %v9711_v6 = vor.u32 %v13667_v1, %v9710_v0  ;;  %v13548_v8 = vld [vmem:[#allocation6 + $0x50] sm:$0xf0] }
  0x29   :  { %2320 = vmatpush.bf16.msra.mxu2 %v9767_v46  ;;  %v9458_v9 = vld [vmem:[#allocation6 + $0x1f8] sm:$0xf]  ;;  %v9935_v10 = vor.u32 %v13723_v3, %v9934_v2  ;;  %v13604_v11 = vld [vmem:[#allocation6 + $0x210] sm:$0xf0]  ;;  %v9235_v16 = vor.u32 %v13548_v8, %v9234_v7  ;;  %v9206_v17 = vld [vmem:[#allocation6] sm:$0xf] }
  0x2a   :  { %2333 = vmatpush.bf16.msra.mxu3 %v9991_v50  ;;  %v9682_v12 = vld [vmem:[#allocation6 + $0x3b8] sm:$0xf]  ;;  %v13660_v13 = vld [vmem:[#allocation6 + $0x3d0] sm:$0xf0]  ;;  %v13541_v18 = vld [vmem:[#allocation6 + $0x18] sm:$0xf0]  ;;  %v9459_v19 = vor.u32 %v13604_v11, %v9458_v9 }
  0x2b   :  { %2295 = vmatpush.bf16.msra.mxu0 %v9291_v56  ;;  %v9906_v14 = vld [vmem:[#allocation6 + $0x578] sm:$0xf]  ;;  %v13716_v15 = vld [vmem:[#allocation6 + $0x590] sm:$0xf0]  ;;  %v9683_v20 = vor.u32 %v13660_v13, %v9682_v12  ;;  %v9430_v21 = vld [vmem:[#allocation6 + $0x1c0] sm:$0xf]  ;;  %v9207_v31 = vor.u32 %v13541_v18, %v9206_v17 }
  0x2c   :  { %2308 = vmatpush.bf16.msra.mxu1 %v9515_v57  ;;  %v13597_v22 = vld [vmem:[#allocation6 + $0x1d8] sm:$0xf0]  ;;  %v9654_v23 = vld [vmem:[#allocation6 + $0x380] sm:$0xf]  ;;  %v9907_v24 = vor.u32 %v13716_v15, %v9906_v14  ;;  %v10298_v28 = vld [vmem:[#allocation6 + $0x888] sm:$0xf] }
  0x2d   :  { %2321 = vmatpush.bf16.msra.mxu2 %v9739_v58  ;;  %v13653_v25 = vld [vmem:[#allocation6 + $0x398] sm:$0xf0]  ;;  %v9878_v26 = vld [vmem:[#allocation6 + $0x540] sm:$0xf]  ;;  %v13814_v29 = vld [vmem:[#allocation6 + $0x8a0] sm:$0xf0]  ;;  %v9431_v35 = vor.u32 %v13597_v22, %v9430_v21 }
  0x2e   :  { %2334 = vmatpush.bf16.msra.mxu3 %v9963_v62  ;;  %v13709_v27 = vld [vmem:[#allocation6 + $0x558] sm:$0xf0]  ;;  %v10522_v30 = vld [vmem:[#allocation6 + $0xa48] sm:$0xf]  ;;  %v13870_v32 = vld [vmem:[#allocation6 + $0xa60] sm:$0xf0]  ;;  %v9655_v36 = vor.u32 %v13653_v25, %v9654_v23  ;;  %v10299_v40 = vor.u32 %v13814_v29, %v10298_v28 }
  0x2f   :  { %2296 = vmatpush.bf16.msra.mxu0 %v9263_v4  ;;  %v13587_v33 = vld [vmem:[#allocation6 + $0x18c] sm:$0xf]  ;;  %v9404_v34 = vld [vmem:[#allocation6 + $0x1a4] sm:$0xf0]  ;;  %v10550_v37 = vld [vmem:[#allocation6 + $0xa80] sm:$0xf]  ;;  %v9879_v39 = vor.u32 %v13709_v27, %v9878_v26  ;;  %v10523_v44 = vor.u32 %v13870_v32, %v10522_v30 }
  0x30   :  { %2309 = vmatpush.bf16.msra.mxu1 %v9487_v5  ;;  %v13877_v38 = vld [vmem:[#allocation6 + $0xa98] sm:$0xf0]  ;;  %v13643_v42 = vld [vmem:[#allocation6 + $0x34c] sm:$0xf]  ;;  %v9628_v43 = vld [vmem:[#allocation6 + $0x364] sm:$0xf0]  ;;  %v9407_v45 = vor.u32 %v13587_v33, %v9404_v34 }
  0x31   :  { %2322 = vmatpush.bf16.msra.mxu2 %v9711_v6  ;;  %v103_v41 = vld [vmem:[#allocation3 + $0x10] sm:$0xff]  ;;  %v10270_v46 = vld [vmem:[#allocation6 + $0x850] sm:$0xf]  ;;  %v13807_v47 = vld [vmem:[#allocation6 + $0x868] sm:$0xf0]  ;;  %v10551_v49 = vor.u32 %v13877_v38, %v10550_v37  ;;  %v9631_v54 = vor.u32 %v13643_v42, %v9628_v43  ;;  %vm2287_vm0 = vcmask 130048  }
  0x32   :  { %2335 = vmatpush.bf16.msra.mxu3 %v9935_v10  ;;  %v10494_v48 = vld [vmem:[#allocation6 + $0xa10] sm:$0xf]  ;;  %v13863_v50 = vld [vmem:[#allocation6 + $0xa28] sm:$0xf0]  ;;  %v13580_v51 = vld [vmem:[#allocation6 + $0x154] sm:$0xf]  ;;  %v14840_v53 = vpack.c.bf16 %v103_v41, %v103_v41  ;;  %v10271_v55 = vor.u32 %v13807_v47, %v10270_v46 }
  0x33   :  { %2297 = vmatpush.bf16.msra.mxu0 %v9235_v16  ;;  %v9376_v52 = vld [vmem:[#allocation6 + $0x16c] sm:$0xf0]  ;;  %v13636_v56 = vld [vmem:[#allocation6 + $0x314] sm:$0xf]  ;;  %v10242_v58 = vld [vmem:[#allocation6 + $0x818] sm:$0xf]  ;;  %v10495_v59 = vor.u32 %v13863_v50, %v10494_v48 }
  0x34   :  { %2310 = vmatpush.bf16.msra.mxu1 %v9459_v19  ;;  %v9600_v57 = vld [vmem:[#allocation6 + $0x32c] sm:$0xf0]  ;;  %v9379_v60 = vor.u32 %v13580_v51, %v9376_v52  ;;  %v13800_v61 = vld [vmem:[#allocation6 + $0x830] sm:$0xf0]  ;;  %v10466_v62 = vld [vmem:[#allocation6 + $0x9d8] sm:$0xf] }
  0x35   :  { %2323 = vmatpush.bf16.msra.mxu2 %v9683_v20  ;;  %v13856_v63 = vld [vmem:[#allocation6 + $0x9f0] sm:$0xf0]  ;;  %v13573_v0 = vld [vmem:[#allocation6 + $0x11c] sm:$0xf]  ;;  %v9348_v1 = vld [vmem:[#allocation6 + $0x134] sm:$0xf0]  ;;  %v9603_v5 = vor.u32 %v13636_v56, %v9600_v57  ;;  %v10243_v6 = vor.u32 %v13800_v61, %v10242_v58 }
  0x36   :  { %2336 = vmatpush.bf16.msra.mxu3 %v9907_v24  ;;  %v101_v2 = vld [vmem:[#allocation3] sm:$0xff]  ;;  %v13629_v3 = vld [vmem:[#allocation6 + $0x2dc] sm:$0xf]  ;;  %v9572_v7 = vld [vmem:[#allocation6 + $0x2f4] sm:$0xf0]  ;;  %v10467_v10 = vor.u32 %v13856_v63, %v10466_v62  ;;  %v9351_v11 = vor.u32 %v13573_v0, %v9348_v1  ;;  %vm2942_vm1 = vcmask 125952  }
  0x37   :  { %2298 = vmatpush.bf16.msra.mxu0 %v9207_v31  ;;  %v14843_v4 = vpack.c.bf16 %v101_v2, %v101_v2  ;;  %v10214_v8 = vld [vmem:[#allocation6 + $0x7e0] sm:$0xf]  ;;  %v13793_v9 = vld [vmem:[#allocation6 + $0x7f8] sm:$0xf0]  ;;  %v102_v13 = vld [vmem:[#allocation3 + $0x8] sm:$0xff]  ;;  %v9575_v20 = vor.u32 %v13629_v3, %v9572_v7  ;;  %s14794_s2 = smov [#allocation12]  }
  0x38   :  { %2311 = vmatpush.bf16.msra.mxu1 %v9431_v35  ;;  %v10438_v12 = vld [vmem:[#allocation6 + $0x9a0] sm:$0xf]  ;;  %v13849_v15 = vld [vmem:[#allocation6 + $0x9b8] sm:$0xf0]  ;;  %v13566_v16 = vld [vmem:[#allocation6 + $0xe4] sm:$0xf]  ;;  %v14846_v18 = vpack.c.bf16 %v102_v13, %v102_v13  ;;  %v10215_v21 = vor.u32 %v13793_v9, %v10214_v8 }
  0x39   :  { %2324 = vmatpush.bf16.msra.mxu2 %v9655_v36  ;;  %v104_v14 = vld [vmem:[#allocation3 + $0x18] sm:$0xff]  ;;  %v10439_v24 = vor.u32 %v13849_v15, %v10438_v12  ;;  %v10186_v26 = vld [vmem:[#allocation6 + $0x7a8] sm:$0xf]  ;;  %v13559_v30 = vld [vmem:[#allocation6 + $0xac] sm:$0xf]  ;;  %s9190_s4 = sshll.u32 %s14794_s2, 4  ;;  %s9191_s4 = int_to_ptr.vmem [resolvable:$true] %s9190_s4 }
  0x3a   :  { %2337 = vmatpush.bf16.msra.mxu3 %v9879_v39  ;;  %v9320_v17 = vld [vmem:[#allocation6 + $0xfc] sm:$0xf0]  ;;  %2299 = vmatmul.bf16.vlgmr.msra.gmra.mxu0 %v14843_v4  ;;  %v14848_v19 = vpack.c.bf16 %v104_v14, %v104_v14  ;;  %v13622_v22 = vld [vmem:[#allocation6 + $0x2a4] sm:$0xf]  ;;  %v10410_v28 = vld [vmem:[#allocation6 + $0x968] sm:$0xf] }
  0x3b   :  { %2343 = vmatpush.bf16.msrb.mxu0 %v10299_v40  ;;  %v9544_v23 = vld [vmem:[#allocation6 + $0x2bc] sm:$0xf0]  ;;  %v9323_v25 = vor.u32 %v13566_v16, %v9320_v17  ;;  %v13786_v27 = vld [vmem:[#allocation6 + $0x7c0] sm:$0xf0]  ;;  %v9292_v31 = vld [vmem:[#allocation6 + $0xc4] sm:$0xf0]  ;;  %2312 = vmatmul.bf16.vlgmr.msra.gmra.mxu1 %v14846_v18 }
  0x3c   :  { %2356 = vmatpush.bf16.msrb.mxu1 %v10523_v44  ;;  %2325 = vmatmul.bf16.vlgmr.msra.gmra.mxu2 %v14840_v53  ;;  %v13842_v29 = vld [vmem:[#allocation6 + $0x980] sm:$0xf0]  ;;  %v9547_v32 = vor.u32 %v13622_v22, %v9544_v23  ;;  %v10187_v33 = vor.u32 %v13786_v27, %v10186_v26  ;;  %v13615_v34 = vld [vmem:[#allocation6 + $0x26c] sm:$0xf]  ;;  %v9516_v35 = vld [vmem:[#allocation6 + $0x284] sm:$0xf0]  ;;  %v9295_v38 = vor.u32 %v13559_v30, %v9292_v31 }
  0x3d   :  { %2376 = vmatpush.bf16.msrb.mxu2 %v10551_v49  ;;  %2338 = vmatmul.bf16.vlgmr.msra.gmra.mxu3 %v14848_v19  ;;  %v10158_v36 = vld [vmem:[#allocation6 + $0x770] sm:$0xf]  ;;  %v10411_v37 = vor.u32 %v13842_v29, %v10410_v28  ;;  %v13779_v39 = vld [vmem:[#allocation6 + $0x788] sm:$0xf0]  ;;  %v107_v41 = vld [vmem:[#allocation3 + $0x30] sm:$0xff]  ;;  %v9519_v46 = vor.u32 %v13615_v34, %v9516_v35  ;;  %s9192_s23 = sshll.u32 %s15174_s5, 4  ;;  %s9193_s23 = int_to_ptr.hbm [resolvable:$true] %s9192_s23 }
  0x3e   :  { %2382 = vmatpush.bf16.msrb.mxu3 %v9407_v45  ;;  %v10382_v40 = vld [vmem:[#allocation6 + $0x930] sm:$0xf]  ;;  %v13835_v42 = vld [vmem:[#allocation6 + $0x948] sm:$0xf0]  ;;  %v13552_v43 = vld [vmem:[#allocation6 + $0x74] sm:$0xf]  ;;  %v14852_v45 = vpack.c.bf16 %v107_v41, %v107_v41  ;;  %v10159_v47 = vor.u32 %v13779_v39, %v10158_v36 }
  0x3f   :  { %2344 = vmatpush.bf16.msrb.mxu0 %v10271_v55  ;;  %v9264_v44 = vld [vmem:[#allocation6 + $0x8c] sm:$0xf0]  ;;  %v13608_v48 = vld [vmem:[#allocation6 + $0x234] sm:$0xf]  ;;  %v10383_v50 = vor.u32 %v13835_v42, %v10382_v40  ;;  %v10130_v52 = vld [vmem:[#allocation6 + $0x738] sm:$0xf] }
  0x40   :  { %2357 = vmatpush.bf16.msrb.mxu1 %v10495_v59  ;;  %v9488_v49 = vld [vmem:[#allocation6 + $0x24c] sm:$0xf0]  ;;  %v9267_v51 = vor.u32 %v13552_v43, %v9264_v44  ;;  %v10354_v55 = vld [vmem:[#allocation6 + $0x8f8] sm:$0xf]  ;;  %v13828_v56 = vld [vmem:[#allocation6 + $0x910] sm:$0xf0] }
  0x41   :  { %2395 = vmatpush.bf16.msra.mxu2 %v9631_v54  ;;  %v13772_v54 = vld [vmem:[#allocation6 + $0x750] sm:$0xf0]  ;;  %v13545_v57 = vld [vmem:[#allocation6 + $0x3c] sm:$0xf]  ;;  %v9236_v58 = vld [vmem:[#allocation6 + $0x54] sm:$0xf0]  ;;  %v9491_v59 = vor.u32 %v13608_v48, %v9488_v49  ;;  %v10355_v0 = vor.u32 %v13828_v56, %v10354_v55 }
  0x42   :  { %2383 = vmatpush.bf16.msrb.mxu3 %v9379_v60  ;;  %v10131_v60 = vor.u32 %v13772_v54, %v10130_v52  ;;  %v13601_v61 = vld [vmem:[#allocation6 + $0x1fc] sm:$0xf]  ;;  %v9460_v62 = vld [vmem:[#allocation6 + $0x214] sm:$0xf0]  ;;  %v10102_v63 = vld [vmem:[#allocation6 + $0x700] sm:$0xf]  ;;  %v9239_v1 = vor.u32 %v13545_v57, %v9236_v58 }
  0x43   :  { %2345 = vmatpush.bf16.msrb.mxu0 %v10243_v6  ;;  %v13765_v2 = vld [vmem:[#allocation6 + $0x718] sm:$0xf0]  ;;  %v10326_v3 = vld [vmem:[#allocation6 + $0x8c0] sm:$0xf]  ;;  %v13538_v6 = vld [vmem:[#allocation6 + $0x4] sm:$0xf]  ;;  %v9463_v12 = vor.u32 %v13601_v61, %v9460_v62 }
  0x44   :  { %2358 = vmatpush.bf16.msrb.mxu1 %v10467_v10  ;;  %v9208_v7 = vld [vmem:[#allocation6 + $0x1c] sm:$0xf0]  ;;  %v13699_v8 = vld [vmem:[#allocation6 + $0x50c] sm:$0xf]  ;;  %v9852_v9 = vld [vmem:[#allocation6 + $0x524] sm:$0xf0]  ;;  %v10103_v13 = vor.u32 %v13765_v2, %v10102_v63 }
  0x45   :  { %2396 = vmatpush.bf16.msra.mxu2 %v9603_v5  ;;  %v13821_v5 = vld [vmem:[#allocation6 + $0x8d8] sm:$0xf0]  ;;  %v13755_v10 = vld [vmem:[#allocation6 + $0x6cc] sm:$0xf]  ;;  %v10300_v15 = vld [vmem:[#allocation6 + $0x8a4] sm:$0xf0] }
  0x46   :  { %2384 = vmatpush.bf16.msrb.mxu3 %v9351_v11  ;;  %v10076_v11 = vld [vmem:[#allocation6 + $0x6e4] sm:$0xf0]  ;;  %v13811_v14 = vld [vmem:[#allocation6 + $0x88c] sm:$0xf]  ;;  %v10327_v17 = vor.u32 %v13821_v5, %v10326_v3  ;;  %v9432_v22 = vld [vmem:[#allocation6 + $0x1dc] sm:$0xf0] }
  0x47   :  { %2346 = vmatpush.bf16.msrb.mxu0 %v10215_v21  ;;  %v105_v16 = vld [vmem:[#allocation3 + $0x20] sm:$0xff]  ;;  %v13594_v21 = vld [vmem:[#allocation6 + $0x1c4] sm:$0xf]  ;;  %v106_v23 = vld [vmem:[#allocation3 + $0x28] sm:$0xff]  ;;  %v10303_v29 = vor.u32 %v13811_v14, %v10300_v15 }
  0x48   :  { %2359 = vmatpush.bf16.msrb.mxu1 %v10439_v24  ;;  %v9855_v24 = vor.u32 %v13699_v8, %v9852_v9  ;;  %v13867_v26 = vld [vmem:[#allocation6 + $0xa4c] sm:$0xf]  ;;  %v10524_v27 = vld [vmem:[#allocation6 + $0xa64] sm:$0xf0]  ;;  %v13692_v28 = vld [vmem:[#allocation6 + $0x4d4] sm:$0xf]  ;;  %v9435_v34 = vor.u32 %v13594_v21, %v9432_v22 }
  0x49   :  { %2397 = vmatpush.bf16.msra.mxu2 %v9575_v20  ;;  %v9211_v20 = vor.u32 %v13538_v6, %v9208_v7  ;;  %v9824_v30 = vld [vmem:[#allocation6 + $0x4ec] sm:$0xf0]  ;;  %v13748_v31 = vld [vmem:[#allocation6 + $0x694] sm:$0xf]  ;;  %v13685_v43 = vld [vmem:[#allocation6 + $0x49c] sm:$0xf] }
  0x4a   :  { %2385 = vmatpush.bf16.msrb.mxu3 %v9323_v25  ;;  %v10079_v25 = vor.u32 %v13755_v10, %v10076_v11  ;;  %v13804_v35 = vld [vmem:[#allocation6 + $0x854] sm:$0xf]  ;;  %v10272_v36 = vld [vmem:[#allocation6 + $0x86c] sm:$0xf0]  ;;  %v9827_v39 = vor.u32 %v13692_v28, %v9824_v30  ;;  %v10020_v48 = vld [vmem:[#allocation6 + $0x674] sm:$0xf0] }
  0x4b   :  { %2347 = vmatpush.bf16.msrb.mxu0 %v10187_v33  ;;  %v14856_v33 = vpack.c.bf16 %v105_v16, %v105_v16  ;;  %v13860_v41 = vld [vmem:[#allocation6 + $0xa14] sm:$0xf]  ;;  %v10496_v42 = vld [vmem:[#allocation6 + $0xa2c] sm:$0xf0]  ;;  %v10275_v44 = vor.u32 %v13804_v35, %v10272_v36  ;;  %v13797_v49 = vld [vmem:[#allocation6 + $0x81c] sm:$0xf] }
  0x4c   :  { %2360 = vmatpush.bf16.msrb.mxu1 %v10411_v37  ;;  %10576 = vmatmul.msk.bf16.vlgmr.msrb.gmra.mxu2 %vm2287_vm0, %v14852_v45  ;;  %v14858_v37 = vpack.c.bf16 %v106_v23, %v106_v23  ;;  %v13853_v55 = vld [vmem:[#allocation6 + $0x9dc] sm:$0xf]  ;;  %v10468_v56 = vld [vmem:[#allocation6 + $0x9f4] sm:$0xf0]  ;;  %v13678_v57 = vld [vmem:[#allocation6 + $0x464] sm:$0xf] }
  0x4d   :  { %2398 = vmatpush.bf16.msra.mxu2 %v9547_v32  ;;  %v10048_v32 = vld [vmem:[#allocation6 + $0x6ac] sm:$0xf0]  ;;  %v9992_v61 = vld [vmem:[#allocation6 + $0x63c] sm:$0xf0]  ;;  %v13790_v62 = vld [vmem:[#allocation6 + $0x7e4] sm:$0xf] }
  0x4e   :  { %2386 = vmatpush.bf16.msrb.mxu3 %v9295_v38  ;;  %v10527_v38 = vor.u32 %v13867_v26, %v10524_v27  ;;  %v10051_v40 = vor.u32 %v13748_v31, %v10048_v32  ;;  %v10216_v63 = vld [vmem:[#allocation6 + $0x7fc] sm:$0xf0]  ;;  %v13846_v3 = vld [vmem:[#allocation6 + $0x9a4] sm:$0xf]  ;;  %v13671_v6 = vld [vmem:[#allocation6 + $0x42c] sm:$0xf] }
  0x4f   :  { %2348 = vmatpush.bf16.msrb.mxu0 %v10159_v47  ;;  %v13741_v47 = vld [vmem:[#allocation6 + $0x65c] sm:$0xf]  ;;  %v10440_v5 = vld [vmem:[#allocation6 + $0x9bc] sm:$0xf0]  ;;  %v10219_v7 = vor.u32 %v13790_v62, %v10216_v63  ;;  %v9740_v8 = vld [vmem:[#allocation6 + $0x444] sm:$0xf0] }
  0x50   :  { %2361 = vmatpush.bf16.msrb.mxu1 %v10383_v50  ;;  %v10244_v50 = vld [vmem:[#allocation6 + $0x834] sm:$0xf0]  ;;  %v10023_v54 = vor.u32 %v13741_v47, %v10020_v48  ;;  %v13727_v9 = vld [vmem:[#allocation6 + $0x5ec] sm:$0xf]  ;;  %v9964_v10 = vld [vmem:[#allocation6 + $0x604] sm:$0xf0]  ;;  %v9743_v14 = vor.u32 %v13671_v6, %v9740_v8 }
  0x51   :  { %2399 = vmatpush.bf16.msra.mxu2 %v9519_v46  ;;  %v9796_v46 = vld [vmem:[#allocation6 + $0x4b4] sm:$0xf0]  ;;  %v10247_v58 = vor.u32 %v13797_v49, %v10244_v50  ;;  %v13783_v11 = vld [vmem:[#allocation6 + $0x7ac] sm:$0xf]  ;;  %v9967_v15 = vor.u32 %v13727_v9, %v9964_v10  ;;  %v9712_v22 = vld [vmem:[#allocation6 + $0x40c] sm:$0xf0] }
  0x52   :  { %2387 = vmatpush.bf16.msrb.mxu3 %v9267_v51  ;;  %v10499_v51 = vor.u32 %v13860_v41, %v10496_v42  ;;  %v9799_v52 = vor.u32 %v13685_v43, %v9796_v46  ;;  %v13839_v16 = vld [vmem:[#allocation6 + $0x96c] sm:$0xf]  ;;  %v13720_v23 = vld [vmem:[#allocation6 + $0x5b4] sm:$0xf]  ;;  %v10160_v26 = vld [vmem:[#allocation6 + $0x78c] sm:$0xf0] }
  0x53   :  { %2349 = vmatpush.bf16.msrb.mxu0 %v10131_v60  ;;  %v13734_v60 = vld [vmem:[#allocation6 + $0x624] sm:$0xf]  ;;  %v13832_v30 = vld [vmem:[#allocation6 + $0x934] sm:$0xf]  ;;  %v10384_v31 = vld [vmem:[#allocation6 + $0x94c] sm:$0xf0] }
  0x54   :  { %2362 = vmatpush.bf16.msrb.mxu1 %v10355_v0  ;;  %v10471_v0 = vor.u32 %v13853_v55, %v10468_v56  ;;  %v9995_v2 = vor.u32 %v13734_v60, %v9992_v61  ;;  %v13657_v32 = vld [vmem:[#allocation6 + $0x3bc] sm:$0xf]  ;;  %v9684_v35 = vld [vmem:[#allocation6 + $0x3d4] sm:$0xf0]  ;;  %v10387_v41 = vor.u32 %v13832_v30, %v10384_v31  ;;  %v13650_v47 = vld [vmem:[#allocation6 + $0x384] sm:$0xf] }
  0x55   :  { %2400 = vmatpush.bf16.msra.mxu2 %v9491_v59  ;;  %v9768_v59 = vld [vmem:[#allocation6 + $0x47c] sm:$0xf0]  ;;  %v13713_v36 = vld [vmem:[#allocation6 + $0x57c] sm:$0xf]  ;;  %v10356_v43 = vld [vmem:[#allocation6 + $0x914] sm:$0xf0] }
  0x56   :  { %2388 = vmatpush.bf16.msrb.mxu3 %v9239_v1  ;;  %v9771_v1 = vor.u32 %v13678_v57, %v9768_v59  ;;  %v13825_v42 = vld [vmem:[#allocation6 + $0x8fc] sm:$0xf]  ;;  %v9656_v48 = vld [vmem:[#allocation6 + $0x39c] sm:$0xf0]  ;;  %v13706_v49 = vld [vmem:[#allocation6 + $0x544] sm:$0xf] }
  0x57   :  { %2350 = vmatpush.bf16.msrb.mxu0 %v10103_v13  ;;  %v10443_v13 = vor.u32 %v13846_v3, %v10440_v5  ;;  %v9410_v55 = vld [vmem:[#allocation6 + $0x190] sm:$0xf]  ;;  %v13591_v56 = vld [vmem:[#allocation6 + $0x1a8] sm:$0xf0]  ;;  %v13874_v60 = vld [vmem:[#allocation6 + $0xa84] sm:$0xf]  ;;  %v9659_v62 = vor.u32 %v13650_v47, %v9656_v48 }
  0x58   :  { %2363 = vmatpush.bf16.msrb.mxu1 %v10327_v17  ;;  %v10412_v17 = vld [vmem:[#allocation6 + $0x984] sm:$0xf0]  ;;  %v9634_v57 = vld [vmem:[#allocation6 + $0x350] sm:$0xf]  ;;  %v13647_v59 = vld [vmem:[#allocation6 + $0x368] sm:$0xf0]  ;;  %v9411_v5 = vor.u32 %v13591_v56, %v9410_v55 }
  0x59   :  { %2401 = vmatpush.bf16.msra.mxu2 %v9463_v12  ;;  %v10188_v12 = vld [vmem:[#allocation6 + $0x7c4] sm:$0xf0]  ;;  %v10415_v27 = vor.u32 %v13839_v16, %v10412_v17  ;;  %v10552_v61 = vld [vmem:[#allocation6 + $0xa9c] sm:$0xf0]  ;;  %v13703_v6 = vld [vmem:[#allocation6 + $0x528] sm:$0xf0]  ;;  %v9635_v9 = vor.u32 %v13647_v59, %v9634_v57 }
  0x5a   :  { %2389 = vmatpush.bf16.msrb.mxu3 %v9211_v20  ;;  %2351 = vmatmul.bf16.vlgmr.msrb.gmra.mxu0 %v14856_v33  ;;  %v13664_v20 = vld [vmem:[#allocation6 + $0x3f4] sm:$0xf]  ;;  %v10191_v21 = vor.u32 %v13783_v11, %v10188_v12  ;;  %v13759_v8 = vld [vmem:[#allocation6 + $0x6e8] sm:$0xf0]  ;;  %v10555_v10 = vor.u32 %v13874_v60, %v10552_v61  ;;  %v9382_v11 = vld [vmem:[#allocation6 + $0x158] sm:$0xf] }
  0x5b   :  { %2408 = vmatpush.bf16.msra.mxu0 %v9855_v24  ;;  %2364 = vmatmul.bf16.vlgmr.msrb.gmra.mxu1 %v14858_v37  ;;  %v9936_v24 = vld [vmem:[#allocation6 + $0x5cc] sm:$0xf0]  ;;  %v9715_v28 = vor.u32 %v13664_v20, %v9712_v22  ;;  %v13584_v12 = vld [vmem:[#allocation6 + $0x170] sm:$0xf0]  ;;  %v9830_v20 = vld [vmem:[#allocation6 + $0x4d8] sm:$0xf] }
  0x5c   :  { %2421 = vmatpush.bf16.msra.mxu1 %v10079_v25  ;;  %v13776_v25 = vld [vmem:[#allocation6 + $0x774] sm:$0xf]  ;;  %v9774_v47 = vld [vmem:[#allocation6 + $0x468] sm:$0xf]  ;;  %v13563_v55 = vld [vmem:[#allocation6 + $0xc8] sm:$0xf0] }
  0x5d   :  { %2402 = vmatpush.bf16.msra.mxu2 %v9435_v34  ;;  %2390 = vmatmul.bf16.vlgmr.msrb.gmra.mxu3 %v14843_v4  ;;  %v10163_v34 = vor.u32 %v13776_v25, %v10160_v26  ;;  %v13696_v22 = vld [vmem:[#allocation6 + $0x4f0] sm:$0xf0]  ;;  %v9354_v26 = vld [vmem:[#allocation6 + $0x120] sm:$0xf]  ;;  %v9522_v56 = vld [vmem:[#allocation6 + $0x270] sm:$0xf] }
  0x5e   :  { %2434 = vmatpush.bf16.msra.mxu3 %v10303_v29  ;;  %v9939_v29 = vor.u32 %v13720_v23, %v9936_v24  ;;  %v10054_v23 = vld [vmem:[#allocation6 + $0x698] sm:$0xf]  ;;  %v13752_v24 = vld [vmem:[#allocation6 + $0x6b0] sm:$0xf0]  ;;  %v9831_v30 = vor.u32 %v13696_v22, %v9830_v20  ;;  %v13619_v57 = vld [vmem:[#allocation6 + $0x288] sm:$0xf0] }
  0x5f   :  { %2409 = vmatpush.bf16.msra.mxu0 %v9827_v39  ;;  %v13769_v39 = vld [vmem:[#allocation6 + $0x73c] sm:$0xf]  ;;  %v10055_v31 = vor.u32 %v13752_v24, %v10054_v23  ;;  %v9746_v60 = vld [vmem:[#allocation6 + $0x430] sm:$0xf]  ;;  %v9690_v23 = vld [vmem:[#allocation6 + $0x3c0] sm:$0xf] }
  0x60   :  { %2422 = vmatpush.bf16.msra.mxu1 %v10051_v40  ;;  %2403 = vmatmul.bf16.vlgmr.msra.gmra.mxu2 %v14846_v18  ;;  %v10132_v40 = vld [vmem:[#allocation6 + $0x754] sm:$0xf0]  ;;  %v13605_v20 = vld [vmem:[#allocation6 + $0x218] sm:$0xf0] }
  0x61   :  { %2447 = vmatpush.bf16.msrb.mxu2 %v10527_v38  ;;  %v9908_v38 = vld [vmem:[#allocation6 + $0x594] sm:$0xf0]  ;;  %v10135_v50 = vor.u32 %v13769_v39, %v10132_v40  ;;  %v9326_v40 = vld [vmem:[#allocation6 + $0xe8] sm:$0xf]  ;;  %v13661_v24 = vld [vmem:[#allocation6 + $0x3d8] sm:$0xf0] }
  0x62   :  { %2435 = vmatpush.bf16.msra.mxu3 %v10275_v44  ;;  %v9687_v44 = vor.u32 %v13657_v32, %v9684_v35  ;;  %v9911_v46 = vor.u32 %v13713_v36, %v9908_v38  ;;  %v9802_v32 = vld [vmem:[#allocation6 + $0x4a0] sm:$0xf]  ;;  %v13689_v35 = vld [vmem:[#allocation6 + $0x4b8] sm:$0xf0] }
  0x63   :  { %2410 = vmatpush.bf16.msra.mxu0 %v9799_v52  ;;  %v13762_v52 = vld [vmem:[#allocation6 + $0x704] sm:$0xf]  ;;  %v10026_v36 = vld [vmem:[#allocation6 + $0x660] sm:$0xf]  ;;  %v13745_v38 = vld [vmem:[#allocation6 + $0x678] sm:$0xf0] }
  0x64   :  { %2423 = vmatpush.bf16.msra.mxu1 %v10023_v54  ;;  %v10104_v54 = vld [vmem:[#allocation6 + $0x71c] sm:$0xf0] }
  0x65   :  { %2448 = vmatpush.bf16.msrb.mxu2 %v10499_v51  ;;  %v9880_v51 = vld [vmem:[#allocation6 + $0x55c] sm:$0xf0]  ;;  %v10107_v3 = vor.u32 %v13762_v52, %v10104_v54  ;;  %v9298_v54 = vld [vmem:[#allocation6 + $0xb0] sm:$0xf] }
  0x66   :  { %2436 = vmatpush.bf16.msra.mxu3 %v10247_v58  ;;  %v10359_v58 = vor.u32 %v13825_v42, %v10356_v43  ;;  %v9883_v63 = vor.u32 %v13706_v49, %v9880_v51  ;;  %v9550_v42 = vld [vmem:[#allocation6 + $0x2a8] sm:$0xf]  ;;  %v13626_v43 = vld [vmem:[#allocation6 + $0x2c0] sm:$0xf0]  ;;  %v9299_v61 = vor.u32 %v13563_v55, %v9298_v54  ;;  %v10278_v55 = vld [vmem:[#allocation6 + $0x858] sm:$0xf] }
  0x67   :  { %2411 = vmatpush.bf16.msra.mxu0 %v9771_v1  ;;  %v10328_v1 = vld [vmem:[#allocation6 + $0x8dc] sm:$0xf0]  ;;  %v13682_v49 = vld [vmem:[#allocation6 + $0x480] sm:$0xf0]  ;;  %v9551_v52 = vor.u32 %v13626_v43, %v9550_v42 }
  0x68   :  { %2424 = vmatpush.bf16.msra.mxu1 %v9995_v2  ;;  %v9858_v2 = vld [vmem:[#allocation6 + $0x510] sm:$0xf]  ;;  %v13738_v51 = vld [vmem:[#allocation6 + $0x640] sm:$0xf0] }
  0x69   :  { %2449 = vmatpush.bf16.msrb.mxu2 %v10471_v0  ;;  %v13818_v0 = vld [vmem:[#allocation6 + $0x8c4] sm:$0xf]  ;;  %v9859_v16 = vor.u32 %v13703_v6, %v9858_v2  ;;  %v9270_v2 = vld [vmem:[#allocation6 + $0x78] sm:$0xf]  ;;  %v13612_v6 = vld [vmem:[#allocation6 + $0x250] sm:$0xf0] }
  0x6a   :  { %2437 = vmatpush.bf16.msra.mxu3 %v10219_v7  ;;  %v10082_v7 = vld [vmem:[#allocation6 + $0x6d0] sm:$0xf]  ;;  %v13654_v42 = vld [vmem:[#allocation6 + $0x3a0] sm:$0xf0] }
  0x6b   :  { %2412 = vmatpush.bf16.msra.mxu0 %v9743_v14  ;;  %v9606_v14 = vld [vmem:[#allocation6 + $0x318] sm:$0xf]  ;;  %v10083_v17 = vor.u32 %v13759_v8, %v10082_v7 }
  0x6c   :  { %2425 = vmatpush.bf16.msra.mxu1 %v9967_v15  ;;  %v13640_v15 = vld [vmem:[#allocation6 + $0x330] sm:$0xf0] }
  0x6d   :  { %2450 = vmatpush.bf16.msrb.mxu2 %v10443_v13  ;;  %v10331_v13 = vor.u32 %v13818_v0, %v10328_v1  ;;  %v9607_v25 = vor.u32 %v13640_v15, %v9606_v14  ;;  %v13731_v0 = vld [vmem:[#allocation6 + $0x608] sm:$0xf0]  ;;  %v9523_v1 = vor.u32 %v13619_v57, %v9522_v56  ;;  %v9242_v15 = vld [vmem:[#allocation6 + $0x40] sm:$0xf]  ;;  %v13808_v56 = vld [vmem:[#allocation6 + $0x870] sm:$0xf0] }
  0x6e   :  { %2438 = vmatpush.bf16.msra.mxu3 %v10191_v21  ;;  %v9383_v21 = vor.u32 %v13584_v12, %v9382_v11  ;;  %v13668_v11 = vld [vmem:[#allocation6 + $0x410] sm:$0xf0]  ;;  %v9942_v12 = vld [vmem:[#allocation6 + $0x5b8] sm:$0xf] }
  0x6f   :  { %2413 = vmatpush.bf16.msra.mxu0 %v9715_v28  ;;  %v9578_v28 = vld [vmem:[#allocation6 + $0x2e0] sm:$0xf] }
  0x70   :  { %2426 = vmatpush.bf16.msra.mxu1 %v9939_v29  ;;  %v13633_v29 = vld [vmem:[#allocation6 + $0x2f8] sm:$0xf0] }
  0x71   :  { %2451 = vmatpush.bf16.msrb.mxu2 %v10415_v27  ;;  %v13577_v27 = vld [vmem:[#allocation6 + $0x138] sm:$0xf0]  ;;  %v9579_v39 = vor.u32 %v13633_v29, %v9578_v28  ;;  %v9214_v28 = vld [vmem:[#allocation6 + $0x8] sm:$0xf] }
  0x72   :  { %2439 = vmatpush.bf16.msra.mxu3 %v10163_v34  ;;  %v9355_v34 = vor.u32 %v13577_v27, %v9354_v26  ;;  %v9914_v26 = vld [vmem:[#allocation6 + $0x580] sm:$0xf]  ;;  %v13717_v27 = vld [vmem:[#allocation6 + $0x598] sm:$0xf0] }
  0x73   :  { %2414 = vmatpush.bf16.msra.mxu0 %v9687_v44  ;;  %v9803_v44 = vor.u32 %v13689_v35, %v9802_v32  ;;  %v13598_v32 = vld [vmem:[#allocation6 + $0x1e0] sm:$0xf0]  ;;  %v13815_v35 = vld [vmem:[#allocation6 + $0x8a8] sm:$0xf0] }
  0x74   :  { %2427 = vmatpush.bf16.msra.mxu1 %v9911_v46  ;;  %v10027_v46 = vor.u32 %v13745_v38, %v10026_v36  ;;  %v10530_v36 = vld [vmem:[#allocation6 + $0xa50] sm:$0xf]  ;;  %v9691_v38 = vor.u32 %v13661_v24, %v9690_v23  ;;  %v10446_v23 = vld [vmem:[#allocation6 + $0x9a8] sm:$0xf]  ;;  %v13850_v24 = vld [vmem:[#allocation6 + $0x9c0] sm:$0xf0] }
  0x75   :  { %2452 = vmatpush.bf16.msrb.mxu2 %v10387_v41  ;;  %v13570_v41 = vld [vmem:[#allocation6 + $0x100] sm:$0xf0] }
  0x76   :  { %2440 = vmatpush.bf16.msra.mxu3 %v10135_v50  ;;  %v9327_v48 = vor.u32 %v13570_v41, %v9326_v40  ;;  %v9998_v50 = vld [vmem:[#allocation6 + $0x628] sm:$0xf]  ;;  %v13871_v40 = vld [vmem:[#allocation6 + $0xa68] sm:$0xf0] }
  0x77   :  { %2415 = vmatpush.bf16.msra.mxu0 %v9659_v62  ;;  %v9999_v59 = vor.u32 %v13738_v51, %v9998_v50  ;;  %v13675_v62 = vld [vmem:[#allocation6 + $0x448] sm:$0xf0]  ;;  %v9662_v41 = vld [vmem:[#allocation6 + $0x388] sm:$0xf]  ;;  %v9412_v50 = vld [vmem:[#allocation6 + $0x1ac] sm:$0xf0]  ;;  %v10531_v54 = vor.u32 %v13871_v40, %v10530_v36 }
  0x78   :  { %2428 = vmatpush.bf16.msra.mxu1 %v9883_v63  ;;  %v9970_v63 = vld [vmem:[#allocation6 + $0x5f0] sm:$0xf]  ;;  %v9747_v7 = vor.u32 %v13675_v62, %v9746_v60  ;;  %v10558_v51 = vld [vmem:[#allocation6 + $0xa88] sm:$0xf]  ;;  %v9663_v57 = vor.u32 %v13654_v42, %v9662_v41  ;;  %v13864_v60 = vld [vmem:[#allocation6 + $0xa30] sm:$0xf0] }
  0x79   :  { %2453 = vmatpush.bf16.msrb.mxu2 %v10359_v58  ;;  %v9775_v58 = vor.u32 %v13682_v49, %v9774_v47  ;;  %v9971_v8 = vor.u32 %v13731_v0, %v9970_v63  ;;  %v13588_v47 = vld [vmem:[#allocation6 + $0x194] sm:$0xf]  ;;  %v9636_v0 = vld [vmem:[#allocation6 + $0x36c] sm:$0xf0]  ;;  %v13623_v40 = vld [vmem:[#allocation6 + $0x2ac] sm:$0xf] }
  0x7a   :  { %2441 = vmatpush.bf16.msra.mxu3 %v10107_v3  ;;  %2416 = vmatmul.bf16.vlgmr.msra.gmra.mxu0 %v14840_v53  ;;  %v13556_v3 = vld [vmem:[#allocation6 + $0x90] sm:$0xf0]  ;;  %v10418_v36 = vld [vmem:[#allocation6 + $0x970] sm:$0xf]  ;;  %v9552_v41 = vld [vmem:[#allocation6 + $0x2c4] sm:$0xf0] }
  0x7b   :  { %2467 = vmatpush.bf16.msrb.mxu0 %v10555_v10  ;;  %2429 = vmatmul.bf16.vlgmr.msra.gmra.mxu1 %v14848_v19  ;;  %v9271_v10 = vor.u32 %v13556_v3, %v9270_v2  ;;  %v13644_v63 = vld [vmem:[#allocation6 + $0x354] sm:$0xf]  ;;  %v13581_v2 = vld [vmem:[#allocation6 + $0x15c] sm:$0xf]  ;;  %v9384_v3 = vld [vmem:[#allocation6 + $0x174] sm:$0xf0] }
  0x7c   :  { %2473 = vmatpush.bf16.msrb.mxu1 %v9411_v5  ;;  %v9494_v5 = vld [vmem:[#allocation6 + $0x238] sm:$0xf] }
  0x7d   :  { %2454 = vmatpush.bf16.msrb.mxu2 %v10331_v13  ;;  %2442 = vmatmul.bf16.vlgmr.msra.gmra.mxu3 %v14856_v33  ;;  %v13724_v13 = vld [vmem:[#allocation6 + $0x5d0] sm:$0xf0]  ;;  %v9495_v14 = vor.u32 %v13612_v6, %v9494_v5  ;;  %v10250_v6 = vld [vmem:[#allocation6 + $0x820] sm:$0xf] }
  0x7e   :  { %2486 = vmatpush.bf16.msrb.mxu3 %v9635_v9  ;;  %v9718_v9 = vld [vmem:[#allocation6 + $0x3f8] sm:$0xf]  ;;  %v9943_v22 = vor.u32 %v13724_v13, %v9942_v12  ;;  %v13637_v12 = vld [vmem:[#allocation6 + $0x31c] sm:$0xf] }
  0x7f   :  { %2499 = vmatpush.bf16.msra.mxu0 %v9859_v16  ;;  %v13549_v16 = vld [vmem:[#allocation6 + $0x58] sm:$0xf0]  ;;  %v9608_v13 = vld [vmem:[#allocation6 + $0x334] sm:$0xf0] }
  0x80   :  { %2474 = vmatpush.bf16.msrb.mxu1 %v9383_v21  ;;  %2455 = vmatmul.bf16.vlgmr.msrb.gmra.mxu2 %v14858_v37  ;;  %v9719_v21 = vor.u32 %v13668_v11, %v9718_v9  ;;  %v10474_v9 = vld [vmem:[#allocation6 + $0x9e0] sm:$0xf]  ;;  %v9387_v11 = vor.u32 %v13581_v2, %v9384_v3  ;;  %v13609_v2 = vld [vmem:[#allocation6 + $0x23c] sm:$0xf]  ;;  %v9496_v3 = vld [vmem:[#allocation6 + $0x254] sm:$0xf0] }
  0x81   :  { %2512 = vmatpush.bf16.msra.mxu2 %v10083_v17  ;;  %v9466_v17 = vld [vmem:[#allocation6 + $0x200] sm:$0xf] }
  0x82   :  { %2487 = vmatpush.bf16.msrb.mxu3 %v9607_v25  ;;  %v9243_v25 = vor.u32 %v13549_v16, %v9242_v15  ;;  %v9467_v29 = vor.u32 %v13605_v20, %v9466_v17  ;;  %v13574_v15 = vld [vmem:[#allocation6 + $0x124] sm:$0xf]  ;;  %v9356_v16 = vld [vmem:[#allocation6 + $0x13c] sm:$0xf0]  ;;  %v10222_v20 = vld [vmem:[#allocation6 + $0x7e8] sm:$0xf] }
  0x83   :  { %2500 = vmatpush.bf16.msra.mxu0 %v9831_v30  ;;  %v13542_v30 = vld [vmem:[#allocation6 + $0x20] sm:$0xf0] }
  0x84   :  { %2475 = vmatpush.bf16.msrb.mxu1 %v9355_v34  ;;  %v10306_v34 = vld [vmem:[#allocation6 + $0x890] sm:$0xf]  ;;  %v9215_v43 = vor.u32 %v13542_v30, %v9214_v28  ;;  %v9328_v30 = vld [vmem:[#allocation6 + $0x104] sm:$0xf0] }
  0x85   :  { %2513 = vmatpush.bf16.msra.mxu2 %v10055_v31  ;;  %v9438_v31 = vld [vmem:[#allocation6 + $0x1c8] sm:$0xf]  ;;  %v10307_v49 = vor.u32 %v13815_v35, %v10306_v34  ;;  %v13787_v34 = vld [vmem:[#allocation6 + $0x7c8] sm:$0xf0] }
  0x86   :  { %2488 = vmatpush.bf16.msrb.mxu3 %v9579_v39  ;;  %v9915_v39 = vor.u32 %v13717_v27, %v9914_v26  ;;  %v13630_v26 = vld [vmem:[#allocation6 + $0x2e4] sm:$0xf]  ;;  %v9580_v27 = vld [vmem:[#allocation6 + $0x2fc] sm:$0xf0] }
  0x87   :  { %2501 = vmatpush.bf16.msra.mxu0 %v9803_v44  ;;  %v9886_v44 = vld [vmem:[#allocation6 + $0x548] sm:$0xf]  ;;  %v9583_v35 = vor.u32 %v13630_v26, %v9580_v27 }
  0x88   :  { %2476 = vmatpush.bf16.msrb.mxu1 %v9327_v48  ;;  %v9439_v48 = vor.u32 %v13598_v32, %v9438_v31  ;;  %v10447_v31 = vor.u32 %v13850_v24, %v10446_v23  ;;  %v10194_v32 = vld [vmem:[#allocation6 + $0x7b0] sm:$0xf]  ;;  %v13539_v24 = vld [vmem:[#allocation6 + $0xc] sm:$0xf] }
  0x89   :  { %2514 = vmatpush.bf16.msra.mxu2 %v10027_v46  ;;  %v13710_v46 = vld [vmem:[#allocation6 + $0x560] sm:$0xf0]  ;;  %v10195_v42 = vor.u32 %v13787_v34, %v10194_v32  ;;  %v13693_v32 = vld [vmem:[#allocation6 + $0x4dc] sm:$0xf]  ;;  %v9832_v34 = vld [vmem:[#allocation6 + $0x4f4] sm:$0xf0] }
  0x8a   :  { %2489 = vmatpush.bf16.msrb.mxu3 %v9551_v52  ;;  %10577 = vmatmul.msk.bf16.vlgmr.msrb.gmra.mxu0 %vm2287_vm0, %v14852_v45  ;;  %v13878_v52 = vld [vmem:[#allocation6 + $0xaa0] sm:$0xf0] }
  0x8b   :  { %2502 = vmatpush.bf16.msra.mxu0 %v9775_v58  ;;  %v9887_v58 = vor.u32 %v13710_v46, %v9886_v44  ;;  %v10559_v62 = vor.u32 %v13878_v52, %v10558_v51  ;;  %v9300_v44 = vld [vmem:[#allocation6 + $0xcc] sm:$0xf0]  ;;  %v13836_v51 = vld [vmem:[#allocation6 + $0x950] sm:$0xf0] }
  0x8c   :  { %2477 = vmatpush.bf16.msrb.mxu1 %v9299_v61  ;;  %v9415_v61 = vor.u32 %v13588_v47, %v9412_v50  ;;  %v10166_v47 = vld [vmem:[#allocation6 + $0x778] sm:$0xf] }
  0x8d   :  { %2515 = vmatpush.bf16.msra.mxu2 %v9999_v59  ;;  %v10502_v59 = vld [vmem:[#allocation6 + $0xa18] sm:$0xf] }
  0x8e   :  { %2490 = vmatpush.bf16.msrb.mxu3 %v9523_v1  ;;  %v10279_v1 = vor.u32 %v13808_v56, %v10278_v55  ;;  %v10503_v5 = vor.u32 %v13864_v60, %v10502_v59  ;;  %v10390_v50 = vld [vmem:[#allocation6 + $0x938] sm:$0xf]  ;;  %v9524_v55 = vld [vmem:[#allocation6 + $0x28c] sm:$0xf0]  ;;  %v10138_v60 = vld [vmem:[#allocation6 + $0x740] sm:$0xf] }
  0x8f   :  { %2503 = vmatpush.bf16.msra.mxu0 %v9747_v7  ;;  %v13801_v7 = vld [vmem:[#allocation6 + $0x838] sm:$0xf0]  ;;  %v10391_v59 = vor.u32 %v13836_v51, %v10390_v50  ;;  %v13686_v50 = vld [vmem:[#allocation6 + $0x4a4] sm:$0xf]  ;;  %v9804_v51 = vld [vmem:[#allocation6 + $0x4bc] sm:$0xf0] }
  0x90   :  { %2478 = vmatpush.bf16.msrb.mxu1 %v9271_v10  ;;  %v13857_v10 = vld [vmem:[#allocation6 + $0x9f8] sm:$0xf0] }
  0x91   :  { %2516 = vmatpush.bf16.msra.mxu2 %v9971_v8  ;;  %v9639_v8 = vor.u32 %v13644_v63, %v9636_v0  ;;  %v10475_v17 = vor.u32 %v13857_v10, %v10474_v9  ;;  %v10362_v63 = vld [vmem:[#allocation6 + $0x900] sm:$0xf]  ;;  %v13829_v0 = vld [vmem:[#allocation6 + $0x918] sm:$0xf0]  ;;  %v13766_v10 = vld [vmem:[#allocation6 + $0x720] sm:$0xf0] }
  0x92   :  { %2491 = vmatpush.bf16.msrb.mxu3 %v9495_v14  ;;  %v10251_v14 = vor.u32 %v13801_v7, %v10250_v6  ;;  %v13546_v6 = vld [vmem:[#allocation6 + $0x44] sm:$0xf]  ;;  %v9244_v7 = vld [vmem:[#allocation6 + $0x5c] sm:$0xf0]  ;;  %v10363_v9 = vor.u32 %v13829_v0, %v10362_v63  ;;  %v13679_v63 = vld [vmem:[#allocation6 + $0x46c] sm:$0xf] }
  0x93   :  { %2504 = vmatpush.bf16.msra.mxu0 %v9719_v21  ;;  %v13794_v21 = vld [vmem:[#allocation6 + $0x800] sm:$0xf0]  ;;  %v9776_v0 = vld [vmem:[#allocation6 + $0x484] sm:$0xf0] }
  0x94   :  { %2479 = vmatpush.bf16.msrb.mxu1 %v9243_v25  ;;  %v9359_v25 = vor.u32 %v13574_v15, %v9356_v16  ;;  %v10223_v28 = vor.u32 %v13794_v21, %v10222_v20  ;;  %v9860_v15 = vld [vmem:[#allocation6 + $0x52c] sm:$0xf0]  ;;  %v13756_v16 = vld [vmem:[#allocation6 + $0x6d4] sm:$0xf]  ;;  %v13602_v21 = vld [vmem:[#allocation6 + $0x204] sm:$0xf] }
  0x95   :  { %2517 = vmatpush.bf16.msra.mxu2 %v9943_v22  ;;  %v9611_v22 = vor.u32 %v13637_v12, %v9608_v13  ;;  %v13822_v12 = vld [vmem:[#allocation6 + $0x8e0] sm:$0xf0]  ;;  %v9499_v13 = vor.u32 %v13609_v2, %v9496_v3  ;;  %v10084_v20 = vld [vmem:[#allocation6 + $0x6ec] sm:$0xf0]  ;;  %v13735_v2 = vld [vmem:[#allocation6 + $0x62c] sm:$0xf] }
  0x96   :  { %2492 = vmatpush.bf16.msrb.mxu3 %v9467_v29  ;;  %v13567_v29 = vld [vmem:[#allocation6 + $0xec] sm:$0xf]  ;;  %v10000_v3 = vld [vmem:[#allocation6 + $0x644] sm:$0xf0] }
  0x97   :  { %2505 = vmatpush.bf16.msra.mxu0 %v9691_v38  ;;  %v13843_v38 = vld [vmem:[#allocation6 + $0x988] sm:$0xf0] }
  0x98   :  { %2480 = vmatpush.bf16.msrb.mxu1 %v9215_v43  ;;  %v13560_v43 = vld [vmem:[#allocation6 + $0xb4] sm:$0xf]  ;;  %v10419_v46 = vor.u32 %v13843_v38, %v10418_v36  ;;  %v10056_v38 = vld [vmem:[#allocation6 + $0x6b4] sm:$0xf0] }
  0x99   :  { %2518 = vmatpush.bf16.msra.mxu2 %v9915_v39  ;;  %v9331_v39 = vor.u32 %v13567_v29, %v9328_v30  ;;  %v9303_v52 = vor.u32 %v13560_v43, %v9300_v44  ;;  %v10308_v29 = vld [vmem:[#allocation6 + $0x8ac] sm:$0xf0]  ;;  %v10087_v30 = vor.u32 %v13756_v16, %v10084_v20  ;;  %v9835_v44 = vor.u32 %v13693_v32, %v9832_v34  ;;  %v13728_v16 = vld [vmem:[#allocation6 + $0x5f4] sm:$0xf]  ;;  %v9944_v32 = vld [vmem:[#allocation6 + $0x5d4] sm:$0xf0] }
  0x9a   :  { %2493 = vmatpush.bf16.msrb.mxu3 %v9439_v48  ;;  %v13780_v48 = vld [vmem:[#allocation6 + $0x790] sm:$0xf0]  ;;  %v10532_v43 = vld [vmem:[#allocation6 + $0xa6c] sm:$0xf0] }
  0x9b   :  { %2506 = vmatpush.bf16.msra.mxu0 %v9663_v57  ;;  %2481 = vmatmul.bf16.vlgmr.msrb.gmra.mxu1 %v14843_v4  ;;  %v10167_v56 = vor.u32 %v13780_v48, %v10166_v47  ;;  %v13553_v57 = vld [vmem:[#allocation6 + $0x7c] sm:$0xf]  ;;  %v10280_v47 = vld [vmem:[#allocation6 + $0x874] sm:$0xf0] }
  0x9c   :  { %2525 = vmatpush.bf16.msra.mxu1 %v10307_v49  ;;  %v9555_v49 = vor.u32 %v13623_v40, %v9552_v41  ;;  %v9440_v40 = vld [vmem:[#allocation6 + $0x1e4] sm:$0xf0] }
  0x9d   :  { %2519 = vmatpush.bf16.msra.mxu2 %v9887_v58  ;;  %2494 = vmatmul.bf16.vlgmr.msrb.gmra.mxu3 %v14846_v18  ;;  %v9272_v58 = vld [vmem:[#allocation6 + $0x94] sm:$0xf0] }
  0x9e   :  { %2538 = vmatpush.bf16.msra.mxu3 %v10531_v54  ;;  %2507 = vmatmul.bf16.vlgmr.msra.gmra.mxu0 %v14840_v53  ;;  %v13616_v54 = vld [vmem:[#allocation6 + $0x274] sm:$0xf] }
  0x9f   :  { %2558 = vmatpush.bf16.msrb.mxu0 %v10559_v62  ;;  %v9527_v62 = vor.u32 %v13616_v54, %v9524_v55  ;;  %v13742_v54 = vld [vmem:[#allocation6 + $0x664] sm:$0xf]  ;;  %v10028_v55 = vld [vmem:[#allocation6 + $0x67c] sm:$0xf0] }
  0xa0   :  { %2526 = vmatpush.bf16.msra.mxu1 %v10279_v1  ;;  %2520 = vmatmul.bf16.vlgmr.msra.gmra.mxu2 %v14848_v19  ;;  %v9275_v1 = vor.u32 %v13553_v57, %v9272_v58  ;;  %v13861_v57 = vld [vmem:[#allocation6 + $0xa1c] sm:$0xf]  ;;  %v10504_v58 = vld [vmem:[#allocation6 + $0xa34] sm:$0xf0] }
  0xa1   :  { %2564 = vmatpush.bf16.msrb.mxu2 %v9415_v61  ;;  %v13773_v61 = vld [vmem:[#allocation6 + $0x758] sm:$0xf0] }
  0xa2   :  { %2539 = vmatpush.bf16.msra.mxu3 %v10503_v5  ;;  %v10139_v5 = vor.u32 %v13773_v61, %v10138_v60  ;;  %v13798_v60 = vld [vmem:[#allocation6 + $0x824] sm:$0xf]  ;;  %v10252_v61 = vld [vmem:[#allocation6 + $0x83c] sm:$0xf0] }
  0xa3   :  { %2577 = vmatpush.bf16.msra.mxu0 %v9639_v8  ;;  %v10110_v8 = vld [vmem:[#allocation6 + $0x708] sm:$0xf] }
  0xa4   :  { %2527 = vmatpush.bf16.msra.mxu1 %v10251_v14  ;;  %v13700_v14 = vld [vmem:[#allocation6 + $0x514] sm:$0xf]  ;;  %v10111_v23 = vor.u32 %v13766_v10, %v10110_v8  ;;  %v9779_v8 = vor.u32 %v13679_v63, %v9776_v0  ;;  %v10224_v10 = vld [vmem:[#allocation6 + $0x804] sm:$0xf0]  ;;  %v13707_v63 = vld [vmem:[#allocation6 + $0x54c] sm:$0xf] }
  0xa5   :  { %2565 = vmatpush.bf16.msrb.mxu2 %v9387_v11  ;;  %v10334_v11 = vld [vmem:[#allocation6 + $0x8c8] sm:$0xf]  ;;  %v9863_v27 = vor.u32 %v13700_v14, %v9860_v15  ;;  %v9748_v14 = vld [vmem:[#allocation6 + $0x44c] sm:$0xf0] }
  0xa6   :  { %2540 = vmatpush.bf16.msra.mxu3 %v10475_v17  ;;  %v9247_v17 = vor.u32 %v13546_v6, %v9244_v7  ;;  %v10335_v26 = vor.u32 %v13822_v12, %v10334_v11  ;;  %v13854_v6 = vld [vmem:[#allocation6 + $0x9e4] sm:$0xf]  ;;  %v10476_v7 = vld [vmem:[#allocation6 + $0x9fc] sm:$0xf0]  ;;  %v14880_v11 = vld [vmem:[#allocation8] sm:$0x7f]  ;;  %v10003_v12 = vor.u32 %v13735_v2, %v10000_v3 }
  0xa7   :  { %2578 = vmatpush.bf16.msra.mxu0 %v9611_v22  ;;  %v9468_v22 = vld [vmem:[#allocation6 + $0x21c] sm:$0xf0]  ;;  %v10479_v15 = vor.u32 %v13854_v6, %v10476_v7  ;;  %v9888_v0 = vld [vmem:[#allocation6 + $0x564] sm:$0xf0]  ;;  %v9418_v3 = vld [vmem:[#allocation6 + $0x198] sm:$0xf] }
  0xa8   :  { %2528 = vmatpush.bf16.msra.mxu1 %v10223_v28  ;;  %v13812_v28 = vld [vmem:[#allocation6 + $0x894] sm:$0xf]  ;;  %v10560_v6 = vld [vmem:[#allocation6 + $0xaa4] sm:$0xf0] }
  0xa9   :  { %2566 = vmatpush.bf16.msrb.mxu2 %v9359_v25  ;;  %v9216_v25 = vld [vmem:[#allocation6 + $0x24] sm:$0xf0]  ;;  %v10311_v41 = vor.u32 %v13812_v28, %v10308_v29  ;;  %v13665_v28 = vld [vmem:[#allocation6 + $0x3fc] sm:$0xf]  ;;  %v9720_v29 = vld [vmem:[#allocation6 + $0x414] sm:$0xf0] }
  0xaa   :  { %2541 = vmatpush.bf16.msra.mxu3 %v10447_v31  ;;  %v9471_v31 = vor.u32 %v13602_v21, %v9468_v22  ;;  %v9219_v36 = vor.u32 %v13539_v24, %v9216_v25  ;;  %v13847_v21 = vld [vmem:[#allocation6 + $0x9ac] sm:$0xf]  ;;  %v10448_v22 = vld [vmem:[#allocation6 + $0x9c4] sm:$0xf0]  ;;  %v13784_v25 = vld [vmem:[#allocation6 + $0x7b4] sm:$0xf] }
  0xab   :  { %2579 = vmatpush.bf16.msra.mxu0 %v9583_v35  ;;  %v13749_v35 = vld [vmem:[#allocation6 + $0x69c] sm:$0xf] }
  0xac   :  { %2529 = vmatpush.bf16.msra.mxu1 %v10195_v42  ;;  %v13868_v42 = vld [vmem:[#allocation6 + $0xa54] sm:$0xf]  ;;  %v10059_v48 = vor.u32 %v13749_v35, %v10056_v38  ;;  %v10420_v38 = vld [vmem:[#allocation6 + $0x98c] sm:$0xf0] }
  0xad   :  { %2567 = vmatpush.bf16.msrb.mxu2 %v9331_v39  ;;  %v13595_v39 = vld [vmem:[#allocation6 + $0x1cc] sm:$0xf] }
  0xae   :  { %2542 = vmatpush.bf16.msra.mxu3 %v10419_v46  ;;  %10578 = vmatmul.msk.bf16.vlgmr.msrb.gmra.mxu0 %vm2287_vm0, %v14852_v45  ;;  %v13805_v46 = vld [vmem:[#allocation6 + $0x85c] sm:$0xf] }
  0xaf   :  { %2580 = vmatpush.bf16.msra.mxu0 %v9555_v49  ;;  %v9443_v49 = vor.u32 %v13595_v39, %v9440_v40  ;;  %v9723_v40 = vor.u32 %v13665_v28, %v9720_v29  ;;  %v13704_v28 = vld [vmem:[#allocation6 + $0x530] sm:$0xf0] }
  0xb0   :  { %2530 = vmatpush.bf16.msra.mxu1 %v10167_v56  ;;  %v10283_v56 = vor.u32 %v13805_v46, %v10280_v47  ;;  %v9692_v46 = vld [vmem:[#allocation6 + $0x3dc] sm:$0xf0] }
  0xb1   :  { %2568 = vmatpush.bf16.msrb.mxu2 %v9303_v52  ;;  %v10535_v52 = vor.u32 %v13868_v42, %v10532_v43  ;;  %v10168_v42 = vld [vmem:[#allocation6 + $0x794] sm:$0xf0] }
  0xb2   :  { %2543 = vmatpush.bf16.msra.mxu3 %v10391_v59  ;;  %v9807_v59 = vor.u32 %v13686_v50, %v9804_v51  ;;  %v9916_v50 = vld [vmem:[#allocation6 + $0x59c] sm:$0xf0] }
  0xb3   :  { %2581 = vmatpush.bf16.msra.mxu0 %v9527_v62  ;;  %v10031_v62 = vor.u32 %v13742_v54, %v10028_v55  ;;  %v13833_v54 = vld [vmem:[#allocation6 + $0x93c] sm:$0xf]  ;;  %v10392_v55 = vld [vmem:[#allocation6 + $0x954] sm:$0xf0] }
  0xb4   :  { %2531 = vmatpush.bf16.msra.mxu1 %v10139_v5  ;;  %v10255_v5 = vor.u32 %v13798_v60, %v10252_v61  ;;  %v13651_v60 = vld [vmem:[#allocation6 + $0x38c] sm:$0xf]  ;;  %v10395_v2 = vor.u32 %v13833_v54, %v10392_v55 }
  0xb5   :  { %2569 = vmatpush.bf16.msrb.mxu2 %v9275_v1  ;;  %v10507_v1 = vor.u32 %v13861_v57, %v10504_v58  ;;  %v13770_v58 = vld [vmem:[#allocation6 + $0x744] sm:$0xf] }
  0xb6   :  { %2544 = vmatpush.bf16.msra.mxu3 %v10363_v9  ;;  %v13791_v9 = vld [vmem:[#allocation6 + $0x7ec] sm:$0xf] }
  0xb7   :  { %2582 = vmatpush.bf16.msra.mxu0 %v9499_v13  ;;  %v13672_v13 = vld [vmem:[#allocation6 + $0x434] sm:$0xf]  ;;  %v10227_v20 = vor.u32 %v13791_v9, %v10224_v10  ;;  %v2300_v34 = vpop.f32.mrf.mxu0  ;;  %v13826_v10 = vld [vmem:[#allocation6 + $0x904] sm:$0xf] }
  0xb8   :  { %2532 = vmatpush.bf16.msra.mxu1 %v10111_v23  ;;  %v509_v23 = vperm.slane %v14880_v11, 0  ;;  %v9751_v24 = vor.u32 %v13672_v13, %v9748_v14  ;;  %v2313_v51 = vpop.f32.mrf.mxu1  ;;  %v13592_v9 = vld [vmem:[#allocation6 + $0x1b0] sm:$0xf0]  ;;  %v13763_v14 = vld [vmem:[#allocation6 + $0x70c] sm:$0xf] }
  0xb9   :  { %2570 = vmatpush.bf16.msrb.mxu2 %v9247_v17  ;;  %v9972_v17 = vld [vmem:[#allocation6 + $0x60c] sm:$0xf0] }
  0xba   :  { %2545 = vmatpush.bf16.msra.mxu3 %v10335_v26  ;;  %v10196_v26 = vld [vmem:[#allocation6 + $0x7cc] sm:$0xf0]  ;;  %v2301_v39 = vadd.f32 %v2300_v34, %v509_v23 }
  0xbb   :  { %2583 = vmatpush.bf16.msra.mxu0 %v9471_v31  ;;  %2533 = vmatmul.bf16.vlgmr.msra.gmra.mxu1 %v14856_v33  ;;  %v13721_v31 = vld [vmem:[#allocation6 + $0x5bc] sm:$0xf]  ;;  %v10199_v35 = vor.u32 %v13784_v25, %v10196_v26  ;;  %v9419_v25 = vor.u32 %v13592_v9, %v9418_v3  ;;  %v10034_v3 = vld [vmem:[#allocation6 + $0x668] sm:$0xf] }
  0xbc   :  { %2590 = vmatpush.bf16.msrb.mxu1 %v9863_v27  ;;  %v9975_v27 = vor.u32 %v13728_v16, %v9972_v17  ;;  %v9947_v43 = vor.u32 %v13721_v31, %v9944_v32  ;;  %v9891_v17 = vor.u32 %v13707_v63, %v9888_v0  ;;  %v9390_v31 = vld [vmem:[#allocation6 + $0x160] sm:$0xf]  ;;  %v13585_v32 = vld [vmem:[#allocation6 + $0x178] sm:$0xf0]  ;;  %v9334_v63 = vld [vmem:[#allocation6 + $0xf0] sm:$0xf] }
  0xbd   :  { %2571 = vmatpush.bf16.msrb.mxu2 %v9219_v36  ;;  %2546 = vmatmul.bf16.vlgmr.msra.gmra.mxu3 %v14858_v37  ;;  %v13840_v36 = vld [vmem:[#allocation6 + $0x974] sm:$0xf]  ;;  %v13571_v0 = vld [vmem:[#allocation6 + $0x108] sm:$0xf0] }
  0xbe   :  { %2603 = vmatpush.bf16.msrb.mxu3 %v10087_v30  ;;  %v10451_v30 = vor.u32 %v13847_v21, %v10448_v22  ;;  %v9642_v21 = vld [vmem:[#allocation6 + $0x358] sm:$0xf]  ;;  %v13648_v22 = vld [vmem:[#allocation6 + $0x370] sm:$0xf0]  ;;  %v9335_v9 = vor.u32 %v13571_v0, %v9334_v63 }
  0xbf   :  { %2584 = vmatpush.bf16.msra.mxu0 %v9443_v49  ;;  %v2326_v47 = vpop.f32.mrf.mxu2  ;;  %v13714_v49 = vld [vmem:[#allocation6 + $0x584] sm:$0xf]  ;;  %v2302_v7 = vpop.f32.mrf.mxu0  ;;  %v9643_v34 = vor.u32 %v13648_v22, %v9642_v21  ;;  %v10006_v22 = vld [vmem:[#allocation6 + $0x630] sm:$0xf] }
  0xc0   :  { %2591 = vmatpush.bf16.msrb.mxu1 %v9835_v44  ;;  %2572 = vmatmul.bf16.vlgmr.msrb.gmra.mxu2 %v14843_v4  ;;  %v13658_v44 = vld [vmem:[#allocation6 + $0x3c4] sm:$0xf]  ;;  %v9919_v61 = vor.u32 %v13714_v49, %v9916_v50  ;;  %v2339_v16 = vpop.f32.mrf.mxu3  ;;  %v2315_v29 = vpop.f32.mrf.mxu1  ;;  %v9558_v7 = vld [vmem:[#allocation6 + $0x2b0] sm:$0xf] }
  0xc1   :  { %2616 = vmatpush.bf16.msra.mxu2 %v10311_v41  ;;  %v13777_v41 = vld [vmem:[#allocation6 + $0x77c] sm:$0xf]  ;;  %v9695_v57 = vor.u32 %v13658_v44, %v9692_v46  ;;  %v9838_v44 = vld [vmem:[#allocation6 + $0x4e0] sm:$0xf]  ;;  %v13578_v49 = vld [vmem:[#allocation6 + $0x140] sm:$0xf0] }
  0xc2   :  { %2604 = vmatpush.bf16.msrb.mxu3 %v10059_v48  ;;  %2585 = vmatmul.bf16.vlgmr.msra.gmra.mxu0 %v14846_v18  ;;  %v10423_v48 = vor.u32 %v13840_v36, %v10420_v38  ;;  %v10336_v36 = vld [vmem:[#allocation6 + $0x8e4] sm:$0xf0]  ;;  %v10090_v38 = vld [vmem:[#allocation6 + $0x6d8] sm:$0xf]  ;;  %v13697_v46 = vld [vmem:[#allocation6 + $0x4f8] sm:$0xf0] }
  0xc3   :  { %2629 = vmatpush.bf16.msrb.mxu0 %v10535_v52  ;;  %v10171_v52 = vor.u32 %v13777_v41, %v10168_v42  ;;  %v9614_v41 = vld [vmem:[#allocation6 + $0x320] sm:$0xf]  ;;  %v13641_v42 = vld [vmem:[#allocation6 + $0x338] sm:$0xf0]  ;;  %v9839_v55 = vor.u32 %v13697_v46, %v9838_v44 }
  0xc4   :  { %2592 = vmatpush.bf16.msrb.mxu1 %v9807_v59  ;;  %v10140_v59 = vld [vmem:[#allocation6 + $0x75c] sm:$0xf0]  ;;  %v13613_v44 = vld [vmem:[#allocation6 + $0x258] sm:$0xf0] }
  0xc5   :  { %2617 = vmatpush.bf16.msra.mxu2 %v10283_v56  ;;  %v2314_v56 = vadd.f32 %v2313_v51, %v2301_v39  ;;  %v9615_v51 = vor.u32 %v13641_v42, %v9614_v41  ;;  %v13732_v42 = vld [vmem:[#allocation6 + $0x610] sm:$0xf0] }
  0xc6   :  { %2605 = vmatpush.bf16.msrb.mxu3 %v10031_v62  ;;  %v9664_v62 = vld [vmem:[#allocation6 + $0x3a4] sm:$0xf0] }
  0xc7   :  { %2630 = vmatpush.bf16.msrb.mxu0 %v10507_v1  ;;  %v2327_v1 = vadd.f32 %v2326_v47, %v2314_v56  ;;  %v9667_v13 = vor.u32 %v13651_v60, %v9664_v62  ;;  %v13753_v56 = vld [vmem:[#allocation6 + $0x6b8] sm:$0xf0]  ;;  %v13690_v62 = vld [vmem:[#allocation6 + $0x4c0] sm:$0xf0] }
  0xc8   :  { %2593 = vmatpush.bf16.msrb.mxu1 %v9779_v8  ;;  %v10143_v8 = vor.u32 %v13770_v58, %v10140_v59  ;;  %v2341_v54 = vpop.f32.mrf.mxu3  ;;  %v13634_v58 = vld [vmem:[#allocation6 + $0x300] sm:$0xf0] }
  0xc9   :  { %2618 = vmatpush.bf16.msra.mxu2 %v10255_v5  ;;  %v13875_v5 = vld [vmem:[#allocation6 + $0xa8c] sm:$0xf]  ;;  %v14883_v23 = vadd.f32 %v2339_v16, %v2327_v1 }
  0xca   :  { %2606 = vmatpush.bf16.msrb.mxu3 %v10003_v12  ;;  %v10364_v12 = vld [vmem:[#allocation6 + $0x91c] sm:$0xf0] }
  0xcb   :  { %2631 = vmatpush.bf16.msrb.mxu0 %v10479_v15  ;;  %v10112_v15 = vld [vmem:[#allocation6 + $0x724] sm:$0xf0]  ;;  %v10367_v26 = vor.u32 %v13826_v10, %v10364_v12  ;;  %v9782_v10 = vld [vmem:[#allocation6 + $0x470] sm:$0xf]  ;;  %v13683_v12 = vld [vmem:[#allocation6 + $0x488] sm:$0xf0] }
  0xcc   :  { %2594 = vmatpush.bf16.msrb.mxu1 %v9751_v24  ;;  %v2328_v24 = vpop.f32.mrf.mxu2 }
  0xcd   :  { %2619 = vmatpush.bf16.msra.mxu2 %v10227_v20  ;;  %v10563_v20 = vor.u32 %v13875_v5, %v10560_v6  ;;  %v13746_v6 = vld [vmem:[#allocation6 + $0x680] sm:$0xf0]  ;;  %v9783_v24 = vor.u32 %v13683_v12, %v9782_v10  ;;  %v13816_v10 = vld [vmem:[#allocation6 + $0x8b0] sm:$0xf0]  ;;  %v9922_v12 = vld [vmem:[#allocation6 + $0x588] sm:$0xf] }
  0xce   :  { %2607 = vmatpush.bf16.msrb.mxu3 %v9975_v27  ;;  %v9866_v27 = vld [vmem:[#allocation6 + $0x518] sm:$0xf]  ;;  %v10035_v16 = vor.u32 %v13746_v6, %v10034_v3  ;;  %v13543_v6 = vld [vmem:[#allocation6 + $0x28] sm:$0xf0] }
  0xcf   :  { %2632 = vmatpush.bf16.msrb.mxu0 %v10451_v30  ;;  %v10115_v30 = vor.u32 %v13763_v14, %v10112_v15  ;;  %v9867_v39 = vor.u32 %v13704_v28, %v9866_v27  ;;  %v9306_v14 = vld [vmem:[#allocation6 + $0xb8] sm:$0xf]  ;;  %v13564_v15 = vld [vmem:[#allocation6 + $0xd0] sm:$0xf0] }
  0xd0   :  { %2595 = vmatpush.bf16.msrb.mxu1 %v9723_v40  ;;  %v13760_v40 = vld [vmem:[#allocation6 + $0x6f0] sm:$0xf0]  ;;  %v9307_v29 = vor.u32 %v13564_v15, %v9306_v14  ;;  %v9446_v15 = vld [vmem:[#allocation6 + $0x1d0] sm:$0xf] }
  0xd1   :  { %2620 = vmatpush.bf16.msra.mxu2 %v10199_v35  ;;  %v13819_v35 = vld [vmem:[#allocation6 + $0x8cc] sm:$0xf]  ;;  %v10091_v50 = vor.u32 %v13760_v40, %v10090_v38  ;;  %v13620_v27 = vld [vmem:[#allocation6 + $0x290] sm:$0xf0]  ;;  %v510_v40 = vperm.slane %v14880_v11, 1 }
  0xd2   :  { %2608 = vmatpush.bf16.msrb.mxu3 %v9947_v43  ;;  %v9391_v43 = vor.u32 %v13585_v32, %v9390_v31  ;;  %v10339_v47 = vor.u32 %v13819_v35, %v10336_v36  ;;  %v9754_v31 = vld [vmem:[#allocation6 + $0x438] sm:$0xf]  ;;  %v13676_v32 = vld [vmem:[#allocation6 + $0x450] sm:$0xf0]  ;;  %v13557_v35 = vld [vmem:[#allocation6 + $0x98] sm:$0xf0] }
  0xd3   :  { %2633 = vmatpush.bf16.msrb.mxu0 %v10423_v48  ;;  %v9362_v48 = vld [vmem:[#allocation6 + $0x128] sm:$0xf]  ;;  %v9755_v41 = vor.u32 %v13676_v32, %v9754_v31  ;;  %v10286_v31 = vld [vmem:[#allocation6 + $0x860] sm:$0xf]  ;;  %v13809_v32 = vld [vmem:[#allocation6 + $0x878] sm:$0xf0] }
  0xd4   :  { %2596 = vmatpush.bf16.msrb.mxu1 %v9695_v57  ;;  %v9586_v57 = vld [vmem:[#allocation6 + $0x2e8] sm:$0xf]  ;;  %v2378_v59 = vpop.f32.mrf.mxu2  ;;  %v9363_v60 = vor.u32 %v13578_v49, %v9362_v48  ;;  %v13669_v48 = vld [vmem:[#allocation6 + $0x418] sm:$0xf0] }
  0xd5   :  { %2621 = vmatpush.bf16.msra.mxu2 %v10171_v52  ;;  %v10062_v52 = vld [vmem:[#allocation6 + $0x6a0] sm:$0xf]  ;;  %v9250_v49 = vld [vmem:[#allocation6 + $0x48] sm:$0xf] }
  0xd6   :  { %2609 = vmatpush.bf16.msrb.mxu3 %v9919_v61  ;;  %v9810_v61 = vld [vmem:[#allocation6 + $0x4a8] sm:$0xf]  ;;  %v10063_v1 = vor.u32 %v13753_v56, %v10062_v52  ;;  %v9950_v56 = vld [vmem:[#allocation6 + $0x5c0] sm:$0xf] }
  0xd7   :  { %2634 = vmatpush.bf16.msrb.mxu0 %v10395_v2  ;;  %v9587_v2 = vor.u32 %v13634_v58, %v9586_v57  ;;  %v9811_v5 = vor.u32 %v13690_v62, %v9810_v61  ;;  %v9474_v61 = vld [vmem:[#allocation6 + $0x208] sm:$0xf]  ;;  %v13606_v62 = vld [vmem:[#allocation6 + $0x220] sm:$0xf0] }
  0xd8   :  { %2597 = vmatpush.bf16.msrb.mxu1 %v9667_v13  ;;  %v2352_v13 = vpop.f32.mrf.mxu0  ;;  %v2365_v21 = vpop.f32.mrf.mxu1 }
  0xd9   :  { %2622 = vmatpush.bf16.msra.mxu2 %v10143_v8  ;;  %v13627_v8 = vld [vmem:[#allocation6 + $0x2c8] sm:$0xf0] }
  0xda   :  { %2610 = vmatpush.bf16.msrb.mxu3 %v9891_v17  ;;  %v2353_v17 = vadd.f32 %v2352_v13, %v14883_v23  ;;  %v13718_v13 = vld [vmem:[#allocation6 + $0x5a0] sm:$0xf0] }
  0xdb   :  { %2635 = vmatpush.bf16.msrb.mxu0 %v10367_v26  ;;  %2598 = vmatmul.bf16.vlgmr.msrb.gmra.mxu1 %v14840_v53  ;;  %v9530_v26 = vld [vmem:[#allocation6 + $0x278] sm:$0xf] }
  0xdc   :  { %2649 = vmatpush.bf16.msra.mxu1 %v10563_v20  ;;  %v9559_v20 = vor.u32 %v13627_v8, %v9558_v7  ;;  %v2380_v28 = vpop.f32.mrf.mxu2  ;;  %v9531_v38 = vor.u32 %v13620_v27, %v9530_v26  ;;  %v10314_v7 = vld [vmem:[#allocation6 + $0x898] sm:$0xf]  ;;  %v10566_v26 = vld [vmem:[#allocation6 + $0xa90] sm:$0xf]  ;;  %v13879_v27 = vld [vmem:[#allocation6 + $0xaa8] sm:$0xf0] }
  0xdd   :  { %2623 = vmatpush.bf16.msra.mxu2 %v10115_v30  ;;  %2611 = vmatmul.bf16.vlgmr.msrb.gmra.mxu3 %v14848_v19  ;;  %v2366_v30 = vadd.f32 %v2365_v21, %v2353_v17  ;;  %v9670_v17 = vld [vmem:[#allocation6 + $0x390] sm:$0xf]  ;;  %v13655_v21 = vld [vmem:[#allocation6 + $0x3a8] sm:$0xf0] }
  0xde   :  { %2655 = vmatpush.bf16.msra.mxu3 %v9419_v25  ;;  %v13739_v25 = vld [vmem:[#allocation6 + $0x648] sm:$0xf0] }
  0xdf   :  { %2636 = vmatpush.bf16.msrb.mxu0 %v10339_v47  ;;  %v10007_v36 = vor.u32 %v13739_v25, %v10006_v22  ;;  %v14890_v23 = vadd.f32 %v2378_v59, %v2366_v30  ;;  %v9726_v47 = vld [vmem:[#allocation6 + $0x400] sm:$0xf]  ;;  %v10538_v22 = vld [vmem:[#allocation6 + $0xa58] sm:$0xf]  ;;  %v10315_v25 = vor.u32 %v13816_v10, %v10314_v7  ;;  %v9364_v7 = vld [vmem:[#allocation6 + $0x144] sm:$0xf0] }
  0xe0   :  { %2668 = vmatpush.bf16.msrb.mxu1 %v9643_v34  ;;  %2624 = vmatmul.bf16.vlgmr.msra.gmra.mxu2 %v14856_v33  ;;  %v9278_v34 = vld [vmem:[#allocation6 + $0x80] sm:$0xf]  ;;  %v2391_v52 = vpop.f32.mrf.mxu3  ;;  %v2367_v58 = vpop.f32.mrf.mxu1  ;;  %v9727_v59 = vor.u32 %v13669_v48, %v9726_v47  ;;  %v13865_v48 = vld [vmem:[#allocation6 + $0xa38] sm:$0xf0] }
  0xe1   :  { %2681 = vmatpush.bf16.msrb.mxu2 %v9867_v39  ;;  %v9978_v39 = vld [vmem:[#allocation6 + $0x5f8] sm:$0xf]  ;;  %v9279_v46 = vor.u32 %v13557_v35, %v9278_v34  ;;  %v2392_v57 = vadd.f32 %v2391_v52, %v510_v40  ;;  %v9671_v34 = vor.u32 %v13655_v21, %v9670_v17  ;;  %v10510_v47 = vld [vmem:[#allocation6 + $0xa20] sm:$0xf]  ;;  %v13638_v58 = vld [vmem:[#allocation6 + $0x324] sm:$0xf] }
  0xe2   :  { %2656 = vmatpush.bf16.msra.mxu3 %v9391_v43  ;;  %2637 = vmatmul.bf16.vlgmr.msrb.gmra.mxu0 %v14858_v37  ;;  %v9502_v43 = vld [vmem:[#allocation6 + $0x240] sm:$0xf]  ;;  %v9979_v54 = vor.u32 %v13732_v42, %v9978_v39  ;;  %v13589_v39 = vld [vmem:[#allocation6 + $0x19c] sm:$0xf]  ;;  %v9420_v42 = vld [vmem:[#allocation6 + $0x1b4] sm:$0xf0] }
  0xe3   :  { %2694 = vmatpush.bf16.msra.mxu0 %v10091_v50  ;;  %v13550_v50 = vld [vmem:[#allocation6 + $0x60] sm:$0xf0]  ;;  %v9423_v52 = vor.u32 %v13589_v39, %v9420_v42  ;;  %v13568_v21 = vld [vmem:[#allocation6 + $0xf4] sm:$0xf]  ;;  %v9532_v42 = vld [vmem:[#allocation6 + $0x294] sm:$0xf0] }
  0xe4   :  { %2669 = vmatpush.bf16.msrb.mxu1 %v9615_v51  ;;  %v2354_v51 = vpop.f32.mrf.mxu0  ;;  %v2404_v63 = vpop.f32.mrf.mxu2  ;;  %v9251_v0 = vor.u32 %v13550_v50, %v9250_v49  ;;  %v10258_v50 = vld [vmem:[#allocation6 + $0x828] sm:$0xf] }
  0xe5   :  { %2682 = vmatpush.bf16.msrb.mxu2 %v9839_v55  ;;  %v9503_v55 = vor.u32 %v13613_v44, %v9502_v43  ;;  %v14895_v3 = vadd.f32 %v2404_v63, %v2392_v57  ;;  %v13645_v43 = vld [vmem:[#allocation6 + $0x35c] sm:$0xf]  ;;  %v9644_v44 = vld [vmem:[#allocation6 + $0x374] sm:$0xf0]  ;;  %v13802_v51 = vld [vmem:[#allocation6 + $0x840] sm:$0xf0] }
  0xe6   :  { %2657 = vmatpush.bf16.msra.mxu3 %v9363_v60  ;;  %v13725_v60 = vld [vmem:[#allocation6 + $0x5d8] sm:$0xf0]  ;;  %v9392_v57 = vld [vmem:[#allocation6 + $0x17c] sm:$0xf0]  ;;  %v10230_v63 = vld [vmem:[#allocation6 + $0x7f0] sm:$0xf] }
  0xe7   :  { %2695 = vmatpush.bf16.msra.mxu0 %v10063_v1  ;;  %v9698_v1 = vld [vmem:[#allocation6 + $0x3c8] sm:$0xf]  ;;  %v9951_v8 = vor.u32 %v13725_v60, %v9950_v56  ;;  %v10511_v56 = vor.u32 %v13865_v48, %v10510_v47  ;;  %v10259_v60 = vor.u32 %v13802_v51, %v10258_v50  ;;  %v13774_v48 = vld [vmem:[#allocation6 + $0x760] sm:$0xf0] }
  0xe8   :  { %2670 = vmatpush.bf16.msrb.mxu1 %v9587_v2  ;;  %v13662_v2 = vld [vmem:[#allocation6 + $0x3e0] sm:$0xf0]  ;;  %v2393_v28 = vpop.f32.mrf.mxu3  ;;  %v10146_v47 = vld [vmem:[#allocation6 + $0x748] sm:$0xf] }
  0xe9   :  { %2683 = vmatpush.bf16.msrb.mxu2 %v9811_v5  ;;  %v9222_v5 = vld [vmem:[#allocation6 + $0x10] sm:$0xf]  ;;  %v9699_v14 = vor.u32 %v13662_v2, %v9698_v1 }
  0xea   :  { %2658 = vmatpush.bf16.msra.mxu3 %v9335_v9  ;;  %v9475_v9 = vor.u32 %v13606_v62, %v9474_v61  ;;  %v10482_v61 = vld [vmem:[#allocation6 + $0x9e8] sm:$0xf]  ;;  %v13858_v62 = vld [vmem:[#allocation6 + $0xa00] sm:$0xf0] }
  0xeb   :  { %2696 = vmatpush.bf16.msra.mxu0 %v10035_v16  ;;  %10579 = vmatmul.msk.bf16.vlgmr.msra.gmra.mxu1 %vm2287_vm0, %v14852_v45  ;;  %v13599_v16 = vld [vmem:[#allocation6 + $0x1e8] sm:$0xf0] }
  0xec   :  { %2671 = vmatpush.bf16.msrb.mxu1 %v9559_v20  ;;  %v9223_v20 = vor.u32 %v13543_v6, %v9222_v5  ;;  %v9447_v30 = vor.u32 %v13599_v16, %v9446_v15  ;;  %v2406_v40 = vpop.f32.mrf.mxu2  ;;  %v13575_v5 = vld [vmem:[#allocation6 + $0x12c] sm:$0xf]  ;;  %v10483_v6 = vor.u32 %v13858_v62, %v10482_v61  ;;  %v13788_v15 = vld [vmem:[#allocation6 + $0x7d0] sm:$0xf0]  ;;  %v10147_v61 = vor.u32 %v13774_v48, %v10146_v47  ;;  %v10370_v62 = vld [vmem:[#allocation6 + $0x908] sm:$0xf] }
  0xed   :  { %2684 = vmatpush.bf16.msrb.mxu2 %v9783_v24  ;;  %v13872_v24 = vld [vmem:[#allocation6 + $0xa70] sm:$0xf0]  ;;  %v9367_v17 = vor.u32 %v13575_v5, %v9364_v7  ;;  %v9308_v40 = vld [vmem:[#allocation6 + $0xd4] sm:$0xf0]  ;;  %v13701_v7 = vld [vmem:[#allocation6 + $0x51c] sm:$0xf] }
  0xee   :  { %2659 = vmatpush.bf16.msra.mxu3 %v9307_v29  ;;  %v9923_v29 = vor.u32 %v13718_v13, %v9922_v12  ;;  %v10539_v35 = vor.u32 %v13872_v24, %v10538_v22  ;;  %v10454_v12 = vld [vmem:[#allocation6 + $0x9b0] sm:$0xf]  ;;  %v13851_v13 = vld [vmem:[#allocation6 + $0x9c8] sm:$0xf0]  ;;  %v13750_v48 = vld [vmem:[#allocation6 + $0x6a4] sm:$0xf] }
  0xef   :  { %2697 = vmatpush.bf16.msra.mxu0 %v10007_v36  ;;  %v9894_v36 = vld [vmem:[#allocation6 + $0x550] sm:$0xf]  ;;  %v10455_v24 = vor.u32 %v13851_v13, %v10454_v12  ;;  %v9252_v13 = vld [vmem:[#allocation6 + $0x64] sm:$0xf0] }
  0xf0   :  { %2672 = vmatpush.bf16.msrb.mxu1 %v9531_v38  ;;  %v13711_v38 = vld [vmem:[#allocation6 + $0x568] sm:$0xf0] }
  0xf1   :  { %2685 = vmatpush.bf16.msrb.mxu2 %v9755_v41  ;;  %v10567_v41 = vor.u32 %v13879_v27, %v10566_v26  ;;  %v9895_v49 = vor.u32 %v13711_v38, %v9894_v36  ;;  %v13624_v26 = vld [vmem:[#allocation6 + $0x2b4] sm:$0xf]  ;;  %v9560_v27 = vld [vmem:[#allocation6 + $0x2cc] sm:$0xf0]  ;;  %v13561_v38 = vld [vmem:[#allocation6 + $0xbc] sm:$0xf] }
  0xf2   :  { %2660 = vmatpush.bf16.msra.mxu3 %v9279_v46  ;;  %v10287_v46 = vor.u32 %v13809_v32, %v10286_v31  ;;  %v10174_v31 = vld [vmem:[#allocation6 + $0x780] sm:$0xf]  ;;  %v13781_v32 = vld [vmem:[#allocation6 + $0x798] sm:$0xf0]  ;;  %v9311_v50 = vor.u32 %v13561_v38, %v9308_v40  ;;  %v9448_v38 = vld [vmem:[#allocation6 + $0x1ec] sm:$0xf0] }
  0xf3   :  { %2698 = vmatpush.bf16.msra.mxu0 %v9979_v54  ;;  %v9647_v54 = vor.u32 %v13645_v43, %v9644_v44  ;;  %v10175_v43 = vor.u32 %v13781_v32, %v10174_v31  ;;  %v10398_v44 = vld [vmem:[#allocation6 + $0x940] sm:$0xf]  ;;  %v9224_v31 = vld [vmem:[#allocation6 + $0x2c] sm:$0xf0] }
  0xf4   :  { %2673 = vmatpush.bf16.msrb.mxu1 %v9503_v55  ;;  %v13582_v55 = vld [vmem:[#allocation6 + $0x164] sm:$0xf] }
  0xf5   :  { %2686 = vmatpush.bf16.msrb.mxu2 %v9727_v59  ;;  %v9616_v59 = vld [vmem:[#allocation6 + $0x33c] sm:$0xf0]  ;;  %v9395_v1 = vor.u32 %v13582_v55, %v9392_v57 }
  0xf6   :  { %2661 = vmatpush.bf16.msra.mxu3 %v9251_v0  ;;  %v13795_v0 = vld [vmem:[#allocation6 + $0x808] sm:$0xf0]  ;;  %v9619_v2 = vor.u32 %v13638_v58, %v9616_v59  ;;  %v9280_v58 = vld [vmem:[#allocation6 + $0x9c] sm:$0xf0]  ;;  %v13610_v59 = vld [vmem:[#allocation6 + $0x244] sm:$0xf] }
  0xf7   :  { %2699 = vmatpush.bf16.msra.mxu0 %v9951_v8  ;;  %v13631_v8 = vld [vmem:[#allocation6 + $0x2ec] sm:$0xf]  ;;  %v10231_v10 = vor.u32 %v13795_v0, %v10230_v63  ;;  %v2417_v16 = vpop.f32.mrf.mxu0  ;;  %v13830_v63 = vld [vmem:[#allocation6 + $0x920] sm:$0xf0] }
  0xf8   :  { %2674 = vmatpush.bf16.msrb.mxu1 %v9475_v9  ;;  %v9588_v9 = vld [vmem:[#allocation6 + $0x304] sm:$0xf0]  ;;  %v2418_v22 = vadd.f32 %v2417_v16, %v14895_v3  ;;  %v2430_v36 = vpop.f32.mrf.mxu1  ;;  %v10371_v12 = vor.u32 %v13830_v63, %v10370_v62  ;;  %v13743_v63 = vld [vmem:[#allocation6 + $0x66c] sm:$0xf] }
  0xf9   :  { %2687 = vmatpush.bf16.msrb.mxu2 %v9699_v14  ;;  %v10202_v14 = vld [vmem:[#allocation6 + $0x7b8] sm:$0xf] }
  0xfa   :  { %2662 = vmatpush.bf16.msra.mxu3 %v9223_v20  ;;  %v9591_v20 = vor.u32 %v13631_v8, %v9588_v9  ;;  %v10203_v28 = vor.u32 %v13788_v15, %v10202_v14  ;;  %v2431_v3 = vadd.f32 %v2430_v36, %v2418_v22  ;;  %v9868_v8 = vld [vmem:[#allocation6 + $0x534] sm:$0xf0]  ;;  %v13547_v9 = vld [vmem:[#allocation6 + $0x4c] sm:$0xf]  ;;  %v9476_v15 = vld [vmem:[#allocation6 + $0x224] sm:$0xf0] }
  0xfb   :  { %2700 = vmatpush.bf16.msra.mxu0 %v9923_v29  ;;  %v10426_v29 = vld [vmem:[#allocation6 + $0x978] sm:$0xf]  ;;  %v13603_v14 = vld [vmem:[#allocation6 + $0x20c] sm:$0xf]  ;;  %v13757_v22 = vld [vmem:[#allocation6 + $0x6dc] sm:$0xf] }
  0xfc   :  { %2675 = vmatpush.bf16.msrb.mxu1 %v9447_v30  ;;  %v13844_v30 = vld [vmem:[#allocation6 + $0x990] sm:$0xf0] }
  0xfd   :  { %2688 = vmatpush.bf16.msrb.mxu2 %v9671_v34  ;;  %2663 = vmatmul.bf16.vlgmr.msra.gmra.mxu3 %v14843_v4  ;;  %v10427_v39 = vor.u32 %v13844_v30, %v10426_v29  ;;  %v9840_v29 = vld [vmem:[#allocation6 + $0x4fc] sm:$0xf0]  ;;  %v13540_v30 = vld [vmem:[#allocation6 + $0x14] sm:$0xf] }
  0xfe   :  { %2707 = vmatpush.bf16.msrb.mxu3 %v10315_v25  ;;  %v9336_v25 = vld [vmem:[#allocation6 + $0x10c] sm:$0xf0]  ;;  %v13596_v36 = vld [vmem:[#allocation6 + $0x1d4] sm:$0xf] }
  0xff   :  { %2676 = vmatmul.bf16.vlgmr.msrb.gmra.mxu1 %v14846_v18  ;;  %2701 = vmatpush.bf16.msra.mxu0 %v9895_v49  ;;  %v9339_v34 = vor.u32 %v13568_v21, %v9336_v25  ;;  %v2419_v49 = vpop.f32.mrf.mxu0  ;;  %v9871_v21 = vor.u32 %v13701_v7, %v9868_v8  ;;  %v13694_v25 = vld [vmem:[#allocation6 + $0x4e4] sm:$0xf]  ;;  %v13799_v8 = vld [vmem:[#allocation6 + $0x82c] sm:$0xf] }
 0x100   :  { %2720 = vmatpush.bf16.msra.mxu1 %v10539_v35  ;;  %2689 = vmatmul.bf16.vlgmr.msrb.gmra.mxu2 %v14840_v53  ;;  %v9563_v35 = vor.u32 %v13624_v26, %v9560_v27  ;;  %v9255_v27 = vor.u32 %v13547_v9, %v9252_v13  ;;  %v9843_v47 = vor.u32 %v13694_v25, %v9840_v29  ;;  %v10064_v49 = vld [vmem:[#allocation6 + $0x6bc] sm:$0xf0]  ;;  %v10484_v13 = vld [vmem:[#allocation6 + $0xa04] sm:$0xf0]  ;;  %v10232_v25 = vld [vmem:[#allocation6 + $0x80c] sm:$0xf0] }
 0x101   :  { %2740 = vmatpush.bf16.msra.mxu2 %v10567_v41  ;;  %v13617_v41 = vld [vmem:[#allocation6 + $0x27c] sm:$0xf]  ;;  %v511_v29 = vperm.slane %v14880_v11, 2 }
 0x102   :  { %2708 = vmatpush.bf16.msrb.mxu3 %v10287_v46  ;;  %2702 = vmatmul.bf16.vlgmr.msra.gmra.mxu0 %v14848_v19  ;;  %v13837_v46 = vld [vmem:[#allocation6 + $0x958] sm:$0xf0]  ;;  %v9535_v51 = vor.u32 %v13617_v41, %v9532_v42  ;;  %v10316_v41 = vld [vmem:[#allocation6 + $0x8b4] sm:$0xf0] }
 0x103   :  { %2746 = vmatpush.bf16.msrb.mxu0 %v9423_v52  ;;  %v2443_v52 = vpop.f32.mrf.mxu3  ;;  %v2456_v57 = vpop.f32.mrf.mxu2  ;;  %v13869_v42 = vld [vmem:[#allocation6 + $0xa5c] sm:$0xf] }
 0x104   :  { %2721 = vmatpush.bf16.msra.mxu1 %v10511_v56  ;;  %v2444_v55 = vadd.f32 %v2443_v52, %v2431_v3  ;;  %v10399_v56 = vor.u32 %v13837_v46, %v10398_v44  ;;  %v2928_v44 = vmax.f32 %v14890_v23, 0.0  ;;  %v13687_v52 = vld [vmem:[#allocation6 + $0x4ac] sm:$0xf]  ;;  %v10067_v23 = vor.u32 %v13750_v48, %v10064_v49  ;;  %v9952_v48 = vld [vmem:[#allocation6 + $0x5dc] sm:$0xf0] }
 0x105   :  { %2759 = vmatpush.bf16.msrb.mxu2 %v9647_v54  ;;  %v13554_v54 = vld [vmem:[#allocation6 + $0x84] sm:$0xf]  ;;  %v13659_v49 = vld [vmem:[#allocation6 + $0x3cc] sm:$0xf] }
 0x106   :  { %2709 = vmatpush.bf16.msrb.mxu3 %v10259_v60  ;;  %v9504_v60 = vld [vmem:[#allocation6 + $0x25c] sm:$0xf0]  ;;  %v2457_v0 = vadd.f32 %v2456_v57, %v2444_v55  ;;  %v9283_v5 = vor.u32 %v13554_v54, %v9280_v58  ;;  %v9812_v54 = vld [vmem:[#allocation6 + $0x4c4] sm:$0xf0]  ;;  %v13806_v58 = vld [vmem:[#allocation6 + $0x864] sm:$0xf] }
 0x107   :  { %2747 = vmatpush.bf16.msrb.mxu0 %v9395_v1  ;;  %v10118_v1 = vld [vmem:[#allocation6 + $0x710] sm:$0xf]  ;;  %v2469_v26 = vpop.f32.mrf.mxu0  ;;  %v9815_v62 = vor.u32 %v13687_v52, %v9812_v54  ;;  %v13778_v54 = vld [vmem:[#allocation6 + $0x784] sm:$0xf] }
 0x108   :  { %2722 = vmatpush.bf16.msra.mxu1 %v10483_v6  ;;  %v9507_v6 = vor.u32 %v13610_v59, %v9504_v60  ;;  %v10288_v59 = vld [vmem:[#allocation6 + $0x87c] sm:$0xf0]  ;;  %v13862_v60 = vld [vmem:[#allocation6 + $0xa24] sm:$0xf] }
 0x109   :  { %2760 = vmatpush.bf16.msrb.mxu2 %v9619_v2  ;;  %v13767_v2 = vld [vmem:[#allocation6 + $0x728] sm:$0xf0] }
 0x10a   :  { %2710 = vmatpush.bf16.msrb.mxu3 %v10231_v10  ;;  %v2432_v10 = vpop.f32.mrf.mxu1  ;;  %v10119_v16 = vor.u32 %v13767_v2, %v10118_v1  ;;  %v13680_v1 = vld [vmem:[#allocation6 + $0x474] sm:$0xf]  ;;  %v9784_v2 = vld [vmem:[#allocation6 + $0x48c] sm:$0xf0] }
 0x10b   :  { %2748 = vmatpush.bf16.msrb.mxu0 %v9367_v17  ;;  %v10342_v17 = vld [vmem:[#allocation6 + $0x8d0] sm:$0xf]  ;;  %v2445_v32 = vpop.f32.mrf.mxu3  ;;  %v2458_v3 = vpop.f32.mrf.mxu2  ;;  %v10260_v10 = vld [vmem:[#allocation6 + $0x844] sm:$0xf0] }
 0x10c   :  { %2723 = vmatpush.bf16.msra.mxu1 %v10455_v24  ;;  %v10092_v24 = vld [vmem:[#allocation6 + $0x6f4] sm:$0xf0]  ;;  %v13785_v3 = vld [vmem:[#allocation6 + $0x7bc] sm:$0xf] }
 0x10d   :  { %2761 = vmatpush.bf16.msrb.mxu2 %v9591_v20  ;;  %v13823_v20 = vld [vmem:[#allocation6 + $0x8e8] sm:$0xf0]  ;;  %v10095_v40 = vor.u32 %v13757_v22, %v10092_v24  ;;  %v13792_v24 = vld [vmem:[#allocation6 + $0x7f4] sm:$0xf]  ;;  %v9980_v32 = vld [vmem:[#allocation6 + $0x614] sm:$0xf0] }
 0x10e   :  { %2711 = vmatpush.bf16.msrb.mxu3 %v10203_v28  ;;  %v9479_v28 = vor.u32 %v13603_v14, %v9476_v15  ;;  %v9787_v14 = vor.u32 %v13680_v1, %v9784_v2  ;;  %v13736_v15 = vld [vmem:[#allocation6 + $0x634] sm:$0xf]  ;;  %v9672_v1 = vld [vmem:[#allocation6 + $0x3ac] sm:$0xf0] }
 0x10f   :  { %2749 = vmatpush.bf16.msrb.mxu0 %v9339_v34  ;;  %v2470_v34 = vadd.f32 %v2469_v26, %v2457_v0  ;;  %v10036_v0 = vld [vmem:[#allocation6 + $0x684] sm:$0xf0] }
 0x110   :  { %2724 = vmatpush.bf16.msra.mxu1 %v10427_v39  ;;  %10580 = vmatmul.msk.bf16.vlgmr.msra.gmra.mxu2 %vm2287_vm0, %v14852_v45  ;;  %v13813_v39 = vld [vmem:[#allocation6 + $0x89c] sm:$0xf]  ;;  %v10039_v9 = vor.u32 %v13743_v63, %v10036_v0  ;;  %v9924_v63 = vld [vmem:[#allocation6 + $0x5a4] sm:$0xf0]  ;;  %v13652_v0 = vld [vmem:[#allocation6 + $0x394] sm:$0xf] }
 0x111   :  { %2762 = vmatpush.bf16.msrb.mxu2 %v9563_v35  ;;  %v10343_v35 = vor.u32 %v13823_v20, %v10342_v17  ;;  %v2929_v46 = vmax.f32 %v2470_v34, 0.0  ;;  %v13673_v17 = vld [vmem:[#allocation6 + $0x43c] sm:$0xf]  ;;  %v9756_v20 = vld [vmem:[#allocation6 + $0x454] sm:$0xf0] }
 0x112   :  { %2712 = vmatpush.bf16.msrb.mxu3 %v10175_v43  ;;  %v10540_v43 = vld [vmem:[#allocation6 + $0xa74] sm:$0xf0]  ;;  %v13666_v34 = vld [vmem:[#allocation6 + $0x404] sm:$0xf] }
 0x113   :  { %2750 = vmatpush.bf16.msrb.mxu0 %v9311_v50  ;;  %v9227_v50 = vor.u32 %v13540_v30, %v9224_v31  ;;  %v14905_v55 = vpack.c.bf16 %v2929_v46, %v2928_v44  ;;  %v10543_v57 = vor.u32 %v13869_v42, %v10540_v43  ;;  %v9759_v30 = vor.u32 %v13673_v17, %v9756_v20  ;;  %v13729_v31 = vld [vmem:[#allocation6 + $0x5fc] sm:$0xf]  ;;  %v10204_v42 = vld [vmem:[#allocation6 + $0x7d4] sm:$0xf0]  ;;  %v10372_v17 = vld [vmem:[#allocation6 + $0x924] sm:$0xf0] }
 0x114   :  { %2725 = vmatpush.bf16.msra.mxu1 %v10399_v56  ;;  %v10319_v56 = vor.u32 %v13813_v39, %v10316_v41  ;;  %v9983_v41 = vor.u32 %v13729_v31, %v9980_v32  ;;  %v13841_v43 = vld [vmem:[#allocation6 + $0x97c] sm:$0xf]  ;;  %v10428_v44 = vld [vmem:[#allocation6 + $0x994] sm:$0xf0]  ;;  %v13764_v32 = vld [vmem:[#allocation6 + $0x714] sm:$0xf] }
 0x115   :  { %2763 = vmatpush.bf16.msrb.mxu2 %v9535_v51  ;;  %v9451_v51 = vor.u32 %v13596_v36, %v9448_v38  ;;  %v10235_v38 = vor.u32 %v13792_v24, %v10232_v25  ;;  %v10431_v52 = vor.u32 %v13841_v43, %v10428_v44  ;;  %v9896_v24 = vld [vmem:[#allocation6 + $0x56c] sm:$0xf0]  ;;  %v9426_v25 = vld [vmem:[#allocation6 + $0x1a0] sm:$0xf]  ;;  %v13761_v44 = vld [vmem:[#allocation6 + $0x6f8] sm:$0xf0] }
 0x116   :  { %2713 = vmatpush.bf16.msrb.mxu3 %v10147_v61  ;;  %v10512_v61 = vld [vmem:[#allocation6 + $0xa3c] sm:$0xf0] }
 0x117   :  { %2751 = vmatpush.bf16.msrb.mxu0 %v9283_v5  ;;  %v2471_v5 = vpop.f32.mrf.mxu0  ;;  %v10515_v7 = vor.u32 %v13862_v60, %v10512_v61  ;;  %v10098_v43 = vld [vmem:[#allocation6 + $0x6e0] sm:$0xf] }
 0x118   :  { %2726 = vmatpush.bf16.msra.mxu1 %v10371_v12  ;;  %v13855_v12 = vld [vmem:[#allocation6 + $0x9ec] sm:$0xf] }
 0x119   :  { %2764 = vmatpush.bf16.msrb.mxu2 %v9507_v6  ;;  %v10291_v6 = vor.u32 %v13806_v58, %v10288_v59  ;;  %v10487_v22 = vor.u32 %v13855_v12, %v10484_v13  ;;  %v10176_v58 = vld [vmem:[#allocation6 + $0x79c] sm:$0xf0] }
 0x11a   :  { %2714 = vmatpush.bf16.msrb.mxu3 %v10119_v16  ;;  %v10008_v16 = vld [vmem:[#allocation6 + $0x64c] sm:$0xf0]  ;;  %v10400_v59 = vld [vmem:[#allocation6 + $0x95c] sm:$0xf0] }
 0x11b   :  { %2752 = vmatpush.bf16.msrb.mxu0 %v9255_v27  ;;  %v10011_v26 = vor.u32 %v13736_v15, %v10008_v16  ;;  %v13848_v27 = vld [vmem:[#allocation6 + $0x9b4] sm:$0xf]  ;;  %v10148_v15 = vld [vmem:[#allocation6 + $0x764] sm:$0xf0]  ;;  %v13827_v16 = vld [vmem:[#allocation6 + $0x90c] sm:$0xf] }
 0x11c   :  { %2727 = vmatpush.bf16.msra.mxu1 %v10343_v35  ;;  %v9728_v35 = vld [vmem:[#allocation6 + $0x41c] sm:$0xf0]  ;;  %v10375_v31 = vor.u32 %v13827_v16, %v10372_v17  ;;  %v13628_v16 = vld [vmem:[#allocation6 + $0x2d0] sm:$0xf0] }
 0x11d   :  { %2765 = vmatpush.bf16.msrb.mxu2 %v9479_v28  ;;  %2715 = vmatmul.bf16.vlgmr.msrb.gmra.mxu3 %v14856_v33  ;;  %v10456_v28 = vld [vmem:[#allocation6 + $0x9cc] sm:$0xf0]  ;;  %v9731_v11 = vor.u32 %v13666_v34, %v9728_v35  ;;  %v13820_v35 = vld [vmem:[#allocation6 + $0x8d4] sm:$0xf] }
 0x11e   :  { %2772 = vmatpush.bf16.msra.mxu3 %v9871_v21  ;;  %v10263_v21 = vor.u32 %v13799_v8, %v10260_v10  ;;  %v10459_v39 = vor.u32 %v13848_v27, %v10456_v28  ;;  %v13771_v8 = vld [vmem:[#allocation6 + $0x74c] sm:$0xf]  ;;  %v10568_v10 = vld [vmem:[#allocation6 + $0xaac] sm:$0xf0]  ;;  %v13593_v27 = vld [vmem:[#allocation6 + $0x1b8] sm:$0xf0] }
 0x11f   :  { %2753 = vmatpush.bf16.msrb.mxu0 %v9227_v50  ;;  %2728 = vmatmul.bf16.vlgmr.msra.gmra.mxu1 %v14858_v37  ;;  %v2508_v36 = vpop.f32.mrf.mxu0  ;;  %v9700_v50 = vld [vmem:[#allocation6 + $0x3e4] sm:$0xf0]  ;;  %v9650_v28 = vld [vmem:[#allocation6 + $0x360] sm:$0xf]  ;;  %v10120_v34 = vld [vmem:[#allocation6 + $0x72c] sm:$0xf0] }
 0x120   :  { %2785 = vmatpush.bf16.msrb.mxu1 %v10095_v40  ;;  %v2482_v40 = vpop.f32.mrf.mxu1  ;;  %v9703_v61 = vor.u32 %v13659_v49, %v9700_v50  ;;  %v10123_v50 = vor.u32 %v13764_v32, %v10120_v34  ;;  %v9314_v32 = vld [vmem:[#allocation6 + $0xc0] sm:$0xf]  ;;  %v13565_v34 = vld [vmem:[#allocation6 + $0xd8] sm:$0xf0] }
 0x121   :  { %2766 = vmatpush.bf16.msrb.mxu2 %v9451_v51  ;;  %v2483_v46 = vadd.f32 %v2482_v40, %v511_v29  ;;  %v10207_v51 = vor.u32 %v13785_v3, %v10204_v42  ;;  %v13649_v29 = vld [vmem:[#allocation6 + $0x378] sm:$0xf0]  ;;  %v9874_v3 = vld [vmem:[#allocation6 + $0x520] sm:$0xf] }
 0x122   :  { %2773 = vmatpush.bf16.msra.mxu3 %v9843_v47  ;;  %2754 = vmatmul.bf16.vlgmr.msrb.gmra.mxu0 %v14843_v4  ;;  %v13722_v47 = vld [vmem:[#allocation6 + $0x5c4] sm:$0xf]  ;;  %v13705_v40 = vld [vmem:[#allocation6 + $0x538] sm:$0xf0]  ;;  %v9651_v42 = vor.u32 %v13649_v29, %v9650_v28  ;;  %v9790_v28 = vld [vmem:[#allocation6 + $0x478] sm:$0xf] }
 0x123   :  { %2798 = vmatpush.bf16.msra.mxu0 %v10319_v56  ;;  %v2495_v56 = vpop.f32.mrf.mxu3  ;;  %v2521_v13 = vpop.f32.mrf.mxu2  ;;  %v13684_v29 = vld [vmem:[#allocation6 + $0x490] sm:$0xf0] }
 0x124   :  { %2786 = vmatpush.bf16.msrb.mxu1 %v10067_v23  ;;  %2767 = vmatmul.bf16.vlgmr.msrb.gmra.mxu2 %v14846_v18  ;;  %v13834_v23 = vld [vmem:[#allocation6 + $0x944] sm:$0xf]  ;;  %v2496_v60 = vadd.f32 %v2495_v56, %v2483_v46  ;;  %v9398_v46 = vld [vmem:[#allocation6 + $0x168] sm:$0xf]  ;;  %v10099_v56 = vor.u32 %v13761_v44, %v10098_v43  ;;  %v13733_v43 = vld [vmem:[#allocation6 + $0x618] sm:$0xf0] }
 0x125   :  { %2811 = vmatpush.bf16.msra.mxu2 %v10543_v57  ;;  %v9955_v57 = vor.u32 %v13722_v47, %v9952_v48  ;;  %v9622_v47 = vld [vmem:[#allocation6 + $0x328] sm:$0xf]  ;;  %v13642_v48 = vld [vmem:[#allocation6 + $0x340] sm:$0xf0] }
 0x126   :  { %2774 = vmatpush.bf16.msra.mxu3 %v9815_v62  ;;  %v13715_v62 = vld [vmem:[#allocation6 + $0x58c] sm:$0xf]  ;;  %v2509_v5 = vadd.f32 %v2508_v36, %v2496_v60  ;;  %v10070_v60 = vld [vmem:[#allocation6 + $0x6a8] sm:$0xf] }
 0x127   :  { %2799 = vmatpush.bf16.msra.mxu0 %v10291_v6  ;;  %v2510_v2 = vpop.f32.mrf.mxu0  ;;  %v10179_v6 = vor.u32 %v13778_v54, %v10176_v58  ;;  %v9875_v54 = vor.u32 %v13705_v40, %v9874_v3  ;;  %v13698_v58 = vld [vmem:[#allocation6 + $0x500] sm:$0xf0]  ;;  %v9315_v3 = vor.u32 %v13565_v34, %v9314_v32  ;;  %v13677_v40 = vld [vmem:[#allocation6 + $0x458] sm:$0xf0]  ;;  %v9286_v44 = vld [vmem:[#allocation6 + $0x88] sm:$0xf] }
 0x128   :  { %2787 = vmatpush.bf16.msrb.mxu1 %v10039_v9  ;;  %v13876_v9 = vld [vmem:[#allocation6 + $0xa94] sm:$0xf]  ;;  %v2484_v12 = vpop.f32.mrf.mxu1  ;;  %v14912_v20 = vadd.f32 %v2521_v13, %v2509_v5  ;;  %v9342_v13 = vld [vmem:[#allocation6 + $0xf8] sm:$0xf] }
 0x129   :  { %2812 = vmatpush.bf16.msra.mxu2 %v10515_v7  ;;  %v10403_v7 = vor.u32 %v13834_v23, %v10400_v59  ;;  %v9623_v59 = vor.u32 %v13642_v48, %v9622_v47  ;;  %v13747_v12 = vld [vmem:[#allocation6 + $0x688] sm:$0xf0]  ;;  %v9510_v48 = vld [vmem:[#allocation6 + $0x248] sm:$0xf]  ;;  %v13656_v32 = vld [vmem:[#allocation6 + $0x3b0] sm:$0xf0] }
 0x12a   :  { %2775 = vmatpush.bf16.msra.mxu3 %v9787_v14  ;;  %v9927_v14 = vor.u32 %v13715_v62, %v9924_v63  ;;  %v9370_v62 = vld [vmem:[#allocation6 + $0x130] sm:$0xf]  ;;  %v13579_v63 = vld [vmem:[#allocation6 + $0x148] sm:$0xf0]  ;;  %v9902_v34 = vld [vmem:[#allocation6 + $0x558] sm:$0xf] }
 0x12b   :  { %2800 = vmatpush.bf16.msra.mxu0 %v10263_v21  ;;  %v9675_v21 = vor.u32 %v13652_v0, %v9672_v1  ;;  %v2497_v36 = vpop.f32.mrf.mxu3  ;;  %v9594_v0 = vld [vmem:[#allocation6 + $0x2f0] sm:$0xf]  ;;  %v13635_v1 = vld [vmem:[#allocation6 + $0x308] sm:$0xf0] }
 0x12c   :  { %2788 = vmatpush.bf16.msrb.mxu1 %v10011_v26  ;;  %v10571_v26 = vor.u32 %v13876_v9, %v10568_v10  ;;  %v9595_v9 = vor.u32 %v13635_v1, %v9594_v0  ;;  %v10042_v10 = vld [vmem:[#allocation6 + $0x670] sm:$0xf]  ;;  %v13621_v36 = vld [vmem:[#allocation6 + $0x298] sm:$0xf0]  ;;  %v13551_v0 = vld [vmem:[#allocation6 + $0x68] sm:$0xf0] }
 0x12d   :  { %2813 = vmatpush.bf16.msra.mxu2 %v10487_v22  ;;  %v13708_v22 = vld [vmem:[#allocation6 + $0x554] sm:$0xf] }
 0x12e   :  { %2776 = vmatpush.bf16.msra.mxu3 %v9759_v30  ;;  %v10151_v30 = vor.u32 %v13771_v8, %v10148_v15  ;;  %v9371_v8 = vor.u32 %v13579_v63, %v9370_v62  ;;  %v9566_v15 = vld [vmem:[#allocation6 + $0x2b8] sm:$0xf]  ;;  %v13726_v62 = vld [vmem:[#allocation6 + $0x5e0] sm:$0xf0]  ;;  %v9258_v63 = vld [vmem:[#allocation6 + $0x50] sm:$0xf] }
 0x12f   :  { %2801 = vmatpush.bf16.msra.mxu0 %v10235_v38  ;;  %v9899_v38 = vor.u32 %v13708_v22, %v9896_v24  ;;  %v14914_v49 = vpop.f32.mrf.mxu0  ;;  %v10043_v24 = vor.u32 %v13747_v12, %v10042_v10  ;;  %v13663_v10 = vld [vmem:[#allocation6 + $0x3e8] sm:$0xf0]  ;;  %v9930_v12 = vld [vmem:[#allocation6 + $0x590] sm:$0xf] }
 0x130   :  { %2789 = vmatpush.bf16.msrb.mxu1 %v9983_v41  ;;  %v9427_v41 = vor.u32 %v13593_v27, %v9426_v25  ;;  %v9567_v27 = vor.u32 %v13628_v16, %v9566_v15  ;;  %v13544_v15 = vld [vmem:[#allocation6 + $0x30] sm:$0xf0]  ;;  %v9454_v16 = vld [vmem:[#allocation6 + $0x1d8] sm:$0xf] }
 0x131   :  { %2814 = vmatpush.bf16.msra.mxu2 %v10459_v39  ;;  %v10344_v39 = vld [vmem:[#allocation6 + $0x8ec] sm:$0xf0] }
 0x132   :  { %2777 = vmatpush.bf16.msra.mxu3 %v9731_v11  ;;  %v13586_v11 = vld [vmem:[#allocation6 + $0x180] sm:$0xf0] }
 0x133   :  { %2802 = vmatpush.bf16.msra.mxu0 %v10207_v51  ;;  %v10347_v51 = vor.u32 %v13820_v35, %v10344_v39  ;;  %v9399_v23 = vor.u32 %v13586_v11, %v9398_v46  ;;  %v9538_v35 = vld [vmem:[#allocation6 + $0x280] sm:$0xf]  ;;  %v13558_v46 = vld [vmem:[#allocation6 + $0xa0] sm:$0xf0] }
 0x134   :  { %2790 = vmatpush.bf16.msrb.mxu1 %v9955_v57  ;;  %v9846_v57 = vld [vmem:[#allocation6 + $0x4e8] sm:$0xf] }
 0x135   :  { %2815 = vmatpush.bf16.msra.mxu2 %v10431_v52  ;;  %v2523_v52 = vpop.f32.mrf.mxu2  ;;  %v9847_v2 = vor.u32 %v13698_v58, %v9846_v57  ;;  %v9287_v57 = vor.u32 %v13558_v46, %v9286_v44  ;;  %v9734_v58 = vld [vmem:[#allocation6 + $0x408] sm:$0xf]  ;;  %v13810_v44 = vld [vmem:[#allocation6 + $0x880] sm:$0xf0] }
 0x136   :  { %2778 = vmatpush.bf16.msra.mxu3 %v9703_v61  ;;  %v13754_v61 = vld [vmem:[#allocation6 + $0x6c0] sm:$0xf0] }
 0x137   :  { %2803 = vmatpush.bf16.msra.mxu0 %v10179_v6  ;;  %v10071_v5 = vor.u32 %v13754_v61, %v10070_v60  ;;  %v9818_v6 = vld [vmem:[#allocation6 + $0x4b0] sm:$0xf]  ;;  %v2562_v17 = vpop.f32.mrf.mxu0 }
 0x138   :  { %2791 = vmatpush.bf16.msrb.mxu1 %v9927_v14  ;;  %v13572_v14 = vld [vmem:[#allocation6 + $0x110] sm:$0xf0] }
 0x139   :  { %2816 = vmatpush.bf16.msra.mxu2 %v10403_v7  ;;  %v13691_v7 = vld [vmem:[#allocation6 + $0x4c8] sm:$0xf0] }
 0x13a   :  { %2779 = vmatpush.bf16.msra.mxu3 %v9675_v21  ;;  %v2534_v21 = vpop.f32.mrf.mxu1  ;;  %v9819_v22 = vor.u32 %v13691_v7, %v9818_v6  ;;  %v9706_v7 = vld [vmem:[#allocation6 + $0x3d0] sm:$0xf] }
 0x13b   :  { %2804 = vmatpush.bf16.msra.mxu0 %v10151_v30  ;;  %v2535_v25 = vadd.f32 %v2534_v21, %v14912_v20  ;;  %v10014_v30 = vld [vmem:[#allocation6 + $0x638] sm:$0xf]  ;;  %v9762_v20 = vld [vmem:[#allocation6 + $0x440] sm:$0xf]  ;;  %v13600_v21 = vld [vmem:[#allocation6 + $0x1f0] sm:$0xf0] }
 0x13c   :  { %2792 = vmatpush.bf16.msrb.mxu1 %v9899_v38  ;;  %v9791_v38 = vor.u32 %v13684_v29, %v9790_v28  ;;  %v9763_v52 = vor.u32 %v13677_v40, %v9762_v20  ;;  %v13873_v28 = vld [vmem:[#allocation6 + $0xa78] sm:$0xf0]  ;;  %v9678_v29 = vld [vmem:[#allocation6 + $0x398] sm:$0xf]  ;;  %v13880_v20 = vld [vmem:[#allocation6 + $0xab0] sm:$0xf0] }
 0x13d   :  { %2817 = vmatpush.bf16.msra.mxu2 %v10375_v31  ;;  %2780 = vmatmul.bf16.vlgmr.msra.gmra.mxu3 %v14840_v53  ;;  %v13740_v31 = vld [vmem:[#allocation6 + $0x650] sm:$0xf0]  ;;  %v9679_v46 = vor.u32 %v13656_v32, %v9678_v29  ;;  %v10434_v29 = vld [vmem:[#allocation6 + $0x980] sm:$0xf] }
 0x13e   :  { %2831 = vmatpush.bf16.msrb.mxu3 %v10571_v26  ;;  %v9343_v26 = vor.u32 %v13572_v14, %v9342_v13  ;;  %v10015_v39 = vor.u32 %v13740_v31, %v10014_v30  ;;  %v9230_v14 = vld [vmem:[#allocation6 + $0x18] sm:$0xf]  ;;  %v14311_v32 = vld [vmem:[#allocation6 + $0xd70] sm:$0xf0] }
 0x13f   :  { %2805 = vmatpush.bf16.msra.mxu0 %v10123_v50  ;;  %2793 = vmatmul.bf16.vlgmr.msrb.gmra.mxu1 %v14848_v19  ;;  %v14921_v11 = vpop.f32.mrf.mxu0  ;;  %v13614_v50 = vld [vmem:[#allocation6 + $0x260] sm:$0xf0]  ;;  %v9231_v31 = vor.u32 %v13544_v15, %v9230_v14  ;;  %v10462_v14 = vld [vmem:[#allocation6 + $0x9b8] sm:$0xf]  ;;  %v13852_v15 = vld [vmem:[#allocation6 + $0x9d0] sm:$0xf0] }
 0x140   :  { %2837 = vmatpush.bf16.msra.mxu1 %v9427_v41  ;;  %v9986_v41 = vld [vmem:[#allocation6 + $0x600] sm:$0xf]  ;;  %v2547_v47 = vpop.f32.mrf.mxu3  ;;  %v9511_v61 = vor.u32 %v13614_v50, %v9510_v48  ;;  %v13866_v48 = vld [vmem:[#allocation6 + $0xa40] sm:$0xf0] }
 0x141   :  { %2818 = vmatpush.bf16.msra.mxu2 %v10347_v51  ;;  %v2548_v51 = vadd.f32 %v2547_v47, %v2535_v25  ;;  %v10518_v47 = vld [vmem:[#allocation6 + $0xa28] sm:$0xf] }
 0x142   :  { %2850 = vmatpush.bf16.msra.mxu3 %v9651_v42  ;;  %2806 = vmatmul.bf16.vlgmr.msra.gmra.mxu0 %v14856_v33  ;;  %v9539_v42 = vor.u32 %v13621_v36, %v9538_v35  ;;  %v13712_v35 = vld [vmem:[#allocation6 + $0x570] sm:$0xf0]  ;;  %v9455_v36 = vor.u32 %v13600_v21, %v9454_v16  ;;  %v14318_v21 = vld [vmem:[#allocation6 + $0xda8] sm:$0xf0] }
 0x143   :  { %2863 = vmatpush.bf16.msrb.mxu0 %v9875_v54  ;;  %v2536_v54 = vpop.f32.mrf.mxu1  ;;  %v14926_v60 = vadd.f32 %v14914_v49, %v2548_v51  ;;  %v14928_v1 = vpop.f32.mrf.mxu2  ;;  %v13719_v49 = vld [vmem:[#allocation6 + $0x5a8] sm:$0xf0]  ;;  %v9903_v50 = vor.u32 %v13712_v35, %v9902_v34  ;;  %v12048_v35 = vld [vmem:[#allocation6 + $0xb60] sm:$0xf] }
 0x144   :  { %2838 = vmatpush.bf16.msra.mxu1 %v9399_v23  ;;  %2819 = vmatmul.bf16.vlgmr.msra.gmra.mxu2 %v14858_v37  ;;  %v13670_v23 = vld [vmem:[#allocation6 + $0x420] sm:$0xf0]  ;;  %v9931_v30 = vor.u32 %v13719_v49, %v9930_v12  ;;  %v14332_v54 = vld [vmem:[#allocation6 + $0xe18] sm:$0xf0]  ;;  %v14262_v12 = vld [vmem:[#allocation6 + $0xbe8] sm:$0xf0] }
 0x145   :  { %2876 = vmatpush.bf16.msrb.mxu2 %v10099_v56  ;;  %v9987_v56 = vor.u32 %v13733_v43, %v9986_v41  ;;  %v9735_v6 = vor.u32 %v13670_v23, %v9734_v58  ;;  %v10294_v43 = vld [vmem:[#allocation6 + $0x868] sm:$0xf]  ;;  %v10519_v23 = vor.u32 %v13866_v48, %v10518_v47  ;;  %v10238_v49 = vld [vmem:[#allocation6 + $0x7f8] sm:$0xf]  ;;  %v14304_v47 = vld [vmem:[#allocation6 + $0xd38] sm:$0xf0] }
 0x146   :  { %2851 = vmatpush.bf16.msra.mxu3 %v9623_v59  ;;  %v9958_v59 = vld [vmem:[#allocation6 + $0x5c8] sm:$0xf]  ;;  %v14940_v48 = vld [vmem:[#allocation8] sm:$0x7f] }
 0x147   :  { %2864 = vmatpush.bf16.msrb.mxu0 %v9847_v2  ;;  %v9482_v2 = vld [vmem:[#allocation6 + $0x210] sm:$0xf]  ;;  %v2588_v17 = vpop.f32.mrf.mxu0  ;;  %v12132_v58 = vld [vmem:[#allocation6 + $0xc08] sm:$0xf] }
 0x148   :  { %2839 = vmatpush.bf16.msra.mxu1 %v9371_v8  ;;  %v9959_v8 = vor.u32 %v13726_v62, %v9958_v59  ;;  %v2549_v25 = vpop.f32.mrf.mxu3  ;;  %v14269_v59 = vld [vmem:[#allocation6 + $0xc20] sm:$0xf0]  ;;  %v13803_v62 = vld [vmem:[#allocation6 + $0x848] sm:$0xf0]  ;;  %v12328_v17 = vld [vmem:[#allocation6 + $0xd90] sm:$0xf] }
 0x149   :  { %2877 = vmatpush.bf16.msrb.mxu2 %v10071_v5  ;;  %v13607_v5 = vld [vmem:[#allocation6 + $0x228] sm:$0xf0]  ;;  %v10463_v25 = vor.u32 %v13852_v15, %v10462_v14  ;;  %v12608_v15 = vld [vmem:[#allocation6 + $0xfc0] sm:$0xf] }
 0x14a   :  { %2852 = vmatpush.bf16.msra.mxu3 %v9595_v9  ;;  %v9259_v9 = vor.u32 %v13551_v0, %v9258_v63  ;;  %v9483_v13 = vor.u32 %v13607_v5, %v9482_v2  ;;  %v10490_v0 = vld [vmem:[#allocation6 + $0x9f0] sm:$0xf]  ;;  %v13859_v2 = vld [vmem:[#allocation6 + $0xa08] sm:$0xf0]  ;;  %v12356_v5 = vld [vmem:[#allocation6 + $0xdc8] sm:$0xf] }
 0x14b   :  { %2865 = vmatpush.bf16.msrb.mxu0 %v9819_v22  ;;  %v10322_v22 = vld [vmem:[#allocation6 + $0x8a0] sm:$0xf]  ;;  %v2575_v40 = vpop.f32.mrf.mxu2 }
 0x14c   :  { %2840 = vmatpush.bf16.msra.mxu1 %v9343_v26  ;;  %v9707_v26 = vor.u32 %v13663_v10, %v9706_v7  ;;  %v12133_v7 = vor.u32 %v14269_v59, %v12132_v58  ;;  %v10491_v10 = vor.u32 %v13859_v2, %v10490_v0  ;;  %v14241_v58 = vld [vmem:[#allocation6 + $0xb40] sm:$0xf0]  ;;  %v13775_v59 = vld [vmem:[#allocation6 + $0x768] sm:$0xf0]  ;;  %v12244_v0 = vld [vmem:[#allocation6 + $0xce8] sm:$0xf] }
 0x14d   :  { %2878 = vmatpush.bf16.msrb.mxu2 %v10043_v24  ;;  %10581 = vmatmul.msk.bf16.vlgmr.msrb.gmra.mxu3 %vm2287_vm0, %v14852_v45  ;;  %v13817_v24 = vld [vmem:[#allocation6 + $0x8b8] sm:$0xf0]  ;;  %v14297_v2 = vld [vmem:[#allocation6 + $0xd00] sm:$0xf0] }
 0x14e   :  { %2853 = vmatpush.bf16.msra.mxu3 %v9567_v27  ;;  %v10546_v27 = vld [vmem:[#allocation6 + $0xa60] sm:$0xf]  ;;  %v12245_v14 = vor.u32 %v14297_v2, %v12244_v0  ;;  %v14423_v0 = vld [vmem:[#allocation6 + $0x10f0] sm:$0xf0] }
 0x14f   :  { %2866 = vmatpush.bf16.msrb.mxu0 %v9791_v38  ;;  %v10323_v38 = vor.u32 %v13817_v24, %v10322_v22  ;;  %v10547_v41 = vor.u32 %v13873_v28, %v10546_v27  ;;  %v12076_v24 = vld [vmem:[#allocation6 + $0xb98] sm:$0xf]  ;;  %v10210_v27 = vld [vmem:[#allocation6 + $0x7c0] sm:$0xf]  ;;  %v13789_v28 = vld [vmem:[#allocation6 + $0x7d8] sm:$0xf0] }
 0x150   :  { %2841 = vmatpush.bf16.msra.mxu1 %v9315_v3  ;;  %v10574_v3 = vld [vmem:[#allocation6 + $0xa98] sm:$0xf]  ;;  %v13280_v2 = vld [vmem:[#allocation6 + $0x1500] sm:$0xf] }
 0x151   :  { %2879 = vmatpush.bf16.msrb.mxu2 %v10015_v39  ;;  %v12160_v39 = vld [vmem:[#allocation6 + $0xc40] sm:$0xf]  ;;  %v10575_v51 = vor.u32 %v13880_v20, %v10574_v3  ;;  %v13782_v3 = vld [vmem:[#allocation6 + $0x7a0] sm:$0xf0] }
 0x152   :  { %2854 = vmatpush.bf16.msra.mxu3 %v9539_v42  ;;  %v14276_v42 = vld [vmem:[#allocation6 + $0xc58] sm:$0xf0] }
 0x153   :  { %2867 = vmatpush.bf16.msrb.mxu0 %v9763_v52  ;;  %v12384_v52 = vld [vmem:[#allocation6 + $0xe00] sm:$0xf] }
 0x154   :  { %2842 = vmatpush.bf16.msra.mxu1 %v9287_v57  ;;  %v10295_v57 = vor.u32 %v13810_v44, %v10294_v43  ;;  %v12385_v63 = vor.u32 %v14332_v54, %v12384_v52  ;;  %v13838_v43 = vld [vmem:[#allocation6 + $0x960] sm:$0xf0] }
 0x155   :  { %2880 = vmatpush.bf16.msrb.mxu2 %v9987_v56  ;;  %v12161_v56 = vor.u32 %v14276_v42, %v12160_v39  ;;  %v10182_v39 = vld [vmem:[#allocation6 + $0x788] sm:$0xf] }
 0x156   :  { %2855 = vmatpush.bf16.msra.mxu3 %v9511_v61  ;;  %v10266_v61 = vld [vmem:[#allocation6 + $0x830] sm:$0xf]  ;;  %v10406_v42 = vld [vmem:[#allocation6 + $0x948] sm:$0xf]  ;;  %v10183_v54 = vor.u32 %v13782_v3, %v10182_v39  ;;  %v14437_v39 = vld [vmem:[#allocation6 + $0x1160] sm:$0xf0] }
 0x157   :  { %2868 = vmatpush.bf16.msrb.mxu0 %v9735_v6  ;;  %v14325_v6 = vld [vmem:[#allocation6 + $0xde0] sm:$0xf0]  ;;  %v12188_v3 = vld [vmem:[#allocation6 + $0xc78] sm:$0xf] }
 0x158   :  { %2843 = vmatpush.bf16.msra.mxu1 %v9259_v9  ;;  %v12104_v9 = vld [vmem:[#allocation6 + $0xbd0] sm:$0xf]  ;;  %v14933_v16 = vpop.f32.mrf.mxu1 }
 0x159   :  { %2881 = vmatpush.bf16.msrb.mxu2 %v9959_v8  ;;  %v10267_v8 = vor.u32 %v13803_v62, %v10266_v61  ;;  %v12105_v22 = vor.u32 %v14262_v12, %v12104_v9  ;;  %v10378_v62 = vld [vmem:[#allocation6 + $0x910] sm:$0xf]  ;;  %v14234_v9 = vld [vmem:[#allocation6 + $0xb08] sm:$0xf0] }
 0x15a   :  { %2856 = vmatpush.bf16.msra.mxu3 %v9483_v13  ;;  %v13796_v13 = vld [vmem:[#allocation6 + $0x810] sm:$0xf0] }
 0x15b   :  { %2869 = vmatpush.bf16.msrb.mxu0 %v9707_v26  ;;  %v14255_v26 = vld [vmem:[#allocation6 + $0xbb0] sm:$0xf0] }
 0x15c   :  { %2844 = vmatpush.bf16.msra.mxu1 %v9231_v31  ;;  %v12300_v31 = vld [vmem:[#allocation6 + $0xd58] sm:$0xf]  ;;  %v12077_v34 = vor.u32 %v14255_v26, %v12076_v24  ;;  %v14444_v24 = vld [vmem:[#allocation6 + $0x1198] sm:$0xf0]  ;;  %v14290_v26 = vld [vmem:[#allocation6 + $0xcc8] sm:$0xf0] }
 0x15d   :  { %2882 = vmatpush.bf16.msrb.mxu2 %v9931_v30  ;;  %v13845_v30 = vld [vmem:[#allocation6 + $0x998] sm:$0xf0]  ;;  %v12301_v40 = vor.u32 %v14311_v32, %v12300_v31  ;;  %v11964_v31 = vld [vmem:[#allocation6 + $0xab8] sm:$0xf]  ;;  %v14227_v32 = vld [vmem:[#allocation6 + $0xad0] sm:$0xf0] }
 0x15e   :  { %2857 = vmatpush.bf16.msra.mxu3 %v9455_v36  ;;  %v10435_v36 = vor.u32 %v13845_v30, %v10434_v29 }
 0x15f   :  { %2870 = vmatpush.bf16.msrb.mxu0 %v9679_v46  ;;  %2845 = vmatmul.bf16.vlgmr.msra.gmra.mxu1 %v14843_v4  ;;  %v12357_v4 = vor.u32 %v14325_v6, %v12356_v5  ;;  %v12272_v46 = vld [vmem:[#allocation6 + $0xd20] sm:$0xf] }
 0x160   :  { %2889 = vmatpush.bf16.msrb.mxu1 %v10323_v38  ;;  %v14248_v38 = vld [vmem:[#allocation6 + $0xb78] sm:$0xf0]  ;;  %v14936_v20 = vpop.f32.mrf.mxu3  ;;  %v2601_v44 = vpop.f32.mrf.mxu1  ;;  %v12273_v61 = vor.u32 %v14304_v47, %v12272_v46 }
 0x161   :  { %2883 = vmatpush.bf16.msrb.mxu2 %v9903_v50  ;;  %2858 = vmatmul.bf16.vlgmr.msra.gmra.mxu3 %v14846_v18  ;;  %v12329_v18 = vor.u32 %v14318_v21, %v12328_v17  ;;  %v512_v50 = vperm.slane %v14940_v48, 3  ;;  %v12049_v52 = vor.u32 %v14248_v38, %v12048_v35  ;;  %v14388_v17 = vld [vmem:[#allocation6 + $0xfd8] sm:$0xf0]  ;;  %v12580_v35 = vld [vmem:[#allocation6 + $0xf88] sm:$0xf]  ;;  %v6222_v44 = vunpack.c.l.b16 %v14905_v55 }
 0x162   :  { %2902 = vmatpush.bf16.msrb.mxu3 %v10547_v41  ;;  %2871 = vmatmul.bf16.vlgmr.msrb.gmra.mxu0 %v14840_v53  ;;  %v10239_v53 = vor.u32 %v13796_v13, %v10238_v49  ;;  %v14938_v41 = vpop.f32.mrf.mxu0  ;;  %v13768_v49 = vld [vmem:[#allocation6 + $0x730] sm:$0xf0]  ;;  %v10350_v13 = vld [vmem:[#allocation6 + $0x8d8] sm:$0xf]  ;;  %v12609_v30 = vor.u32 %v14388_v17, %v12608_v15  ;;  %v12804_v38 = vld [vmem:[#allocation6 + $0x1148] sm:$0xf] }
 0x163   :  { %2922 = vmatpush.bf16.msra.mxu0 %v10575_v51  ;;  %v14943_v51 = vpop.f32.mrf.mxu2  ;;  %v2574_v5 = vadd.f32 %v14928_v1, %v512_v50  ;;  %v12832_v1 = vld [vmem:[#allocation6 + $0x1180] sm:$0xf]  ;;  %v12805_v46 = vor.u32 %v14437_v39, %v12804_v38  ;;  %v12552_v50 = vld [vmem:[#allocation6 + $0xf50] sm:$0xf]  ;;  %v14549_v15 = vld [vmem:[#allocation6 + $0x14e0] sm:$0xf0] }
 0x164   :  { %2890 = vmatpush.bf16.msrb.mxu1 %v10295_v57  ;;  %2884 = vmatmul.bf16.vlgmr.msrb.gmra.mxu2 %v14848_v19  ;;  %v10211_v19 = vor.u32 %v13789_v28, %v10210_v27  ;;  %v10407_v57 = vor.u32 %v13838_v43, %v10406_v42  ;;  %v11965_v42 = vor.u32 %v14227_v32, %v11964_v31  ;;  %v12440_v32 = vld [vmem:[#allocation6 + $0xe70] sm:$0xf] }
 0x165   :  { %8010 = vmatpush.bf16.msra.mxu2 %v12161_v56  ;;  %v12020_v56 = vld [vmem:[#allocation6 + $0xb28] sm:$0xf]  ;;  %v2587_v27 = vadd.f32 %v14921_v11, %v2574_v5 }
 0x166   :  { %2903 = vmatpush.bf16.msrb.mxu3 %v10519_v23  ;;  %v10154_v23 = vld [vmem:[#allocation6 + $0x750] sm:$0xf]  ;;  %v12021_v6 = vor.u32 %v14241_v58, %v12020_v56 }
 0x167   :  { %8023 = vmatpush.bf16.msrb.mxu0 %v12385_v63  ;;  %v13831_v63 = vld [vmem:[#allocation6 + $0x928] sm:$0xf0]  ;;  %v2600_v11 = vadd.f32 %v14933_v16, %v2587_v27  ;;  %v12776_v56 = vld [vmem:[#allocation6 + $0x1110] sm:$0xf] }
 0x168   :  { %2891 = vmatpush.bf16.msrb.mxu1 %v10267_v8  ;;  %v11992_v8 = vld [vmem:[#allocation6 + $0xaf0] sm:$0xf]  ;;  %v10379_v12 = vor.u32 %v13831_v63, %v10378_v62  ;;  %v2614_v21 = vpop.f32.mrf.mxu3  ;;  %v14430_v16 = vld [vmem:[#allocation6 + $0x1128] sm:$0xf0]  ;;  %v12524_v62 = vld [vmem:[#allocation6 + $0xf18] sm:$0xf] }
 0x169   :  { %8011 = vmatpush.bf16.msra.mxu2 %v12133_v7  ;;  %v10155_v7 = vor.u32 %v13775_v59, %v10154_v23  ;;  %v2613_v58 = vadd.f32 %v14936_v20, %v2600_v11  ;;  %v14957_v23 = vpack.c.b16 %v6222_v44, %v6222_v44  ;;  %v14367_v63 = vld [vmem:[#allocation6 + $0xf30] sm:$0xf0]  ;;  %v12468_v21 = vld [vmem:[#allocation6 + $0xea8] sm:$0xf] }
 0x16a   :  { %2904 = vmatpush.bf16.msrb.mxu3 %v10491_v10  ;;  %v10126_v10 = vld [vmem:[#allocation6 + $0x718] sm:$0xf]  ;;  %v12525_v5 = vor.u32 %v14367_v63, %v12524_v62  ;;  %v14535_v11 = vld [vmem:[#allocation6 + $0x1470] sm:$0xf0]  ;;  %v12162_v62 = vld [vmem:[#allocation6 + $0xc5c] sm:$0xf0] }
 0x16b   :  { %8024 = vmatpush.bf16.msrb.mxu0 %v12357_v4  ;;  %v13824_v4 = vld [vmem:[#allocation6 + $0x8f0] sm:$0xf0]  ;;  %v10127_v28 = vor.u32 %v13768_v49, %v10126_v10  ;;  %v2626_v20 = vadd.f32 %v14943_v51, %v2613_v58  ;;  %v12720_v10 = vld [vmem:[#allocation6 + $0x10a0] sm:$0xf]  ;;  %v14273_v58 = vld [vmem:[#allocation6 + $0xc44] sm:$0xf] }
 0x16c   :  { %2892 = vmatpush.bf16.msrb.mxu1 %v10239_v53  ;;  %v14948_v53 = vpop.f32.mrf.mxu1  ;;  %v10351_v29 = vor.u32 %v13824_v4, %v10350_v13  ;;  %v13252_v4 = vld [vmem:[#allocation6 + $0x14c8] sm:$0xf] }
 0x16d   :  { %8012 = vmatpush.bf16.msra.mxu2 %v12105_v22  ;;  %v2640_v22 = vpop.f32.mrf.mxu0  ;;  %v2639_v13 = vadd.f32 %v14938_v41, %v2626_v20 }
 0x16e   :  { %2905 = vmatpush.bf16.msrb.mxu3 %v10463_v25  ;;  %v12216_v25 = vld [vmem:[#allocation6 + $0xcb0] sm:$0xf]  ;;  %v14353_v22 = vld [vmem:[#allocation6 + $0xec0] sm:$0xf0] }
 0x16f   :  { %8025 = vmatpush.bf16.msrb.mxu0 %v12329_v18  ;;  %v2627_v18 = vpop.f32.mrf.mxu2  ;;  %v2652_v17 = vadd.f32 %v14948_v53, %v2639_v13  ;;  %v12469_v41 = vor.u32 %v14353_v22, %v12468_v21  ;;  %v14346_v53 = vld [vmem:[#allocation6 + $0xe88] sm:$0xf0]  ;;  %v12134_v13 = vld [vmem:[#allocation6 + $0xc24] sm:$0xf0] }
 0x170   :  { %2893 = vmatpush.bf16.msrb.mxu1 %v10211_v19  ;;  %v12217_v19 = vor.u32 %v14290_v26, %v12216_v25  ;;  %v12692_v25 = vld [vmem:[#allocation6 + $0x1068] sm:$0xf]  ;;  %v14409_v26 = vld [vmem:[#allocation6 + $0x1080] sm:$0xf0] }
 0x171   :  { %8013 = vmatpush.bf16.msra.mxu2 %v12077_v34  ;;  %v12833_v34 = vor.u32 %v14444_v24, %v12832_v1  ;;  %v13253_v24 = vor.u32 %v14549_v15, %v13252_v4  ;;  %v12693_v31 = vor.u32 %v14409_v26, %v12692_v25  ;;  %v13140_v4 = vld [vmem:[#allocation6 + $0x13e8] sm:$0xf]  ;;  %v14259_v25 = vld [vmem:[#allocation6 + $0xbd4] sm:$0xf]  ;;  %v12106_v26 = vld [vmem:[#allocation6 + $0xbec] sm:$0xf0] }
 0x172   :  { %2906 = vmatpush.bf16.msrb.mxu3 %v10435_v36  ;;  %10582 = vmatmul.msk.bf16.vlgmr.msra.gmra.mxu0 %vm2287_vm0, %v14852_v45  ;;  %v11993_v45 = vor.u32 %v14234_v9, %v11992_v8  ;;  %v14381_v36 = vld [vmem:[#allocation6 + $0xfa0] sm:$0xf0]  ;;  %v12496_v8 = vld [vmem:[#allocation6 + $0xee0] sm:$0xf]  ;;  %v14360_v9 = vld [vmem:[#allocation6 + $0xef8] sm:$0xf0] }
 0x173   :  { %8026 = vmatpush.bf16.msrb.mxu0 %v12301_v40  ;;  %v14283_v40 = vld [vmem:[#allocation6 + $0xc90] sm:$0xf0]  ;;  %v12581_v43 = vor.u32 %v14381_v36, %v12580_v35  ;;  %v12497_v51 = vor.u32 %v14360_v9, %v12496_v8  ;;  %v12664_v35 = vld [vmem:[#allocation6 + $0x1030] sm:$0xf]  ;;  %v14402_v36 = vld [vmem:[#allocation6 + $0x1048] sm:$0xf0]  ;;  %v12165_v9 = vor.u32 %v14273_v58, %v12162_v62 }
 0x174   :  { %2894 = vmatpush.bf16.msrb.mxu1 %v10183_v54  ;;  %v12189_v47 = vor.u32 %v14283_v40, %v12188_v3  ;;  %v6223_v54 = vunpack.c.h.b16 %v14905_v55  ;;  %v12748_v55 = vld [vmem:[#allocation6 + $0x10d8] sm:$0xf]  ;;  %v2930_v3 = vmax.f32 %v14926_v60, 0.0  ;;  %v14493_v8 = vld [vmem:[#allocation6 + $0x1320] sm:$0xf0] }
 0x175   :  { %8014 = vmatpush.bf16.msra.mxu2 %v12049_v52  ;;  %v14374_v52 = vld [vmem:[#allocation6 + $0xf68] sm:$0xf0]  ;;  %v13196_v40 = vld [vmem:[#allocation6 + $0x1458] sm:$0xf]  ;;  %v12022_v62 = vld [vmem:[#allocation6 + $0xb44] sm:$0xf0] }
 0x176   :  { %2907 = vmatpush.bf16.msrb.mxu3 %v10407_v57  ;;  %v2653_v57 = vpop.f32.mrf.mxu1  ;;  %v12553_v59 = vor.u32 %v14374_v52, %v12552_v50  ;;  %v12665_v50 = vor.u32 %v14402_v36, %v12664_v35  ;;  %v14339_v52 = vld [vmem:[#allocation6 + $0xe50] sm:$0xf0]  ;;  %v14441_v36 = vld [vmem:[#allocation6 + $0x1184] sm:$0xf] }
 0x177   :  { %8027 = vmatpush.bf16.msrb.mxu0 %v12273_v61  ;;  %v12777_v61 = vor.u32 %v14430_v16, %v12776_v56  ;;  %v14500_v56 = vld [vmem:[#allocation6 + $0x1358] sm:$0xf0]  ;;  %v12636_v16 = vld [vmem:[#allocation6 + $0xff8] sm:$0xf]  ;;  %v14395_v57 = vld [vmem:[#allocation6 + $0x1010] sm:$0xf0] }
 0x178   :  { %2895 = vmatpush.bf16.msrb.mxu1 %v10155_v7  ;;  %v12749_v7 = vor.u32 %v14423_v0, %v12748_v55  ;;  %v13168_v55 = vld [vmem:[#allocation6 + $0x1420] sm:$0xf]  ;;  %v14528_v0 = vld [vmem:[#allocation6 + $0x1438] sm:$0xf0] }
 0x179   :  { %8015 = vmatpush.bf16.msra.mxu2 %v12021_v6 }
 0x17a   :  { %2908 = vmatpush.bf16.msrb.mxu3 %v10379_v12  ;;  %v14416_v12 = vld [vmem:[#allocation6 + $0x10b8] sm:$0xf0] }
 0x17b   :  { %8028 = vmatpush.bf16.msrb.mxu0 %v12245_v14  ;;  %v513_v14 = vperm.slane %v14940_v48, 4  ;;  %v12721_v1 = vor.u32 %v14416_v12, %v12720_v10  ;;  %v14266_v12 = vld [vmem:[#allocation6 + $0xc0c] sm:$0xf] }
 0x17c   :  { %2896 = vmatpush.bf16.msrb.mxu1 %v10127_v28  ;;  %v13224_v28 = vld [vmem:[#allocation6 + $0x1490] sm:$0xf]  ;;  %v12137_v22 = vor.u32 %v14266_v12, %v12134_v13  ;;  %v12860_v12 = vld [vmem:[#allocation6 + $0x11b8] sm:$0xf] }
 0x17d   :  { %8016 = vmatpush.bf16.msra.mxu2 %v11993_v45 }
 0x17e   :  { %2909 = vmatpush.bf16.msrb.mxu3 %v10351_v29  ;;  %v2677_v49 = vpop.f32.mrf.mxu1  ;;  %v14542_v29 = vld [vmem:[#allocation6 + $0x14a8] sm:$0xf0] }
 0x17f   :  { %8029 = vmatpush.bf16.msrb.mxu0 %v12217_v19  ;;  %2897 = vmatmul.bf16.vlgmr.msrb.gmra.mxu1 %v14856_v33  ;;  %v14960_v33 = vpack.c.b16 %v6223_v54, %v6223_v54  ;;  %v2703_v27 = vpop.f32.mrf.mxu0  ;;  %v13225_v19 = vor.u32 %v14542_v29, %v13224_v28  ;;  %v13056_v54 = vld [vmem:[#allocation6 + $0x1340] sm:$0xf]  ;;  %v14479_v29 = vld [vmem:[#allocation6 + $0x12b0] sm:$0xf0] }
 0x180   :  { %8036 = vmatpush.bf16.msra.mxu1 %v12609_v30  ;;  %v2664_v45 = vpop.f32.mrf.mxu3  ;;  %v2931_v30 = vmax.f32 %v2652_v17, 0.0  ;;  %v13000_v17 = vld [vmem:[#allocation6 + $0x12d0] sm:$0xf] }
 0x181   :  { %2910 = vmatmul.bf16.vlgmr.msrb.gmra.mxu3 %v14858_v37  ;;  %8017 = vmatpush.bf16.msra.mxu2 %v11965_v42  ;;  %v14556_v37 = vld [vmem:[#allocation6 + $0x1518] sm:$0xf0]  ;;  %v2665_v18 = vadd.f32 %v2664_v45, %v513_v14  ;;  %v12441_v42 = vor.u32 %v14346_v53, %v12440_v32  ;;  %v14514_v45 = vld [vmem:[#allocation6 + $0x13c8] sm:$0xf0]  ;;  %v12078_v53 = vld [vmem:[#allocation6 + $0xbb4] sm:$0xf0] }
 0x182   :  { %8049 = vmatpush.bf16.msra.mxu3 %v12833_v34  ;;  %v13281_v6 = vor.u32 %v14556_v37, %v13280_v2  ;;  %v13169_v2 = vor.u32 %v14528_v0, %v13168_v55  ;;  %v12637_v37 = vor.u32 %v14395_v57, %v12636_v16  ;;  %v14427_v55 = vld [vmem:[#allocation6 + $0x1114] sm:$0xf]  ;;  %v12778_v0 = vld [vmem:[#allocation6 + $0x112c] sm:$0xf0] }
 0x183   :  { %8030 = vmatpush.bf16.msrb.mxu0 %v12189_v47  ;;  %v2690_v34 = vpop.f32.mrf.mxu2  ;;  %v2678_v38 = vadd.f32 %v2677_v49, %v2665_v18  ;;  %v2936_v47 = vpack.c.bf16 %v2931_v30, %v2930_v3  ;;  %v12972_v18 = vld [vmem:[#allocation6 + $0x1298] sm:$0xf]  ;;  %v12109_v30 = vor.u32 %v14259_v25, %v12106_v26  ;;  %v14472_v3 = vld [vmem:[#allocation6 + $0x1278] sm:$0xf0] }
 0x184   :  { %8037 = vmatpush.bf16.msra.mxu1 %v12581_v43  ;;  %8018 = vmatmul.bf16.vlgmr.msra.gmra.mxu2 %v14957_v23  ;;  %v12412_v43 = vld [vmem:[#allocation6 + $0xe38] sm:$0xf]  ;;  %v12973_v32 = vor.u32 %v14479_v29, %v12972_v18  ;;  %v14413_v29 = vld [vmem:[#allocation6 + $0x10a4] sm:$0xf] }
 0x185   :  { %v2691_v44 = vadd.f32 %v2690_v34, %v2678_v38  ;;  %v12413_v20 = vor.u32 %v14339_v52, %v12412_v43  ;;  %v6225_v10 = vunpack.c.h.b16 %v2936_v47  ;;  %v13084_v34 = vld [vmem:[#allocation6 + $0x1378] sm:$0xf]  ;;  %v12834_v38 = vld [vmem:[#allocation6 + $0x119c] sm:$0xf0]  ;;  %v14245_v43 = vld [vmem:[#allocation6 + $0xb64] sm:$0xf] }
 0x186   :  { %8050 = vmatpush.bf16.msra.mxu3 %v12805_v46  ;;  %8031 = vmatmul.bf16.vlgmr.msrb.gmra.mxu0 %v14960_v33  ;;  %v2679_v39 = vpop.f32.mrf.mxu1  ;;  %v13197_v46 = vor.u32 %v14535_v11, %v13196_v40  ;;  %v12837_v11 = vor.u32 %v14441_v36, %v12834_v38  ;;  %v12916_v52 = vld [vmem:[#allocation6 + $0x1228] sm:$0xf]  ;;  %v11966_v25 = vld [vmem:[#allocation6 + $0xad4] sm:$0xf0] }
 0x187   :  { %8075 = vmatpush.bf16.msra.mxu0 %v13281_v6  ;;  %v2705_v60 = vpop.f32.mrf.mxu0  ;;  %v14972_v21 = vpack.c.b16 %v6225_v10, %v6225_v10  ;;  %v12944_v39 = vld [vmem:[#allocation6 + $0x1260] sm:$0xf]  ;;  %v12750_v10 = vld [vmem:[#allocation6 + $0x10f4] sm:$0xf0]  ;;  %v13030_v38 = vld [vmem:[#allocation6 + $0x1324] sm:$0xf0] }
 0x188   :  { %8038 = vmatpush.bf16.msra.mxu1 %v12553_v59  ;;  %v14968_v59 = vadd.f32 %v2703_v27, %v2691_v44  ;;  %v2666_v63 = vpop.f32.mrf.mxu3  ;;  %v13112_v27 = vld [vmem:[#allocation6 + $0x13b0] sm:$0xf]  ;;  %v12050_v44 = vld [vmem:[#allocation6 + $0xb7c] sm:$0xf0] }
 0x18a   :  { %8051 = vmatpush.bf16.msra.mxu3 %v12777_v61  ;;  %v13057_v61 = vor.u32 %v14500_v56, %v13056_v54  ;;  %v14465_v54 = vld [vmem:[#allocation6 + $0x1240] sm:$0xf0]  ;;  %v12053_v56 = vor.u32 %v14245_v43, %v12050_v44  ;;  %v12554_v43 = vld [vmem:[#allocation6 + $0xf6c] sm:$0xf0] }
 0x18b   :  { %8076 = vmatpush.bf16.msra.mxu0 %v13253_v24  ;;  %v2692_v6 = vpop.f32.mrf.mxu2  ;;  %v12917_v57 = vor.u32 %v14465_v54, %v12916_v52  ;;  %v14399_v52 = vld [vmem:[#allocation6 + $0x1034] sm:$0xf]  ;;  %v12666_v54 = vld [vmem:[#allocation6 + $0x104c] sm:$0xf0] }
 0x18c   :  { %8039 = vmatpush.bf16.msra.mxu1 %v12525_v5  ;;  %8062 = vmatpush.bf16.msrb.mxu2 %v13057_v61  ;;  %v6224_v5 = vunpack.c.l.b16 %v2936_v47  ;;  %v14238_v61 = vld [vmem:[#allocation6 + $0xb2c] sm:$0xf] }
 0x18e   :  { %8052 = vmatpush.bf16.msra.mxu3 %v12749_v7  ;;  %v13028_v7 = vld [vmem:[#allocation6 + $0x1308] sm:$0xf]  ;;  %v14970_v15 = vpack.c.b16 %v6224_v5, %v6224_v5  ;;  %v12781_v5 = vor.u32 %v14427_v55, %v12778_v0  ;;  %v14476_v55 = vld [vmem:[#allocation6 + $0x129c] sm:$0xf] }
 0x18f   :  { %8077 = vmatpush.bf16.msra.mxu0 %v13225_v19  ;;  %v13029_v49 = vor.u32 %v14493_v8, %v13028_v7  ;;  %v14507_v19 = vld [vmem:[#allocation6 + $0x1390] sm:$0xf0]  ;;  %v11994_v8 = vld [vmem:[#allocation6 + $0xb0c] sm:$0xf0] }
 0x190   :  { %8040 = vmatpush.bf16.msra.mxu1 %v12497_v51  ;;  %v14521_v51 = vld [vmem:[#allocation6 + $0x1400] sm:$0xf0]  ;;  %v13085_v35 = vor.u32 %v14507_v19, %v13084_v34  ;;  %v14231_v7 = vld [vmem:[#allocation6 + $0xaf4] sm:$0xf]  ;;  %v12582_v34 = vld [vmem:[#allocation6 + $0xfa4] sm:$0xf0] }
 0x191   :  { %8063 = vmatpush.bf16.msrb.mxu2 %v13029_v49  ;;  %v13141_v14 = vor.u32 %v14521_v51, %v13140_v4  ;;  %v14451_v49 = vld [vmem:[#allocation6 + $0x11d0] sm:$0xf0]  ;;  %v11997_v13 = vor.u32 %v14231_v7, %v11994_v8  ;;  %v14357_v8 = vld [vmem:[#allocation6 + $0xee4] sm:$0xf] }
 0x192   :  { %8053 = vmatpush.bf16.msra.mxu3 %v12721_v1  ;;  %v14486_v1 = vld [vmem:[#allocation6 + $0x12e8] sm:$0xf0] }
 0x193   :  { %8078 = vmatpush.bf16.msra.mxu0 %v13197_v46  ;;  %v13001_v24 = vor.u32 %v14486_v1, %v13000_v17  ;;  %v14976_v28 = vpop.f32.mrf.mxu2  ;;  %v14434_v46 = vld [vmem:[#allocation6 + $0x114c] sm:$0xf]  ;;  %v14385_v17 = vld [vmem:[#allocation6 + $0xfc4] sm:$0xf]  ;;  %v12610_v1 = vld [vmem:[#allocation6 + $0xfdc] sm:$0xf0] }
 0x194   :  { %8041 = vmatpush.bf16.msra.mxu1 %v12469_v41  ;;  %v13113_v41 = vor.u32 %v14514_v45, %v13112_v27  ;;  %v12613_v27 = vor.u32 %v14385_v17, %v12610_v1  ;;  %v14497_v45 = vld [vmem:[#allocation6 + $0x1344] sm:$0xf]  ;;  %v12470_v17 = vld [vmem:[#allocation6 + $0xec4] sm:$0xf0] }
 0x195   :  { %8064 = vmatpush.bf16.msrb.mxu2 %v13001_v24  ;;  %v14224_v24 = vld [vmem:[#allocation6 + $0xabc] sm:$0xf] }
 0x196   :  { %8054 = vmatpush.bf16.msra.mxu3 %v12693_v31  ;;  %v14252_v31 = vld [vmem:[#allocation6 + $0xb9c] sm:$0xf] }
 0x197   :  { %8079 = vmatpush.bf16.msra.mxu0 %v13169_v2  ;;  %v12081_v40 = vor.u32 %v14252_v31, %v12078_v53  ;;  %v14458_v2 = vld [vmem:[#allocation6 + $0x1208] sm:$0xf0]  ;;  %v11969_v31 = vor.u32 %v14224_v24, %v11966_v25  ;;  %v12918_v25 = vld [vmem:[#allocation6 + $0x1244] sm:$0xf0] }
 0x198   :  { %8042 = vmatpush.bf16.msra.mxu1 %v12441_v42  ;;  %v12945_v42 = vor.u32 %v14472_v3, %v12944_v39  ;;  %v14378_v53 = vld [vmem:[#allocation6 + $0xf8c] sm:$0xf]  ;;  %v12694_v3 = vld [vmem:[#allocation6 + $0x1084] sm:$0xf0] }
 0x199   :  { %8065 = vmatpush.bf16.msrb.mxu2 %v12973_v32  ;;  %v12585_v36 = vor.u32 %v14378_v53, %v12582_v34  ;;  %v14406_v39 = vld [vmem:[#allocation6 + $0x106c] sm:$0xf] }
 0x19a   :  { %8055 = vmatpush.bf16.msra.mxu3 %v12665_v50  ;;  %v12806_v50 = vld [vmem:[#allocation6 + $0x1164] sm:$0xf0]  ;;  %v14462_v24 = vld [vmem:[#allocation6 + $0x122c] sm:$0xf] }
 0x19b   :  { %8080 = vmatpush.bf16.msra.mxu0 %v13141_v14  ;;  %v2744_v47 = vpop.f32.mrf.mxu2  ;;  %v12809_v16 = vor.u32 %v14434_v46, %v12806_v50  ;;  %v12861_v14 = vor.u32 %v14451_v49, %v12860_v12  ;;  %v14483_v46 = vld [vmem:[#allocation6 + $0x12d4] sm:$0xf]  ;;  %v13002_v50 = vld [vmem:[#allocation6 + $0x12ec] sm:$0xf0]  ;;  %v12946_v12 = vld [vmem:[#allocation6 + $0x127c] sm:$0xf0] }
 0x19c   :  { %8043 = vmatpush.bf16.msra.mxu1 %v12413_v20  ;;  %v14980_v60 = vpop.f32.mrf.mxu1  ;;  %v12888_v20 = vld [vmem:[#allocation6 + $0x11f0] sm:$0xf] }
 0x19d   :  { %8066 = vmatpush.bf16.msrb.mxu2 %v12945_v42  ;;  %v12889_v6 = vor.u32 %v14458_v2, %v12888_v20  ;;  %v14371_v42 = vld [vmem:[#allocation6 + $0xf54] sm:$0xf]  ;;  %v12974_v20 = vld [vmem:[#allocation6 + $0x12b4] sm:$0xf0]  ;;  %v14392_v2 = vld [vmem:[#allocation6 + $0xffc] sm:$0xf] }
 0x19e   :  { %8056 = vmatpush.bf16.msra.mxu3 %v12637_v37  ;;  %v12025_v37 = vor.u32 %v14238_v61, %v12022_v62  ;;  %v12557_v47 = vor.u32 %v14371_v42, %v12554_v43  ;;  %v514_v61 = vperm.slane %v14940_v48, 5  ;;  %v13005_v62 = vor.u32 %v14483_v46, %v13002_v50  ;;  %v14389_v42 = vld [vmem:[#allocation6 + $0xfe0] sm:$0xf0]  ;;  %v14382_v50 = vld [vmem:[#allocation6 + $0xfa8] sm:$0xf0] }
 0x19f   :  { %8044 = vmatmul.bf16.vlgmr.msra.gmra.mxu1 %v14970_v15  ;;  %8081 = vmatpush.bf16.msra.mxu0 %v13113_v41  ;;  %v14982_v63 = vpop.f32.mrf.mxu0  ;;  %v13058_v41 = vld [vmem:[#allocation6 + $0x135c] sm:$0xf0]  ;;  %v12977_v7 = vor.u32 %v14476_v55, %v12974_v20  ;;  %v12560_v20 = vld [vmem:[#allocation6 + $0xf58] sm:$0xf] }
 0x1a0   :  { %v14978_v58 = vpop.f32.mrf.mxu3  ;;  %v13061_v19 = vor.u32 %v14497_v45, %v13058_v41  ;;  %v12921_v45 = vor.u32 %v14462_v24, %v12918_v25  ;;  %v14343_v41 = vld [vmem:[#allocation6 + $0xe74] sm:$0xf]  ;;  %v12504_v25 = vld [vmem:[#allocation6 + $0xee8] sm:$0xf] }
 0x1a1   :  { %8057 = vmatmul.bf16.vlgmr.msra.gmra.mxu3 %v14972_v21  ;;  %8067 = vmatpush.bf16.msrb.mxu2 %v12917_v57  ;;  %v12526_v57 = vld [vmem:[#allocation6 + $0xf34] sm:$0xf0] }
 0x1a2   :  { %8101 = vmatpush.bf16.msrb.mxu3 %v12165_v9  ;;  %v14420_v9 = vld [vmem:[#allocation6 + $0x10dc] sm:$0xf] }
 0x1a3   :  { %8082 = vmatpush.bf16.msra.mxu0 %v13085_v35  ;;  %v12753_v51 = vor.u32 %v14420_v9, %v12750_v10  ;;  %v14490_v35 = vld [vmem:[#allocation6 + $0x130c] sm:$0xf]  ;;  %v12498_v9 = vld [vmem:[#allocation6 + $0xefc] sm:$0xf0]  ;;  %v14469_v10 = vld [vmem:[#allocation6 + $0x1264] sm:$0xf] }
 0x1a4   :  { %v2731_v26 = vpop.f32.mrf.mxu1  ;;  %v13033_v44 = vor.u32 %v14490_v35, %v13030_v38  ;;  %v12501_v49 = vor.u32 %v14357_v8, %v12498_v9  ;;  %v12414_v35 = vld [vmem:[#allocation6 + $0xe54] sm:$0xf0]  ;;  %v14448_v38 = vld [vmem:[#allocation6 + $0x11bc] sm:$0xf]  ;;  %v12386_v8 = vld [vmem:[#allocation6 + $0xe1c] sm:$0xf0] }
 0x1a5   :  { %8068 = vmatpush.bf16.msrb.mxu2 %v12889_v6  ;;  %v2756_v6 = vadd.f32 %v14982_v63, %v514_v61  ;;  %v14368_v9 = vld [vmem:[#allocation6 + $0xf38] sm:$0xf0] }
 0x1a6   :  { %8102 = vmatpush.bf16.msrb.mxu3 %v12137_v22 }
 0x1a7   :  { %8140 = vmatpush.bf16.msrb.mxu0 %v12837_v11  ;;  %v14984_v4 = vpop.f32.mrf.mxu2  ;;  %v2757_v18 = vpop.f32.mrf.mxu0 }
 0x1a8   :  { %v2718_v22 = vpop.f32.mrf.mxu3  ;;  %v12442_v18 = vld [vmem:[#allocation6 + $0xe8c] sm:$0xf0] }
 0x1a9   :  { %8069 = vmatpush.bf16.msrb.mxu2 %v12861_v14  ;;  %v14350_v14 = vld [vmem:[#allocation6 + $0xeac] sm:$0xf] }
 0x1aa   :  { %8103 = vmatpush.bf16.msrb.mxu3 %v12109_v30  ;;  %v12722_v30 = vld [vmem:[#allocation6 + $0x10bc] sm:$0xf0]  ;;  %v12473_v63 = vor.u32 %v14350_v14, %v12470_v17 }
 0x1ab   :  { %8141 = vmatpush.bf16.msrb.mxu0 %v12809_v16  ;;  %v12725_v32 = vor.u32 %v14413_v29, %v12722_v30  ;;  %v14364_v16 = vld [vmem:[#allocation6 + $0xf1c] sm:$0xf]  ;;  %v14455_v29 = vld [vmem:[#allocation6 + $0x11f4] sm:$0xf]  ;;  %v12890_v30 = vld [vmem:[#allocation6 + $0x120c] sm:$0xf0] }
 0x1ac   :  { %v12529_v0 = vor.u32 %v14364_v16, %v12526_v57  ;;  %v12893_v34 = vor.u32 %v14455_v29, %v12890_v30  ;;  %v13308_v16 = vld [vmem:[#allocation6 + $0x1538] sm:$0xf]  ;;  %v14563_v57 = vld [vmem:[#allocation6 + $0x1550] sm:$0xf0]  ;;  %v14270_v29 = vld [vmem:[#allocation6 + $0xc28] sm:$0xf0] }
 0x1ad   :  { %8127 = vmatpush.bf16.msra.mxu2 %v12613_v27  ;;  %v13309_v55 = vor.u32 %v14563_v57, %v13308_v16 }
 0x1ae   :  { %8104 = vmatpush.bf16.msrb.mxu3 %v12081_v40  ;;  %v12697_v40 = vor.u32 %v14406_v39, %v12694_v3  ;;  %v12862_v39 = vld [vmem:[#allocation6 + $0x11d4] sm:$0xf0] }
 0x1af   :  { %8142 = vmatpush.bf16.msrb.mxu0 %v12781_v5  ;;  %v2770_v11 = vpop.f32.mrf.mxu2  ;;  %8095 = vmatpush.bf16.msrb.mxu1 %v13309_v55  ;;  %v12274_v55 = vld [vmem:[#allocation6 + $0xd3c] sm:$0xf0] }
 0x1b0   :  { %v12616_v11 = vld [vmem:[#allocation6 + $0xfc8] sm:$0xf] }
 0x1b1   :  { %8128 = vmatpush.bf16.msra.mxu2 %v12585_v36 }
 0x1b2   :  { %8105 = vmatpush.bf16.msrb.mxu3 %v12053_v56  ;;  %v12669_v56 = vor.u32 %v14399_v52, %v12666_v54 }
 0x1b3   :  { %8143 = vmatpush.bf16.msrb.mxu0 %v12753_v51  ;;  %v12949_v51 = vor.u32 %v14469_v10, %v12946_v12  ;;  %v12168_v10 = vld [vmem:[#allocation6 + $0xc48] sm:$0xf]  ;;  %v14277_v12 = vld [vmem:[#allocation6 + $0xc60] sm:$0xf0] }
 0x1b4   :  { %v12169_v24 = vor.u32 %v14277_v12, %v12168_v10  ;;  %v12028_v10 = vld [vmem:[#allocation6 + $0xb30] sm:$0xf]  ;;  %v14294_v12 = vld [vmem:[#allocation6 + $0xcec] sm:$0xf] }
 0x1b5   :  { %8129 = vmatpush.bf16.msra.mxu2 %v12557_v47  ;;  %v12865_v47 = vor.u32 %v14448_v38, %v12862_v39  ;;  %v14354_v38 = vld [vmem:[#allocation6 + $0xec8] sm:$0xf0]  ;;  %v12112_v39 = vld [vmem:[#allocation6 + $0xbd8] sm:$0xf] }
 0x1b6   :  { %8106 = vmatpush.bf16.msrb.mxu3 %v12025_v37  ;;  %v12638_v37 = vld [vmem:[#allocation6 + $0x1014] sm:$0xf0] }
 0x1b7   :  { %8144 = vmatpush.bf16.msrb.mxu0 %v12725_v32  ;;  %v12641_v5 = vor.u32 %v14392_v2, %v12638_v37  ;;  %v2717_v32 = vadd.f32 %v14978_v58, %v14968_v59  ;;  %v12617_v59 = vor.u32 %v14389_v42, %v12616_v11  ;;  %v12588_v58 = vld [vmem:[#allocation6 + $0xf90] sm:$0xf] }
 0x1b9   :  { %8130 = vmatpush.bf16.msra.mxu2 %v12529_v0 }
 0x1ba   :  { %8107 = vmatpush.bf16.msrb.mxu3 %v11997_v13  ;;  %v2769_v13 = vadd.f32 %v14984_v4, %v2756_v6  ;;  %v12532_v6 = vld [vmem:[#allocation6 + $0xf20] sm:$0xf] }
 0x1bb   :  { %8145 = vmatpush.bf16.msrb.mxu0 %v12697_v40 }
 0x1bc   :  { %v2794_v22 = vpop.f32.mrf.mxu1 }
 0x1bd   :  { %8131 = vmatpush.bf16.msra.mxu2 %v12501_v49 }
 0x1be   :  { %8108 = vmatpush.bf16.msrb.mxu3 %v11969_v31  ;;  %v12445_v31 = vor.u32 %v14343_v41, %v12442_v18  ;;  %v14361_v41 = vld [vmem:[#allocation6 + $0xf00] sm:$0xf0]  ;;  %v12140_v18 = vld [vmem:[#allocation6 + $0xc10] sm:$0xf] }
 0x1bf   :  { %8146 = vmatpush.bf16.msrb.mxu0 %v12669_v56  ;;  %v2807_v26 = vpop.f32.mrf.mxu0 }
 0x1c0   :  { %v2781_v1 = vpop.f32.mrf.mxu3 }
 0x1c1   :  { %8109 = vmatmul.bf16.vlgmr.msrb.gmra.mxu3 %v14957_v23  ;;  %8132 = vmatpush.bf16.msra.mxu2 %v12473_v63  ;;  %v2782_v27 = vadd.f32 %v2781_v1, %v2769_v13  ;;  %v14560_v13 = vld [vmem:[#allocation6 + $0x153c] sm:$0xf]  ;;  %v14322_v63 = vld [vmem:[#allocation6 + $0xdcc] sm:$0xf] }
 0x1c2   :  { %8153 = vmatpush.bf16.msra.mxu3 %v13061_v19  ;;  %v14336_v19 = vld [vmem:[#allocation6 + $0xe3c] sm:$0xf] }
 0x1c3   :  { %8147 = vmatpush.bf16.msrb.mxu0 %v12641_v5  ;;  %v2795_v53 = vadd.f32 %v2794_v22, %v2782_v27  ;;  %v12417_v40 = vor.u32 %v14336_v19, %v12414_v35  ;;  %v12533_v22 = vor.u32 %v14368_v9, %v12532_v6  ;;  %v14315_v19 = vld [vmem:[#allocation6 + $0xd94] sm:$0xf]  ;;  %v12330_v35 = vld [vmem:[#allocation6 + $0xdac] sm:$0xf0]  ;;  %v12392_v6 = vld [vmem:[#allocation6 + $0xe08] sm:$0xf] }
 0x1c4   :  { %v2796_v3 = vpop.f32.mrf.mxu1 }
 0x1c5   :  { %8133 = vmatpush.bf16.msra.mxu2 %v12445_v31  ;;  %v2808_v46 = vadd.f32 %v2807_v26, %v2795_v53  ;;  %v12358_v26 = vld [vmem:[#allocation6 + $0xde4] sm:$0xf0]  ;;  %v12141_v53 = vor.u32 %v14270_v29, %v12140_v18  ;;  %v14263_v3 = vld [vmem:[#allocation6 + $0xbf0] sm:$0xf0] }
 0x1c6   :  { %8154 = vmatpush.bf16.msra.mxu3 %v13033_v44  ;;  %v2730_v44 = vadd.f32 %v14980_v60, %v2717_v32  ;;  %v14375_v60 = vld [vmem:[#allocation6 + $0xf70] sm:$0xf0]  ;;  %v12505_v32 = vor.u32 %v14361_v41, %v12504_v25  ;;  %v12113_v42 = vor.u32 %v14263_v3, %v12112_v39  ;;  %v12218_v41 = vld [vmem:[#allocation6 + $0xccc] sm:$0xf0] }
 0x1c7   :  { %v2820_v4 = vpop.f32.mrf.mxu2  ;;  %v2809_v43 = vpop.f32.mrf.mxu0  ;;  %v12561_v5 = vor.u32 %v14375_v60, %v12560_v20  ;;  %v12056_v60 = vld [vmem:[#allocation6 + $0xb68] sm:$0xf]  ;;  %v14319_v39 = vld [vmem:[#allocation6 + $0xdb0] sm:$0xf0] }
 0x1c8   :  { %v2783_v36 = vpop.f32.mrf.mxu3  ;;  %v2743_v54 = vadd.f32 %v14976_v28, %v2730_v44  ;;  %v2821_v56 = vadd.f32 %v2820_v4, %v2808_v46  ;;  %v12361_v4 = vor.u32 %v14322_v63, %v12358_v26  ;;  %v12448_v43 = vld [vmem:[#allocation6 + $0xe78] sm:$0xf]  ;;  %v14308_v44 = vld [vmem:[#allocation6 + $0xd5c] sm:$0xf]  ;;  %v515_v63 = vperm.slane %v14940_v48, 6 }
 0x1c9   :  { %8134 = vmatpush.bf16.msra.mxu2 %v12417_v40  ;;  %v12333_v40 = vor.u32 %v14315_v19, %v12330_v35  ;;  %v12302_v46 = vld [vmem:[#allocation6 + $0xd74] sm:$0xf0]  ;;  %v14287_v26 = vld [vmem:[#allocation6 + $0xcb4] sm:$0xf]  ;;  %v12366_v48 = vld [vmem:[#allocation6 + $0xdec] sm:$0xf0] }
 0x1ca   :  { %8155 = vmatpush.bf16.msra.mxu3 %v13005_v62  ;;  %v12589_v62 = vor.u32 %v14382_v50, %v12588_v58  ;;  %v2932_v2 = vmax.f32 %v2743_v54, 0.0  ;;  %v14256_v58 = vld [vmem:[#allocation6 + $0xbb8] sm:$0xf0]  ;;  %v12420_v54 = vld [vmem:[#allocation6 + $0xe40] sm:$0xf]  ;;  %v12221_v3 = vor.u32 %v14287_v26, %v12218_v41 }
 0x1cb   :  { %v14323_v19 = vld [vmem:[#allocation6 + $0xdd4] sm:$0xf] }
 0x1cc   :  { %v14235_v35 = vld [vmem:[#allocation6 + $0xb10] sm:$0xf0] }
 0x1ce   :  { %8156 = vmatpush.bf16.msra.mxu3 %v12977_v7  ;;  %v14329_v7 = vld [vmem:[#allocation6 + $0xe04] sm:$0xf] }
 0x1cf   :  { %v2822_v52 = vpop.f32.mrf.mxu2  ;;  %v12389_v49 = vor.u32 %v14329_v7, %v12386_v8  ;;  %v14333_v7 = vld [vmem:[#allocation6 + $0xe20] sm:$0xf0] }
 0x1d0   :  { %v2833_v61 = vpop.f32.mrf.mxu3  ;;  %v12305_v52 = vor.u32 %v14308_v44, %v12302_v46  ;;  %v11972_v46 = vld [vmem:[#allocation6 + $0xac0] sm:$0xf] }
 0x1d1   :  { %v2834_v0 = vadd.f32 %v2833_v61, %v2821_v56  ;;  %8114 = vmatpush.bf16.msra.mxu1 %v12389_v49  ;;  %v14340_v61 = vld [vmem:[#allocation6 + $0xe58] sm:$0xf0]  ;;  %v12246_v49 = vld [vmem:[#allocation6 + $0xd04] sm:$0xf0] }
 0x1d2   :  { %8157 = vmatpush.bf16.msra.mxu3 %v12949_v51  ;;  %v13310_v51 = vld [vmem:[#allocation6 + $0x1554] sm:$0xf0]  ;;  %v12249_v25 = vor.u32 %v14294_v12, %v12246_v49 }
 0x1d3   :  { %v2933_v37 = vmax.f32 %v2834_v0, 0.0  ;;  %v13313_v30 = vor.u32 %v14560_v13, %v13310_v51  ;;  %v12393_v51 = vor.u32 %v14333_v7, %v12392_v6  ;;  %v13036_v6 = vld [vmem:[#allocation6 + $0x1310] sm:$0xf]  ;;  %v14494_v7 = vld [vmem:[#allocation6 + $0x1328] sm:$0xf0] }
 0x1d4   :  { %v13008_v12 = vld [vmem:[#allocation6 + $0x12d8] sm:$0xf] }
 0x1d5   :  { %v2937_v28 = vpack.c.bf16 %v2933_v37, %v2932_v2  ;;  %8115 = vmatpush.bf16.msra.mxu1 %v12361_v4  ;;  %v14249_v2 = vld [vmem:[#allocation6 + $0xb80] sm:$0xf0]  ;;  %v13316_v37 = vld [vmem:[#allocation6 + $0x1540] sm:$0xf]  ;;  %v12000_v4 = vld [vmem:[#allocation6 + $0xaf8] sm:$0xf] }
 0x1d6   :  { %8158 = vmatpush.bf16.msra.mxu3 %v12921_v45  ;;  %v12057_v9 = vor.u32 %v14249_v2, %v12056_v60  ;;  %v12001_v44 = vor.u32 %v14235_v35, %v12000_v4  ;;  %v6202_v49 = vld [vmem:[#allocation8 + $0x7] sm:$0x7f]  ;;  %v12254_v4 = vld [vmem:[#allocation6 + $0xd0c] sm:$0xf0] }
 0x1d7   :  { %v6226_v14 = vunpack.c.l.b16 %v2937_v28  ;;  %v6227_v17 = vunpack.c.h.b16 %v2937_v28  ;;  %v12421_v28 = vor.u32 %v14340_v61, %v12420_v54  ;;  %v14501_v54 = vld [vmem:[#allocation6 + $0x1360] sm:$0xf0]  ;;  %v14291_v35 = vld [vmem:[#allocation6 + $0xcd0] sm:$0xf0] }
 0x1d8   :  { %v2835_v1 = vpop.f32.mrf.mxu3 }
 0x1d9   :  { %v14994_v27 = vpack.c.b16 %v6226_v14, %v6226_v14  ;;  %v14996_v45 = vpack.c.b16 %v6227_v17, %v6227_v17  ;;  %8116 = vmatpush.bf16.msra.mxu1 %v12333_v40  ;;  %v14330_v14 = vld [vmem:[#allocation6 + $0xe0c] sm:$0xf]  ;;  %v12394_v17 = vld [vmem:[#allocation6 + $0xe24] sm:$0xf0] }
 0x1da   :  { %8159 = vmatpush.bf16.msra.mxu3 %v12893_v34  ;;  %v12476_v34 = vld [vmem:[#allocation6 + $0xeb0] sm:$0xf]  ;;  %v14242_v1 = vld [vmem:[#allocation6 + $0xb48] sm:$0xf0]  ;;  %v12397_v29 = vor.u32 %v14330_v14, %v12394_v17  ;;  %v12282_v17 = vld [vmem:[#allocation6 + $0xd44] sm:$0xf0] }
 0x1db   :  { %8070 = vmatmul.bf16.vlgmr.msrb.gmra.mxu2 %v14994_v27  ;;  %8083 = vmatmul.bf16.vlgmr.msra.gmra.mxu0 %v14996_v45  ;;  %v12477_v11 = vor.u32 %v14354_v38, %v12476_v34  ;;  %v12336_v38 = vld [vmem:[#allocation6 + $0xd98] sm:$0xf]  ;;  %v14302_v14 = vld [vmem:[#allocation6 + $0xd2c] sm:$0xf] }
 0x1dc   :  { %v14998_v31 = vpop.f32.mrf.mxu1  ;;  %8192 = vmatpush.bf16.msra.mxu0 %v12169_v24  ;;  %8186 = vmatpush.bf16.msrb.mxu2 %v13313_v30  ;;  %v14326_v24 = vld [vmem:[#allocation6 + $0xde8] sm:$0xf0]  ;;  %v12029_v30 = vor.u32 %v14242_v1, %v12028_v10  ;;  %v14487_v1 = vld [vmem:[#allocation6 + $0x12f0] sm:$0xf0] }
 0x1dd   :  { %8117 = vmatpush.bf16.msra.mxu1 %v12305_v52  ;;  %v2847_v40 = vadd.f32 %v14998_v31, %v515_v63  ;;  %v13064_v52 = vld [vmem:[#allocation6 + $0x1348] sm:$0xf]  ;;  %v12285_v63 = vor.u32 %v14302_v14, %v12282_v17  ;;  %v14452_v14 = vld [vmem:[#allocation6 + $0x11d8] sm:$0xf0] }
 0x1de   :  { %8160 = vmatpush.bf16.msra.mxu3 %v12865_v47  ;;  %v14347_v47 = vld [vmem:[#allocation6 + $0xe90] sm:$0xf0]  ;;  %v13065_v60 = vor.u32 %v14501_v54, %v13064_v52 }
 0x1df   :  { %v15002_v36 = vpop.f32.mrf.mxu0  ;;  %v12449_v16 = vor.u32 %v14347_v47, %v12448_v43  ;;  %v12369_v43 = vor.u32 %v14323_v19, %v12366_v48  ;;  %v14228_v47 = vld [vmem:[#allocation6 + $0xad8] sm:$0xf0]  ;;  %v12224_v48 = vld [vmem:[#allocation6 + $0xcb8] sm:$0xf] }
 0x1e0   :  { %8193 = vmatpush.bf16.msra.mxu0 %v12141_v53  ;;  %v14480_v19 = vld [vmem:[#allocation6 + $0x12b8] sm:$0xf0] }
 0x1e1   :  { %8161 = vmatmul.bf16.vlgmr.msra.gmra.mxu3 %v14994_v27 }
 0x1e2   :  { %8218 = vmatpush.bf16.msrb.mxu3 %v12617_v59  ;;  %v12084_v59 = vld [vmem:[#allocation6 + $0xba0] sm:$0xf] }
 0x1e3   :  { %v12085_v57 = vor.u32 %v14256_v58, %v12084_v59  ;;  %v12337_v59 = vor.u32 %v14319_v39, %v12336_v38  ;;  %v14316_v58 = vld [vmem:[#allocation6 + $0xd9c] sm:$0xf] }
 0x1e4   :  { %v2848_v50 = vpop.f32.mrf.mxu1  ;;  %v15005_v56 = vpop.f32.mrf.mxu3  ;;  %8194 = vmatpush.bf16.msra.mxu0 %v12113_v42  ;;  %v12190_v42 = vld [vmem:[#allocation6 + $0xc94] sm:$0xf0] }
 0x1e5   :  { %v12338_v50 = vld [vmem:[#allocation6 + $0xdb4] sm:$0xf0]  ;;  %v2860_v61 = vadd.f32 %v15005_v56, %v2847_v40 }
 0x1e6   :  { %8219 = vmatpush.bf16.msrb.mxu3 %v12589_v62  ;;  %v14301_v62 = vld [vmem:[#allocation6 + $0xd24] sm:$0xf] }
 0x1e7   :  { %v2874_v0 = vpop.f32.mrf.mxu0  ;;  %v15007_v20 = vpop.f32.mrf.mxu2  ;;  %v12277_v8 = vor.u32 %v14301_v62, %v12274_v55  ;;  %v12341_v62 = vor.u32 %v14316_v58, %v12338_v50  ;;  %v11973_v55 = vor.u32 %v14228_v47, %v11972_v46  ;;  %v12952_v46 = vld [vmem:[#allocation6 + $0x1268] sm:$0xf]  ;;  %v12196_v58 = vld [vmem:[#allocation6 + $0xc80] sm:$0xf]  ;;  %v14284_v50 = vld [vmem:[#allocation6 + $0xc98] sm:$0xf0] }
 0x1e8   :  { %8195 = vmatpush.bf16.msra.mxu0 %v12085_v57  ;;  %v14312_v57 = vld [vmem:[#allocation6 + $0xd78] sm:$0xf0] }
 0x1e9   :  { %8118 = vmatpush.bf16.msra.mxu1 %v12277_v8  ;;  %v12280_v8 = vld [vmem:[#allocation6 + $0xd28] sm:$0xf] }
 0x1ea   :  { %8220 = vmatpush.bf16.msrb.mxu3 %v12561_v5  ;;  %v14564_v5 = vld [vmem:[#allocation6 + $0x1558] sm:$0xf0] }
 0x1eb   :  { %v13317_v13 = vor.u32 %v14564_v5, %v13316_v37  ;;  %8135 = vmatmul.bf16.vlgmr.msra.gmra.mxu2 %v14970_v15  ;;  %8148 = vmatmul.bf16.vlgmr.msrb.gmra.mxu0 %v14972_v21  ;;  %v14309_v37 = vld [vmem:[#allocation6 + $0xd64] sm:$0xf]  ;;  %v12310_v5 = vld [vmem:[#allocation6 + $0xd7c] sm:$0xf0] }
 0x1ec   :  { %v2861_v18 = vpop.f32.mrf.mxu3  ;;  %8196 = vmatpush.bf16.msra.mxu0 %v12057_v9  ;;  %8205 = vmatpush.bf16.msra.mxu2 %v12393_v51  ;;  %v2873_v9 = vadd.f32 %v15002_v36, %v2860_v61  ;;  %v12313_v56 = vor.u32 %v14309_v37, %v12310_v5  ;;  %v6204_v36 = vperm.slane %v6202_v49, 0  ;;  %v12197_v61 = vor.u32 %v14284_v50, %v12196_v58  ;;  %v14372_v58 = vld [vmem:[#allocation6 + $0xf5c] sm:$0xf]  ;;  %v12562_v50 = vld [vmem:[#allocation6 + $0xf74] sm:$0xf0] }
 0x1ed   :  { %8119 = vmatpush.bf16.msra.mxu1 %v12249_v25  ;;  %v13009_v18 = vor.u32 %v14487_v1, %v13008_v12  ;;  %v14554_v12 = vld [vmem:[#allocation6 + $0x150c] sm:$0xf]  ;;  %v13290_v1 = vld [vmem:[#allocation6 + $0x1524] sm:$0xf0] }
 0x1ee   :  { %8221 = vmatpush.bf16.msrb.mxu3 %v12533_v22  ;;  %v12364_v22 = vld [vmem:[#allocation6 + $0xdd0] sm:$0xf]  ;;  %v2886_v25 = vadd.f32 %v15007_v20, %v2873_v9  ;;  %v13282_v9 = vld [vmem:[#allocation6 + $0x151c] sm:$0xf0] }
 0x1ef   :  { %v2887_v53 = vpop.f32.mrf.mxu2  ;;  %v12365_v34 = vor.u32 %v14326_v24, %v12364_v22  ;;  %v12252_v22 = vld [vmem:[#allocation6 + $0xcf0] sm:$0xf]  ;;  %v14298_v24 = vld [vmem:[#allocation6 + $0xd08] sm:$0xf0] }
 0x1f0   :  { %8197 = vmatpush.bf16.msra.mxu0 %v12029_v30  ;;  %v14295_v30 = vld [vmem:[#allocation6 + $0xcf4] sm:$0xf]  ;;  %v12980_v53 = vld [vmem:[#allocation6 + $0x12a0] sm:$0xf] }
 0x1f1   :  { %8206 = vmatpush.bf16.msra.mxu2 %v12365_v34  ;;  %8120 = vmatpush.bf16.msra.mxu1 %v12221_v3  ;;  %v12257_v39 = vor.u32 %v14295_v30, %v12254_v4  ;;  %v13293_v4 = vor.u32 %v14554_v12, %v13290_v1 }
 0x1f2   :  { %8222 = vmatpush.bf16.msrb.mxu3 %v12505_v32  ;;  %v15012_v32 = vpop.f32.mrf.mxu0 }
 0x1f4   :  { %8198 = vmatpush.bf16.msra.mxu0 %v12001_v44  ;;  %v12226_v44 = vld [vmem:[#allocation6 + $0xcd4] sm:$0xf0] }
 0x1f5   :  { %8207 = vmatpush.bf16.msra.mxu2 %v12337_v59  ;;  %v14473_v59 = vld [vmem:[#allocation6 + $0x1280] sm:$0xf0] }
 0x1f6   :  { %8223 = vmatpush.bf16.msrb.mxu3 %v12477_v11  ;;  %v14280_v11 = vld [vmem:[#allocation6 + $0xc7c] sm:$0xf] }
 0x1f7   :  { %v12193_v31 = vor.u32 %v14280_v11, %v12190_v42  ;;  %v12981_v11 = vor.u32 %v14480_v19, %v12980_v53  ;;  %v12225_v42 = vor.u32 %v14291_v35, %v12224_v48  ;;  %v14547_v53 = vld [vmem:[#allocation6 + $0x14d4] sm:$0xf]  ;;  %v13262_v19 = vld [vmem:[#allocation6 + $0x14ec] sm:$0xf0] }
 0x1f8   :  { %8199 = vmatpush.bf16.msra.mxu0 %v11973_v55  ;;  %v12198_v55 = vld [vmem:[#allocation6 + $0xc9c] sm:$0xf0]  ;;  %v14379_v48 = vld [vmem:[#allocation6 + $0xf94] sm:$0xf]  ;;  %v12590_v35 = vld [vmem:[#allocation6 + $0xfac] sm:$0xf0] }
 0x1f9   :  { %8121 = vmatpush.bf16.msra.mxu1 %v12193_v31 }
 0x1fa   :  { %8224 = vmatpush.bf16.msrb.mxu3 %v12449_v16  ;;  %v12308_v16 = vld [vmem:[#allocation6 + $0xd60] sm:$0xf]  ;;  %v2926_v0 = vpop.f32.mrf.mxu0 }
 0x1fb   :  { %v12309_v2 = vor.u32 %v14312_v57, %v12308_v16  ;;  %8200 = vmatmul.bf16.vlgmr.msra.gmra.mxu0 %v14957_v23 }
 0x1fc   :  { %v2898_v10 = vpop.f32.mrf.mxu1  ;;  %8244 = vmatpush.bf16.msrb.mxu0 %v13065_v60  ;;  %v12924_v60 = vld [vmem:[#allocation6 + $0x1230] sm:$0xf] }
 0x1fd   :  { %8208 = vmatpush.bf16.msra.mxu2 %v12309_v2  ;;  %v2899_v26 = vadd.f32 %v2898_v10, %v2886_v25  ;;  %v14466_v2 = vld [vmem:[#allocation6 + $0x1248] sm:$0xf0]  ;;  %v13288_v10 = vld [vmem:[#allocation6 + $0x1508] sm:$0xf] }
 0x1fe   :  { %8225 = vmatpush.bf16.msrb.mxu3 %v12421_v28  ;;  %v14305_v28 = vld [vmem:[#allocation6 + $0xd40] sm:$0xf0] }
 0x1ff   :  { %v12281_v51 = vor.u32 %v14305_v28, %v12280_v8  ;;  %v14459_v8 = vld [vmem:[#allocation6 + $0x1210] sm:$0xf0]  ;;  %v14553_v28 = vld [vmem:[#allocation6 + $0x1504] sm:$0xf] }
 0x200   :  { %v13285_v25 = vor.u32 %v14553_v28, %v13282_v9  ;;  %v14525_v28 = vld [vmem:[#allocation6 + $0x1424] sm:$0xf]  ;;  %v13170_v9 = vld [vmem:[#allocation6 + $0x143c] sm:$0xf0] }
 0x201   :  { %8226 = vmatmul.bf16.vlgmr.msrb.gmra.mxu3 %v14970_v15  ;;  %8209 = vmatpush.bf16.msra.mxu2 %v12281_v51  ;;  %v12868_v51 = vld [vmem:[#allocation6 + $0x11c0] sm:$0xf]  ;;  %v13173_v1 = vor.u32 %v14525_v28, %v13170_v9  ;;  %v14561_v9 = vld [vmem:[#allocation6 + $0x1544] sm:$0xf] }
 0x202   :  { %8277 = vmatpush.bf16.msra.mxu3 %v13317_v13  ;;  %v13037_v13 = vor.u32 %v14494_v7, %v13036_v6  ;;  %v12925_v6 = vor.u32 %v14466_v2, %v12924_v60  ;;  %v12896_v7 = vld [vmem:[#allocation6 + $0x11f8] sm:$0xf]  ;;  %v12869_v30 = vor.u32 %v14452_v14, %v12868_v51  ;;  %v13206_v60 = vld [vmem:[#allocation6 + $0x147c] sm:$0xf0]  ;;  %v14365_v2 = vld [vmem:[#allocation6 + $0xf24] sm:$0xf] }
 0x203   :  { %v8032_v41 = vpop.f32.mrf.mxu0  ;;  %v12897_v49 = vor.u32 %v14459_v8, %v12896_v7  ;;  %v13178_v51 = vld [vmem:[#allocation6 + $0x1444] sm:$0xf0]  ;;  %v14358_v14 = vld [vmem:[#allocation6 + $0xeec] sm:$0xf] }
 0x204   :  { %8245 = vmatpush.bf16.msrb.mxu0 %v13037_v13  ;;  %v2911_v34 = vpop.f32.mrf.mxu3  ;;  %v2900_v20 = vpop.f32.mrf.mxu1 }
 0x205   :  { %v2912_v38 = vadd.f32 %v2911_v34, %v2899_v26 }
 0x206   :  { %8296 = vmatpush.bf16.msrb.mxu3 %v12397_v29  ;;  %v12253_v29 = vor.u32 %v14298_v24, %v12252_v22  ;;  %v14386_v22 = vld [vmem:[#allocation6 + $0xfcc] sm:$0xf]  ;;  %v12618_v24 = vld [vmem:[#allocation6 + $0xfe4] sm:$0xf0] }
 0x207   :  { %v2925_v3 = vadd.f32 %v15012_v32, %v2912_v38  ;;  %v8019_v40 = vpop.f32.mrf.mxu2  ;;  %v12953_v32 = vor.u32 %v14473_v59, %v12952_v46  ;;  %v12621_v34 = vor.u32 %v14386_v22, %v12618_v24  ;;  %v14540_v46 = vld [vmem:[#allocation6 + $0x149c] sm:$0xf]  ;;  %v13234_v59 = vld [vmem:[#allocation6 + $0x14b4] sm:$0xf0]  ;;  %v14518_v24 = vld [vmem:[#allocation6 + $0x13ec] sm:$0xf] }
 0x208   :  { %8246 = vmatpush.bf16.msrb.mxu0 %v13009_v18  ;;  %8210 = vmatpush.bf16.msra.mxu2 %v12253_v29  ;;  %v8020_v47 = vadd.f32 %v8019_v40, %v6204_v36  ;;  %v13260_v18 = vld [vmem:[#allocation6 + $0x14d0] sm:$0xf]  ;;  %v14550_v29 = vld [vmem:[#allocation6 + $0x14e8] sm:$0xf0] }
 0x209   :  { %v2934_v52 = vmax.f32 %v2925_v3, 0.0  ;;  %v14539_v3 = vld [vmem:[#allocation6 + $0x1494] sm:$0xf] }
 0x20a   :  { %8297 = vmatpush.bf16.msrb.mxu3 %v12369_v43  ;;  %v14288_v43 = vld [vmem:[#allocation6 + $0xcbc] sm:$0xf]  ;;  %v8033_v16 = vadd.f32 %v8032_v41, %v8020_v47  ;;  %v13254_v41 = vld [vmem:[#allocation6 + $0x14e4] sm:$0xf0]  ;;  %v12593_v47 = vor.u32 %v14379_v48, %v12590_v35  ;;  %v14511_v35 = vld [vmem:[#allocation6 + $0x13b4] sm:$0xf] }
 0x20b   :  { %v12229_v54 = vor.u32 %v14288_v43, %v12226_v44  ;;  %v2938_v57 = vpack.c.bf16 %v2934_v52, %v2934_v52  ;;  %v8034_v31 = vpop.f32.mrf.mxu0  ;;  %v14543_v43 = vld [vmem:[#allocation6 + $0x14b0] sm:$0xf0]  ;;  %v13265_v44 = vor.u32 %v14547_v53, %v13262_v19 }
 0x20c   :  { %8247 = vmatpush.bf16.msrb.mxu0 %v12981_v11  ;;  %8211 = vmatpush.bf16.msra.mxu2 %v12225_v42  ;;  %v2913_v0 = vpop.f32.mrf.mxu3  ;;  %v13226_v11 = vld [vmem:[#allocation6 + $0x14ac] sm:$0xf0]  ;;  %v13232_v42 = vld [vmem:[#allocation6 + $0x1498] sm:$0xf]  ;;  %v14351_v53 = vld [vmem:[#allocation6 + $0xeb4] sm:$0xf] }
 0x20d   :  { %2943 = vst.msk [vmem:[#allocation2 + $0x18] sm:$0xf] %vm2942_vm1, %v2938_v57  ;;  %v13229_v52 = vor.u32 %v14539_v3, %v13226_v11  ;;  %v14532_v57 = vld [vmem:[#allocation6 + $0x145c] sm:$0xf]  ;;  %v13198_v31 = vld [vmem:[#allocation6 + $0x1474] sm:$0xf0] }
 0x20e   :  { %8298 = vmatpush.bf16.msrb.mxu3 %v12341_v62  ;;  %v14281_v62 = vld [vmem:[#allocation6 + $0xc84] sm:$0xf]  ;;  %v13201_v7 = vor.u32 %v14532_v57, %v13198_v31  ;;  %v12840_v57 = vld [vmem:[#allocation6 + $0x1188] sm:$0xf] }
 0x20f   :  { %v12201_v37 = vor.u32 %v14281_v62, %v12198_v55  ;;  %v8021_v5 = vpop.f32.mrf.mxu2  ;;  %v14533_v62 = vld [vmem:[#allocation6 + $0x1464] sm:$0xf]  ;;  %v12565_v55 = vor.u32 %v14372_v58, %v12562_v50  ;;  %v13086_v58 = vld [vmem:[#allocation6 + $0x1394] sm:$0xf0]  ;;  %v13092_v50 = vld [vmem:[#allocation6 + $0x1380] sm:$0xf] }
 0x210   :  { %8248 = vmatpush.bf16.msrb.mxu0 %v12953_v32  ;;  %8212 = vmatpush.bf16.msra.mxu2 %v12197_v61  ;;  %v13204_v32 = vld [vmem:[#allocation6 + $0x1460] sm:$0xf]  ;;  %v13237_v61 = vor.u32 %v14540_v46, %v13234_v59  ;;  %v13209_v12 = vor.u32 %v14533_v62, %v13206_v60  ;;  %v14504_v59 = vld [vmem:[#allocation6 + $0x137c] sm:$0xf] }
 0x211   :  { %v12422_v60 = vld [vmem:[#allocation6 + $0xe5c] sm:$0xf0] }
 0x212   :  { %8299 = vmatpush.bf16.msrb.mxu3 %v12313_v56  ;;  %v14557_v56 = vld [vmem:[#allocation6 + $0x1520] sm:$0xf0] }
 0x213   :  { %v13289_v36 = vor.u32 %v14557_v56, %v13288_v10  ;;  %v13176_v10 = vld [vmem:[#allocation6 + $0x1428] sm:$0xf]  ;;  %v14529_v56 = vld [vmem:[#allocation6 + $0x1440] sm:$0xf0] }
 0x214   :  { %8249 = vmatpush.bf16.msrb.mxu0 %v12925_v6  ;;  %v5807_v13 = vld [vmem:[#allocation2 + $0x18] sm:$0xf]  ;;  %v13177_v22 = vor.u32 %v14529_v56, %v13176_v10  ;;  %v13318_v10 = vld [vmem:[#allocation6 + $0x155c] sm:$0xf0] }
 0x215   :  { %v6228_v17 = vunpack.c.l.b16 %v5807_v13 }
 0x216   :  { %8300 = vmatpush.bf16.msrb.mxu3 %v12285_v63  ;;  %v14546_v63 = vld [vmem:[#allocation6 + $0x14cc] sm:$0xf] }
 0x217   :  { %v15022_v26 = vpack.c.b16 %v6228_v17, %v6228_v17  ;;  %v13257_v20 = vor.u32 %v14546_v63, %v13254_v41  ;;  %v12506_v17 = vld [vmem:[#allocation6 + $0xf04] sm:$0xf0]  ;;  %v14522_v63 = vld [vmem:[#allocation6 + $0x1408] sm:$0xf0] }
 0x218   :  { %8250 = vmatpush.bf16.msrb.mxu0 %v12897_v49  ;;  %v14526_v49 = vld [vmem:[#allocation6 + $0x142c] sm:$0xf] }
 0x219   :  { %13334 = vmatmul.msk.bf16.vlgmr.msrb.gmra.mxu1 %vm2287_vm0, %v15022_v26  ;;  %13335 = vmatmul.msk.bf16.vlgmr.msrb.gmra.mxu2 %vm2287_vm0, %v15022_v26  ;;  %v13181_v41 = vor.u32 %v14526_v49, %v13178_v51  ;;  %v14438_v49 = vld [vmem:[#allocation6 + $0x1168] sm:$0xf0] }
 0x21a   :  { %8301 = vmatpush.bf16.msrb.mxu3 %v12257_v39  ;;  %8166 = vmatpush.bf16.msrb.mxu1 %v13285_v25  ;;  %v13261_v39 = vor.u32 %v14550_v29, %v13260_v18  ;;  %v13142_v25 = vld [vmem:[#allocation6 + $0x1404] sm:$0xf0]  ;;  %v14519_v18 = vld [vmem:[#allocation6 + $0x13f4] sm:$0xf]  ;;  %v12509_v29 = vor.u32 %v14358_v14, %v12506_v17  ;;  %v12814_v17 = vld [vmem:[#allocation6 + $0x116c] sm:$0xf0] }
 0x21b   :  { %8257 = vmatpush.bf16.msrb.mxu2 %v13289_v36  ;;  %13336 = vmatmul.msk.bf16.vlgmr.msra.gmra.mxu3 %vm2287_vm0, %v15022_v26  ;;  %v13148_v36 = vld [vmem:[#allocation6 + $0x13f0] sm:$0xf]  ;;  %v13145_v19 = vor.u32 %v14518_v24, %v13142_v25  ;;  %v14435_v14 = vld [vmem:[#allocation6 + $0x1154] sm:$0xf]  ;;  %v13321_v24 = vor.u32 %v14561_v9, %v13318_v10 }
 0x21c   :  { %v8045_v38 = vpop.f32.mrf.mxu1  ;;  %8251 = vmatpush.bf16.msrb.mxu0 %v12869_v30  ;;  %v13149_v48 = vor.u32 %v14522_v63, %v13148_v36  ;;  %v12400_v25 = vld [vmem:[#allocation6 + $0xe10] sm:$0xf]  ;;  %v14334_v36 = vld [vmem:[#allocation6 + $0xe28] sm:$0xf0]  ;;  %v14407_v9 = vld [vmem:[#allocation6 + $0x1074] sm:$0xf] }
 0x21d   :  { %v8046_v40 = vadd.f32 %v8045_v38, %v8033_v16  ;;  %v14536_v16 = vld [vmem:[#allocation6 + $0x1478] sm:$0xf0]  ;;  %v13114_v38 = vld [vmem:[#allocation6 + $0x13cc] sm:$0xf0] }
 0x21e   :  { %8302 = vmatpush.bf16.msrb.mxu3 %v12229_v54  ;;  %8167 = vmatpush.bf16.msrb.mxu1 %v13257_v20  ;;  %v13233_v54 = vor.u32 %v14543_v43, %v13232_v42  ;;  %v13205_v8 = vor.u32 %v14536_v16, %v13204_v32  ;;  %v13120_v20 = vld [vmem:[#allocation6 + $0x13b8] sm:$0xf]  ;;  %v14344_v43 = vld [vmem:[#allocation6 + $0xe7c] sm:$0xf]  ;;  %v13117_v46 = vor.u32 %v14511_v35, %v13114_v38  ;;  %v14445_v32 = vld [vmem:[#allocation6 + $0x11a0] sm:$0xf0] }
 0x21f   :  { %8258 = vmatpush.bf16.msrb.mxu2 %v13261_v39  ;;  %8252 = vmatmul.bf16.vlgmr.msrb.gmra.mxu0 %v14994_v27  ;;  %v14515_v39 = vld [vmem:[#allocation6 + $0x13d0] sm:$0xf0]  ;;  %v13122_v42 = vld [vmem:[#allocation6 + $0x13d4] sm:$0xf0]  ;;  %v14442_v16 = vld [vmem:[#allocation6 + $0x118c] sm:$0xf] }
 0x220   :  { %8309 = vmatpush.bf16.msra.mxu0 %v12621_v34  ;;  %v12478_v34 = vld [vmem:[#allocation6 + $0xecc] sm:$0xf0]  ;;  %v12372_v35 = vld [vmem:[#allocation6 + $0xdd8] sm:$0xf]  ;;  %v14327_v38 = vld [vmem:[#allocation6 + $0xdf0] sm:$0xf0] }
 0x221   :  { %v12481_v11 = vor.u32 %v14351_v53, %v12478_v34  ;;  %v12786_v53 = vld [vmem:[#allocation6 + $0x1134] sm:$0xf0]  ;;  %v12792_v34 = vld [vmem:[#allocation6 + $0x1120] sm:$0xf]  ;;  %v12702_v10 = vld [vmem:[#allocation6 + $0x108c] sm:$0xf0] }
 0x222   :  { %8303 = vmatpush.bf16.msrb.mxu3 %v12201_v37  ;;  %v12534_v37 = vld [vmem:[#allocation6 + $0xf3c] sm:$0xf0]  ;;  %8168 = vmatpush.bf16.msrb.mxu1 %v13229_v52  ;;  %v14508_v52 = vld [vmem:[#allocation6 + $0x1398] sm:$0xf0] }
 0x223   :  { %8259 = vmatpush.bf16.msrb.mxu2 %v13233_v54  ;;  %v12537_v13 = vor.u32 %v14365_v2, %v12534_v37  ;;  %v14505_v54 = vld [vmem:[#allocation6 + $0x1384] sm:$0xf]  ;;  %v13089_v2 = vor.u32 %v14504_v59, %v13086_v58  ;;  %v13093_v37 = vor.u32 %v14508_v52, %v13092_v50  ;;  %v12344_v58 = vld [vmem:[#allocation6 + $0xda0] sm:$0xf]  ;;  %v14320_v50 = vld [vmem:[#allocation6 + $0xdb8] sm:$0xf0] }
 0x224   :  { %8310 = vmatpush.bf16.msra.mxu0 %v12593_v47  ;;  %v8058_v0 = vpop.f32.mrf.mxu3  ;;  %v8047_v6 = vpop.f32.mrf.mxu1  ;;  %v13121_v47 = vor.u32 %v14515_v39, %v13120_v20  ;;  %v14425_v59 = vld [vmem:[#allocation6 + $0x1100] sm:$0xf0] }
 0x225   :  { %v15031_v5 = vadd.f32 %v8058_v0, %v8046_v40  ;;  %v14512_v40 = vld [vmem:[#allocation6 + $0x13bc] sm:$0xf]  ;;  %v14337_v0 = vld [vmem:[#allocation6 + $0xe44] sm:$0xf]  ;;  %v12848_v6 = vld [vmem:[#allocation6 + $0x1190] sm:$0xf] }
 0x226   :  { %8348 = vmatpush.bf16.msra.mxu3 %v13293_v4  ;;  %8169 = vmatpush.bf16.msrb.mxu1 %v13201_v7  ;;  %v13150_v4 = vld [vmem:[#allocation6 + $0x140c] sm:$0xf0]  ;;  %v13125_v31 = vor.u32 %v14512_v40, %v13122_v42  ;;  %v14446_v7 = vld [vmem:[#allocation6 + $0x11a8] sm:$0xf0]  ;;  %v14424_v40 = vld [vmem:[#allocation6 + $0x10f8] sm:$0xf0] }
 0x227   :  { %8260 = vmatpush.bf16.msrb.mxu2 %v13205_v8  ;;  %v13153_v3 = vor.u32 %v14519_v18, %v13150_v4  ;;  %v12841_v8 = vor.u32 %v14445_v32, %v12840_v57  ;;  %v12849_v51 = vor.u32 %v14446_v7, %v12848_v6  ;;  %v12784_v18 = vld [vmem:[#allocation6 + $0x1118] sm:$0xf]  ;;  %v14428_v4 = vld [vmem:[#allocation6 + $0x111c] sm:$0xf]  ;;  %v14421_v42 = vld [vmem:[#allocation6 + $0x10e4] sm:$0xf] }
 0x228   :  { %8311 = vmatpush.bf16.msra.mxu0 %v12565_v55  ;;  %v13094_v55 = vld [vmem:[#allocation6 + $0x139c] sm:$0xf0]  ;;  %v12789_v39 = vor.u32 %v14428_v4, %v12786_v53  ;;  %v12728_v57 = vld [vmem:[#allocation6 + $0x10a8] sm:$0xf]  ;;  %v12700_v7 = vld [vmem:[#allocation6 + $0x1070] sm:$0xf] }
 0x229   :  { %8122 = vmatmul.bf16.vlgmr.msra.gmra.mxu1 %v14960_v33  ;;  %8213 = vmatmul.bf16.vlgmr.msra.gmra.mxu2 %v14960_v33  ;;  %v13097_v56 = vor.u32 %v14505_v54, %v13094_v55  ;;  %v12345_v55 = vor.u32 %v14320_v50, %v12344_v58  ;;  %v14299_v4 = vld [vmem:[#allocation6 + $0xd10] sm:$0xf0]  ;;  %v12178_v58 = vld [vmem:[#allocation6 + $0xc6c] sm:$0xf0] }
 0x22a   :  { %8349 = vmatpush.bf16.msra.mxu3 %v13265_v44  ;;  %8170 = vmatpush.bf16.msrb.mxu1 %v13173_v1  ;;  %v12450_v44 = vld [vmem:[#allocation6 + $0xe94] sm:$0xf0] }
 0x22b   :  { %8261 = vmatpush.bf16.msrb.mxu2 %v13177_v22  ;;  %8304 = vmatmul.bf16.vlgmr.msrb.gmra.mxu3 %v14960_v33  ;;  %v12453_v62 = vor.u32 %v14344_v43, %v12450_v44  ;;  %v12820_v1 = vld [vmem:[#allocation6 + $0x1158] sm:$0xf]  ;;  %v14439_v22 = vld [vmem:[#allocation6 + $0x1170] sm:$0xf0]  ;;  %v12758_v43 = vld [vmem:[#allocation6 + $0x10fc] sm:$0xf0] }
 0x22c   :  { %8312 = vmatpush.bf16.msra.mxu0 %v12537_v13  ;;  %v8060_v30 = vpop.f32.mrf.mxu3  ;;  %v12425_v13 = vor.u32 %v14337_v0, %v12422_v60  ;;  %v12764_v44 = vld [vmem:[#allocation6 + $0x10e8] sm:$0xf]  ;;  %v12761_v54 = vor.u32 %v14421_v42, %v12758_v43  ;;  %v14418_v0 = vld [vmem:[#allocation6 + $0x10c8] sm:$0xf0]  ;;  %v14397_v42 = vld [vmem:[#allocation6 + $0x1020] sm:$0xf0] }
 0x22d   :  { %v12821_v30 = vor.u32 %v14439_v22, %v12820_v1  ;;  %v12765_v32 = vor.u32 %v14425_v59, %v12764_v44  ;;  %v12316_v60 = vld [vmem:[#allocation6 + $0xd68] sm:$0xf]  ;;  %v12705_v1 = vor.u32 %v14407_v9, %v12702_v10  ;;  %v12672_v22 = vld [vmem:[#allocation6 + $0x1038] sm:$0xf]  ;;  %v12176_v43 = vld [vmem:[#allocation6 + $0xc50] sm:$0xf] }
 0x22e   :  { %8350 = vmatpush.bf16.msra.mxu3 %v13237_v61  ;;  %8171 = vmatpush.bf16.msrb.mxu1 %v13145_v19  ;;  %v12842_v61 = vld [vmem:[#allocation6 + $0x11a4] sm:$0xf0]  ;;  %v12401_v19 = vor.u32 %v14334_v36, %v12400_v25  ;;  %v14400_v36 = vld [vmem:[#allocation6 + $0x103c] sm:$0xf]  ;;  %v14278_v44 = vld [vmem:[#allocation6 + $0xc68] sm:$0xf0] }
 0x22f   :  { %8262 = vmatpush.bf16.msrb.mxu2 %v13149_v48  ;;  %v12845_v28 = vor.u32 %v14442_v16, %v12842_v61  ;;  %v14432_v48 = vld [vmem:[#allocation6 + $0x1138] sm:$0xf0]  ;;  %v14414_v16 = vld [vmem:[#allocation6 + $0x10ac] sm:$0xf]  ;;  %v12730_v61 = vld [vmem:[#allocation6 + $0x10c4] sm:$0xf0] }
 0x230   :  { %8313 = vmatpush.bf16.msra.mxu0 %v12509_v29  ;;  %v14431_v29 = vld [vmem:[#allocation6 + $0x1130] sm:$0xf0]  ;;  %v12733_v6 = vor.u32 %v14414_v16, %v12730_v61  ;;  %v12142_v61 = vld [vmem:[#allocation6 + $0xc2c] sm:$0xf0]  ;;  %v14260_v10 = vld [vmem:[#allocation6 + $0xbdc] sm:$0xf] }
 0x231   :  { %v12785_v20 = vor.u32 %v14431_v29, %v12784_v18  ;;  %v14404_v29 = vld [vmem:[#allocation6 + $0x1058] sm:$0xf0]  ;;  %v14275_v59 = vld [vmem:[#allocation6 + $0xc54] sm:$0xf] }
 0x232   :  { %8351 = vmatpush.bf16.msra.mxu3 %v13209_v12  ;;  %8172 = vmatpush.bf16.msrb.mxu1 %v13117_v46  ;;  %v12812_v12 = vld [vmem:[#allocation6 + $0x1150] sm:$0xf]  ;;  %v12373_v46 = vor.u32 %v14327_v38, %v12372_v35  ;;  %v14393_v35 = vld [vmem:[#allocation6 + $0x1004] sm:$0xf]  ;;  %v12646_v38 = vld [vmem:[#allocation6 + $0x101c] sm:$0xf0] }
 0x233   :  { %8263 = vmatpush.bf16.msrb.mxu2 %v13121_v47  ;;  %v12813_v63 = vor.u32 %v14438_v49, %v12812_v12  ;;  %v12649_v50 = vor.u32 %v14393_v35, %v12646_v38  ;;  %v14267_v16 = vld [vmem:[#allocation6 + $0xc14] sm:$0xf]  ;;  %v13240_v35 = vld [vmem:[#allocation6 + $0x14a0] sm:$0xf] }
 0x234   :  { %8314 = vmatpush.bf16.msra.mxu0 %v12481_v11  ;;  %v12793_v11 = vor.u32 %v14432_v48, %v12792_v34  ;;  %v12644_v34 = vld [vmem:[#allocation6 + $0x1000] sm:$0xf]  ;;  %v14396_v48 = vld [vmem:[#allocation6 + $0x1018] sm:$0xf0] }
 0x236   :  { %8352 = vmatpush.bf16.msra.mxu3 %v13181_v41  ;;  %8173 = vmatpush.bf16.msrb.mxu1 %v13089_v2  ;;  %v12817_v41 = vor.u32 %v14435_v14, %v12814_v17  ;;  %v14313_v2 = vld [vmem:[#allocation6 + $0xd80] sm:$0xf0]  ;;  %v14306_v14 = vld [vmem:[#allocation6 + $0xd48] sm:$0xf0] }
 0x237   :  { %8264 = vmatpush.bf16.msrb.mxu2 %v13093_v37  ;;  %v12317_v12 = vor.u32 %v14313_v2, %v12316_v60  ;;  %v14268_v60 = vld [vmem:[#allocation6 + $0xc1c] sm:$0xf]  ;;  %v12150_v2 = vld [vmem:[#allocation6 + $0xc34] sm:$0xf0] }
 0x238   :  { %8315 = vmatpush.bf16.msra.mxu0 %v12453_v62  ;;  %v12736_v62 = vld [vmem:[#allocation6 + $0x10b0] sm:$0xf] }
 0x239   :  { %8174 = vmatmul.bf16.vlgmr.msrb.gmra.mxu1 %v14996_v45 }
 0x23a   :  { %8353 = vmatpush.bf16.msra.mxu3 %v13153_v3  ;;  %8231 = vmatpush.bf16.msra.mxu1 %v12841_v8  ;;  %v12756_v3 = vld [vmem:[#allocation6 + $0x10e0] sm:$0xf]  ;;  %v14410_v8 = vld [vmem:[#allocation6 + $0x1088] sm:$0xf0] }
 0x23b   :  { %8322 = vmatpush.bf16.msra.mxu2 %v12845_v28  ;;  %v12757_v52 = vor.u32 %v14424_v40, %v12756_v3  ;;  %v12737_v28 = vor.u32 %v14418_v0, %v12736_v62  ;;  %v12701_v17 = vor.u32 %v14410_v8, %v12700_v7  ;;  %v14274_v3 = vld [vmem:[#allocation6 + $0xc4c] sm:$0xf]  ;;  %v12170_v40 = vld [vmem:[#allocation6 + $0xc64] sm:$0xf0]  ;;  %v12181_v62 = vor.u32 %v14275_v59, %v12178_v58  ;;  %v14271_v0 = vld [vmem:[#allocation6 + $0xc30] sm:$0xf0] }
 0x23c   :  { %8316 = vmatpush.bf16.msra.mxu0 %v12425_v13  ;;  %8265 = vmatmul.bf16.vlgmr.msrb.gmra.mxu2 %v14996_v45  ;;  %v14411_v13 = vld [vmem:[#allocation6 + $0x1090] sm:$0xf0]  ;;  %v12204_v7 = vld [vmem:[#allocation6 + $0xc88] sm:$0xf]  ;;  %v14285_v8 = vld [vmem:[#allocation6 + $0xca0] sm:$0xf0] }
 0x23e   :  { %8354 = vmatpush.bf16.msra.mxu3 %v13125_v31  ;;  %8232 = vmatpush.bf16.msra.mxu1 %v12813_v63  ;;  %v14417_v31 = vld [vmem:[#allocation6 + $0x10c0] sm:$0xf0]  ;;  %v12674_v63 = vld [vmem:[#allocation6 + $0x1054] sm:$0xf0] }
 0x23f   :  { %8323 = vmatpush.bf16.msra.mxu2 %v12817_v41  ;;  %8317 = vmatmul.bf16.vlgmr.msra.gmra.mxu0 %v14970_v15  ;;  %v12729_v37 = vor.u32 %v14417_v31, %v12728_v57  ;;  %v12680_v41 = vld [vmem:[#allocation6 + $0x1040] sm:$0xf]  ;;  %v14292_v57 = vld [vmem:[#allocation6 + $0xcd8] sm:$0xf0] }
 0x240   :  { %8368 = vmatpush.bf16.msrb.mxu0 %v13321_v24  ;;  %v14403_v24 = vld [vmem:[#allocation6 + $0x1050] sm:$0xf0] }
 0x241   :  { %v12673_v53 = vor.u32 %v14403_v24, %v12672_v22 }
 0x242   :  { %8355 = vmatpush.bf16.msra.mxu3 %v13097_v56  ;;  %8233 = vmatpush.bf16.msra.mxu1 %v12785_v20  ;;  %v12708_v56 = vld [vmem:[#allocation6 + $0x1078] sm:$0xf]  ;;  %v12681_v20 = vor.u32 %v14404_v29, %v12680_v41  ;;  %v12086_v41 = vld [vmem:[#allocation6 + $0xbbc] sm:$0xf0] }
 0x243   :  { %8324 = vmatpush.bf16.msra.mxu2 %v12789_v39  ;;  %v12709_v25 = vor.u32 %v14411_v13, %v12708_v56  ;;  %v12652_v39 = vld [vmem:[#allocation6 + $0x1008] sm:$0xf]  ;;  %v12114_v56 = vld [vmem:[#allocation6 + $0xbf4] sm:$0xf0]  ;;  %v12120_v13 = vld [vmem:[#allocation6 + $0xbe0] sm:$0xf] }
 0x244   :  { %8387 = vmatpush.bf16.msra.mxu0 %v12401_v19  ;;  %v15040_v47 = vpop.f32.mrf.mxu3  ;;  %v12677_v19 = vor.u32 %v14400_v36, %v12674_v63  ;;  %v12653_v31 = vor.u32 %v14397_v42, %v12652_v39  ;;  %v12117_v22 = vor.u32 %v14260_v10, %v12114_v56  ;;  %v14253_v63 = vld [vmem:[#allocation6 + $0xba4] sm:$0xf]  ;;  %v12058_v39 = vld [vmem:[#allocation6 + $0xb84] sm:$0xf0]  ;;  %v14250_v42 = vld [vmem:[#allocation6 + $0xb88] sm:$0xf0] }
 0x245   :  { %8356 = vmatmul.bf16.vlgmr.msra.gmra.mxu3 %v14996_v45  ;;  %v12008_v56 = vld [vmem:[#allocation6 + $0xb00] sm:$0xf] }
 0x246   :  { %8413 = vmatpush.bf16.msrb.mxu3 %v12849_v51  ;;  %8234 = vmatpush.bf16.msra.mxu1 %v12757_v52  ;;  %v12288_v51 = vld [vmem:[#allocation6 + $0xd30] sm:$0xf]  ;;  %v12173_v52 = vor.u32 %v14274_v3, %v12170_v40  ;;  %v14544_v3 = vld [vmem:[#allocation6 + $0x14b8] sm:$0xf0] }
 0x247   :  { %8325 = vmatpush.bf16.msra.mxu2 %v12761_v54  ;;  %v12289_v18 = vor.u32 %v14306_v14, %v12288_v51  ;;  %v12232_v54 = vld [vmem:[#allocation6 + $0xcc0] sm:$0xf]  ;;  %v14264_v51 = vld [vmem:[#allocation6 + $0xbf8] sm:$0xf0]  ;;  %v14261_v14 = vld [vmem:[#allocation6 + $0xbe4] sm:$0xf]  ;;  %v13241_v58 = vor.u32 %v14544_v3, %v13240_v35 }
 0x248   :  { %8388 = vmatpush.bf16.msra.mxu0 %v12373_v46  ;;  %v12645_v46 = vor.u32 %v14396_v48, %v12644_v34  ;;  %v12121_v36 = vor.u32 %v14264_v51, %v12120_v13  ;;  %v12094_v34 = vld [vmem:[#allocation6 + $0xbc4] sm:$0xf0]  ;;  %v14233_v51 = vld [vmem:[#allocation6 + $0xb04] sm:$0xf] }
 0x24a   :  { %8414 = vmatpush.bf16.msrb.mxu3 %v12821_v30  ;;  %8235 = vmatpush.bf16.msra.mxu1 %v12729_v37  ;;  %v12260_v30 = vld [vmem:[#allocation6 + $0xcf8] sm:$0xf]  ;;  %v12233_v37 = vor.u32 %v14292_v57, %v12232_v54  ;;  %v14239_v54 = vld [vmem:[#allocation6 + $0xb34] sm:$0xf]  ;;  %v12030_v57 = vld [vmem:[#allocation6 + $0xb4c] sm:$0xf0] }
 0x24b   :  { %8326 = vmatpush.bf16.msra.mxu2 %v12733_v6  ;;  %v12145_v6 = vor.u32 %v14267_v16, %v12142_v61  ;;  %v12036_v16 = vld [vmem:[#allocation6 + $0xb38] sm:$0xf]  ;;  %v14243_v61 = vld [vmem:[#allocation6 + $0xb50] sm:$0xf0] }
 0x24c   :  { %8389 = vmatpush.bf16.msra.mxu0 %v12345_v55  ;;  %v8112_v49 = vpop.f32.mrf.mxu3  ;;  %v12148_v55 = vld [vmem:[#allocation6 + $0xc18] sm:$0xf] }
 0x24d   :  { %v12149_v9 = vor.u32 %v14271_v0, %v12148_v55  ;;  %v12153_v49 = vor.u32 %v14268_v60, %v12150_v2  ;;  %v12038_v55 = vld [vmem:[#allocation6 + $0xb54] sm:$0xf0]  ;;  %v12033_v0 = vor.u32 %v14239_v54, %v12030_v57 }
 0x24e   :  { %8415 = vmatpush.bf16.msrb.mxu3 %v12793_v11  ;;  %8236 = vmatpush.bf16.msra.mxu1 %v12701_v17  ;;  %v12261_v11 = vor.u32 %v14299_v4, %v12260_v30  ;;  %v12122_v17 = vld [vmem:[#allocation6 + $0xbfc] sm:$0xf0]  ;;  %v12092_v30 = vld [vmem:[#allocation6 + $0xba8] sm:$0xf]  ;;  %v14257_v4 = vld [vmem:[#allocation6 + $0xbc0] sm:$0xf0] }
 0x24f   :  { %8327 = vmatpush.bf16.msra.mxu2 %v12705_v1  ;;  %13337 = vmatmul.msk.bf16.vlgmr.msrb.gmra.mxu0 %vm2287_vm0, %v15022_v26  ;;  %v12205_v1 = vor.u32 %v14285_v8, %v12204_v7  ;;  %v12125_v29 = vor.u32 %v14261_v14, %v12122_v17  ;;  %v12093_v38 = vor.u32 %v14257_v4, %v12092_v30  ;;  %v14232_v7 = vld [vmem:[#allocation6 + $0xafc] sm:$0xf]  ;;  %v12002_v8 = vld [vmem:[#allocation6 + $0xb14] sm:$0xf0]  ;;  %v12010_v14 = vld [vmem:[#allocation6 + $0xb1c] sm:$0xf0] }
 0x250   :  { %8390 = vmatpush.bf16.msra.mxu0 %v12317_v12  ;;  %v14558_v12 = vld [vmem:[#allocation6 + $0x1528] sm:$0xf0]  ;;  %v13044_v57 = vld [vmem:[#allocation6 + $0x1318] sm:$0xf] }
 0x251   :  { %v14226_v30 = vld [vmem:[#allocation6 + $0xacc] sm:$0xf] }
 0x252   :  { %8416 = vmatpush.bf16.msrb.mxu3 %v12765_v32  ;;  %8237 = vmatpush.bf16.msra.mxu1 %v12673_v53  ;;  %v12177_v32 = vor.u32 %v14278_v44, %v12176_v43  ;;  %v14254_v53 = vld [vmem:[#allocation6 + $0xbac] sm:$0xf]  ;;  %v14247_v44 = vld [vmem:[#allocation6 + $0xb74] sm:$0xf] }
 0x253   :  { %8328 = vmatpush.bf16.msra.mxu2 %v12677_v19  ;;  %v12089_v19 = vor.u32 %v14253_v63, %v12086_v41  ;;  %v12097_v40 = vor.u32 %v14254_v53, %v12094_v34  ;;  %v11974_v63 = vld [vmem:[#allocation6 + $0xadc] sm:$0xf0]  ;;  %v11980_v41 = vld [vmem:[#allocation6 + $0xac8] sm:$0xf]  ;;  %v14498_v4 = vld [vmem:[#allocation6 + $0x134c] sm:$0xf] }
 0x254   :  { %8391 = vmatpush.bf16.msra.mxu0 %v12289_v18  ;;  %v14551_v18 = vld [vmem:[#allocation6 + $0x14f0] sm:$0xf0]  ;;  %v13066_v53 = vld [vmem:[#allocation6 + $0x1364] sm:$0xf0] }
 0x255   :  { %v11982_v34 = vld [vmem:[#allocation6 + $0xae4] sm:$0xf0] }
 0x256   :  { %8417 = vmatpush.bf16.msrb.mxu3 %v12737_v28  ;;  %8238 = vmatpush.bf16.msra.mxu1 %v12645_v46  ;;  %v13296_v28 = vld [vmem:[#allocation6 + $0x1510] sm:$0xf] }
 0x257   :  { %8329 = vmatpush.bf16.msra.mxu2 %v12649_v50  ;;  %v13297_v24 = vor.u32 %v14558_v12, %v13296_v28  ;;  %v12066_v46 = vld [vmem:[#allocation6 + $0xb8c] sm:$0xf0]  ;;  %v13212_v50 = vld [vmem:[#allocation6 + $0x1468] sm:$0xf]  ;;  %v14236_v12 = vld [vmem:[#allocation6 + $0xb18] sm:$0xf0] }
 0x258   :  { %8392 = vmatpush.bf16.msra.mxu0 %v12261_v11  ;;  %v12064_v11 = vld [vmem:[#allocation6 + $0xb70] sm:$0xf]  ;;  %v8084_v43 = vpop.f32.mrf.mxu0 }
 0x259   :  { %8239 = vmatmul.bf16.vlgmr.msra.gmra.mxu1 %v14972_v21 }
 0x25a   :  { %8418 = vmatpush.bf16.msrb.mxu3 %v12709_v25  ;;  %8283 = vmatpush.bf16.msrb.mxu1 %v12173_v52  ;;  %v13268_v25 = vld [vmem:[#allocation6 + $0x14d8] sm:$0xf]  ;;  %v12065_v52 = vor.u32 %v14250_v42, %v12064_v11  ;;  %v13069_v11 = vor.u32 %v14498_v4, %v13066_v53  ;;  %v13128_v42 = vld [vmem:[#allocation6 + $0x13c0] sm:$0xf] }
 0x25b   :  { %8374 = vmatpush.bf16.msrb.mxu2 %v12177_v32  ;;  %v13269_v48 = vor.u32 %v14551_v18, %v13268_v25  ;;  %v12069_v32 = vor.u32 %v14247_v44, %v12066_v46  ;;  %v13156_v25 = vld [vmem:[#allocation6 + $0x13f8] sm:$0xf]  ;;  %v14229_v18 = vld [vmem:[#allocation6 + $0xae0] sm:$0xf0]  ;;  %v11985_v44 = vor.u32 %v14226_v30, %v11982_v34  ;;  %v12990_v30 = vld [vmem:[#allocation6 + $0x12c4] sm:$0xf0] }
 0x25c   :  { %8330 = vmatmul.bf16.vlgmr.msra.gmra.mxu2 %v14972_v21  ;;  %8393 = vmatpush.bf16.msra.mxu0 %v12233_v37  ;;  %v13184_v37 = vld [vmem:[#allocation6 + $0x1430] sm:$0xf] }
 0x25e   :  { %8419 = vmatpush.bf16.msrb.mxu3 %v12681_v20  ;;  %8284 = vmatpush.bf16.msrb.mxu1 %v12145_v6  ;;  %v14246_v20 = vld [vmem:[#allocation6 + $0xb6c] sm:$0xf]  ;;  %v8071_v60 = vpop.f32.mrf.mxu2  ;;  %v12037_v6 = vor.u32 %v14243_v61, %v12036_v16  ;;  %v13046_v16 = vld [vmem:[#allocation6 + $0x1334] sm:$0xf0] }
 0x25f   :  { %8375 = vmatpush.bf16.msrb.mxu2 %v12149_v9  ;;  %v12061_v59 = vor.u32 %v14246_v20, %v12058_v39  ;;  %v8072_v28 = vadd.f32 %v8071_v60, %v15031_v5  ;;  %v14530_v9 = vld [vmem:[#allocation6 + $0x1448] sm:$0xf0]  ;;  %v12009_v5 = vor.u32 %v14236_v12, %v12008_v56  ;;  %v13074_v20 = vld [vmem:[#allocation6 + $0x136c] sm:$0xf0]  ;;  %v14443_v60 = vld [vmem:[#allocation6 + $0x1194] sm:$0xf] }
 0x260   :  { %8394 = vmatpush.bf16.msra.mxu0 %v12205_v1  ;;  %v8086_v13 = vpop.f32.mrf.mxu0  ;;  %v12005_v1 = vor.u32 %v14232_v7, %v12002_v8  ;;  %v12850_v7 = vld [vmem:[#allocation6 + $0x11ac] sm:$0xf0]  ;;  %v13018_v56 = vld [vmem:[#allocation6 + $0x12fc] sm:$0xf0] }
 0x261   :  { %v15051_v17 = vadd.f32 %v8084_v43, %v8072_v28  ;;  %v14516_v43 = vld [vmem:[#allocation6 + $0x13d8] sm:$0xf0]  ;;  %v13016_v28 = vld [vmem:[#allocation6 + $0x12e0] sm:$0xf] }
 0x262   :  { %8420 = vmatpush.bf16.msrb.mxu3 %v12653_v31  ;;  %8285 = vmatpush.bf16.msrb.mxu1 %v12117_v22  ;;  %v14537_v31 = vld [vmem:[#allocation6 + $0x1480] sm:$0xf0]  ;;  %v13129_v61 = vor.u32 %v14516_v43, %v13128_v42  ;;  %v12962_v42 = vld [vmem:[#allocation6 + $0x128c] sm:$0xf0] }
 0x263   :  { %8376 = vmatpush.bf16.msrb.mxu2 %v12121_v36  ;;  %8395 = vmatmul.bf16.vlgmr.msra.gmra.mxu0 %v14960_v33  ;;  %v13213_v2 = vor.u32 %v14537_v31, %v13212_v50  ;;  %v14225_v22 = vld [vmem:[#allocation6 + $0xac4] sm:$0xf]  ;;  %v14523_v36 = vld [vmem:[#allocation6 + $0x1410] sm:$0xf0] }
 0x264   :  { %8439 = vmatpush.bf16.msrb.mxu0 %v13297_v24  ;;  %v13185_v24 = vor.u32 %v14530_v9, %v13184_v37  ;;  %v11977_v35 = vor.u32 %v14225_v22, %v11974_v63  ;;  %v13157_v3 = vor.u32 %v14523_v36, %v13156_v25  ;;  %v14495_v31 = vld [vmem:[#allocation6 + $0x1330] sm:$0xf0]  ;;  %v14484_v37 = vld [vmem:[#allocation6 + $0x12dc] sm:$0xf]  ;;  %v12982_v25 = vld [vmem:[#allocation6 + $0x12bc] sm:$0xf0] }
 0x265   :  { %8421 = vmatmul.bf16.vlgmr.msrb.gmra.mxu3 %v14972_v21  ;;  %v14488_v9 = vld [vmem:[#allocation6 + $0x12f8] sm:$0xf0] }
 0x266   :  { %8465 = vmatpush.bf16.msra.mxu3 %v12181_v62  ;;  %8286 = vmatpush.bf16.msrb.mxu1 %v12089_v19  ;;  %v14240_v62 = vld [vmem:[#allocation6 + $0xb3c] sm:$0xf]  ;;  %v13072_v19 = vld [vmem:[#allocation6 + $0x1350] sm:$0xf]  ;;  %v8073_v39 = vpop.f32.mrf.mxu2  ;;  %v13017_v22 = vor.u32 %v14488_v9, %v13016_v28 }
 0x267   :  { %8377 = vmatpush.bf16.msrb.mxu2 %v12093_v38  ;;  %v12041_v10 = vor.u32 %v14240_v62, %v12038_v55  ;;  %v14499_v38 = vld [vmem:[#allocation6 + $0x1354] sm:$0xf]  ;;  %v13100_v55 = vld [vmem:[#allocation6 + $0x1388] sm:$0xf]  ;;  %v12738_v28 = vld [vmem:[#allocation6 + $0x10cc] sm:$0xf0] }
 0x268   :  { %8440 = vmatpush.bf16.msrb.mxu0 %v13269_v48  ;;  %v14502_v48 = vld [vmem:[#allocation6 + $0x1368] sm:$0xf0]  ;;  %v13077_v54 = vor.u32 %v14499_v38, %v13074_v20  ;;  %v12954_v38 = vld [vmem:[#allocation6 + $0x1284] sm:$0xf0]  ;;  %v12794_v20 = vld [vmem:[#allocation6 + $0x113c] sm:$0xf0] }
 0x269   :  { %v13073_v46 = vor.u32 %v14502_v48, %v13072_v19  ;;  %v14429_v19 = vld [vmem:[#allocation6 + $0x1124] sm:$0xf] }
 0x26a   :  { %8466 = vmatpush.bf16.msra.mxu3 %v12153_v49  ;;  %8287 = vmatpush.bf16.msrb.mxu1 %v12061_v59  ;;  %v15049_v49 = vpop.f32.mrf.mxu3  ;;  %v14491_v59 = vld [vmem:[#allocation6 + $0x1314] sm:$0xf] }
 0x26b   :  { %8378 = vmatpush.bf16.msrb.mxu2 %v12065_v52  ;;  %v15053_v52 = vpop.f32.mrf.mxu0 }
 0x26c   :  { %8441 = vmatpush.bf16.msrb.mxu0 %v13241_v58  ;;  %v13038_v58 = vld [vmem:[#allocation6 + $0x132c] sm:$0xf0] }
 0x26d   :  { %v13041_v62 = vor.u32 %v14491_v59, %v13038_v58  ;;  %v14422_v59 = vld [vmem:[#allocation6 + $0x10ec] sm:$0xf] }
 0x26e   :  { %8467 = vmatpush.bf16.msra.mxu3 %v12125_v29  ;;  %8288 = vmatpush.bf16.msrb.mxu1 %v12033_v0  ;;  %v12013_v29 = vor.u32 %v14233_v51, %v12010_v14  ;;  %v14509_v0 = vld [vmem:[#allocation6 + $0x13a0] sm:$0xf0]  ;;  %v15057_v12 = vpop.f32.mrf.mxu2  ;;  %v12853_v14 = vor.u32 %v14443_v60, %v12850_v7  ;;  %v14456_v7 = vld [vmem:[#allocation6 + $0x11fc] sm:$0xf] }
 0x26f   :  { %8379 = vmatpush.bf16.msrb.mxu2 %v12037_v6  ;;  %v13010_v6 = vld [vmem:[#allocation6 + $0x12f4] sm:$0xf0]  ;;  %v13101_v13 = vor.u32 %v14509_v0, %v13100_v55 }
 0x270   :  { %8442 = vmatpush.bf16.msrb.mxu0 %v13213_v2  ;;  %v13045_v2 = vor.u32 %v14495_v31, %v13044_v57  ;;  %v13013_v51 = vor.u32 %v14484_v37, %v13010_v6  ;;  %v12766_v31 = vld [vmem:[#allocation6 + $0x1104] sm:$0xf0]  ;;  %v12934_v55 = vld [vmem:[#allocation6 + $0x1254] sm:$0xf0]  ;;  %v14415_v37 = vld [vmem:[#allocation6 + $0x10b4] sm:$0xf] }
 0x272   :  { %8468 = vmatpush.bf16.msra.mxu3 %v12097_v40  ;;  %8289 = vmatpush.bf16.msrb.mxu1 %v12005_v1  ;;  %v11981_v40 = vor.u32 %v14229_v18, %v11980_v41  ;;  %v8164_v50 = vpop.f32.mrf.mxu3  ;;  %v14436_v1 = vld [vmem:[#allocation6 + $0x115c] sm:$0xf]  ;;  %v12988_v41 = vld [vmem:[#allocation6 + $0x12a8] sm:$0xf]  ;;  %v14481_v18 = vld [vmem:[#allocation6 + $0x12c0] sm:$0xf0] }
 0x273   :  { %8380 = vmatpush.bf16.msrb.mxu2 %v12009_v5  ;;  %v8151_v36 = vpop.f32.mrf.mxu0  ;;  %v12822_v5 = vld [vmem:[#allocation6 + $0x1174] sm:$0xf0]  ;;  %v12989_v48 = vor.u32 %v14481_v18, %v12988_v41  ;;  %v14463_v50 = vld [vmem:[#allocation6 + $0x1234] sm:$0xf]  ;;  %v14453_v41 = vld [vmem:[#allocation6 + $0x11e0] sm:$0xf0] }
 0x274   :  { %8443 = vmatpush.bf16.msrb.mxu0 %v13185_v24  ;;  %v14477_v24 = vld [vmem:[#allocation6 + $0x12a4] sm:$0xf]  ;;  %v12825_v34 = vor.u32 %v14436_v1, %v12822_v5  ;;  %v12870_v5 = vld [vmem:[#allocation6 + $0x11dc] sm:$0xf0] }
 0x275   :  { %v12985_v53 = vor.u32 %v14477_v24, %v12982_v25  ;;  %v14449_v1 = vld [vmem:[#allocation6 + $0x11c4] sm:$0xf]  ;;  %v14408_v24 = vld [vmem:[#allocation6 + $0x107c] sm:$0xf]  ;;  %v12710_v25 = vld [vmem:[#allocation6 + $0x1094] sm:$0xf0] }
 0x276   :  { %8469 = vmatpush.bf16.msra.mxu3 %v12069_v32  ;;  %8290 = vmatpush.bf16.msrb.mxu1 %v11977_v35  ;;  %v14492_v32 = vld [vmem:[#allocation6 + $0x131c] sm:$0xf]  ;;  %v14470_v35 = vld [vmem:[#allocation6 + $0x126c] sm:$0xf]  ;;  %v8138_v43 = vpop.f32.mrf.mxu2 }
 0x277   :  { %8381 = vmatpush.bf16.msrb.mxu2 %v11981_v40  ;;  %v13049_v8 = vor.u32 %v14492_v32, %v13046_v16  ;;  %v14474_v40 = vld [vmem:[#allocation6 + $0x1288] sm:$0xf0]  ;;  %v12932_v16 = vld [vmem:[#allocation6 + $0x1238] sm:$0xf]  ;;  %v12682_v43 = vld [vmem:[#allocation6 + $0x105c] sm:$0xf0] }
 0x278   :  { %8444 = vmatpush.bf16.msrb.mxu0 %v13157_v3  ;;  %v12960_v3 = vld [vmem:[#allocation6 + $0x1270] sm:$0xf] }
 0x279   :  { %8291 = vmatmul.bf16.vlgmr.msrb.gmra.mxu1 %v14957_v23  ;;  %v12961_v58 = vor.u32 %v14474_v40, %v12960_v3  ;;  %v12713_v3 = vor.u32 %v14408_v24, %v12710_v25  ;;  %v12540_v24 = vld [vmem:[#allocation6 + $0xf28] sm:$0xf]  ;;  %v14369_v25 = vld [vmem:[#allocation6 + $0xf40] sm:$0xf0] }
 0x27a   :  { %8470 = vmatpush.bf16.msra.mxu3 %v12041_v10  ;;  %8335 = vmatpush.bf16.msra.mxu1 %v13069_v11  ;;  %v14485_v10 = vld [vmem:[#allocation6 + $0x12e4] sm:$0xf]  ;;  %v14471_v11 = vld [vmem:[#allocation6 + $0x1274] sm:$0xf] }
 0x27b   :  { %8426 = vmatpush.bf16.msra.mxu2 %v13073_v46  ;;  %v13021_v63 = vor.u32 %v14485_v10, %v13018_v56  ;;  %v12797_v46 = vor.u32 %v14429_v19, %v12794_v20  ;;  %v15063_v57 = vpop.f32.mrf.mxu0  ;;  %v12965_v32 = vor.u32 %v14471_v11, %v12962_v42  ;;  %v12904_v10 = vld [vmem:[#allocation6 + $0x1200] sm:$0xf]  ;;  %v14460_v56 = vld [vmem:[#allocation6 + $0x1218] sm:$0xf0]  ;;  %v12878_v19 = vld [vmem:[#allocation6 + $0x11e4] sm:$0xf0] }
 0x27c   :  { %8382 = vmatmul.bf16.vlgmr.msrb.gmra.mxu2 %v14957_v23  ;;  %8445 = vmatpush.bf16.msrb.mxu0 %v13129_v61  ;;  %v14467_v61 = vld [vmem:[#allocation6 + $0x1250] sm:$0xf0]  ;;  %v12905_v36 = vor.u32 %v14460_v56, %v12904_v10  ;;  %v12632_v20 = vld [vmem:[#allocation6 + $0xfd8] sm:$0xf]  ;;  %v14401_v42 = vld [vmem:[#allocation6 + $0x1044] sm:$0xf] }
 0x27d   :  { %v12933_v6 = vor.u32 %v14467_v61, %v12932_v16  ;;  %v14384_v16 = vld [vmem:[#allocation6 + $0xfb8] sm:$0xf0]  ;;  %v12685_v61 = vor.u32 %v14401_v42, %v12682_v43  ;;  %v12576_v10 = vld [vmem:[#allocation6 + $0xf68] sm:$0xf]  ;;  %v14377_v56 = vld [vmem:[#allocation6 + $0xf80] sm:$0xf0] }
 0x27e   :  { %8471 = vmatpush.bf16.msra.mxu3 %v12013_v29  ;;  %8336 = vmatpush.bf16.msra.mxu1 %v13041_v62  ;;  %v14478_v29 = vld [vmem:[#allocation6 + $0x12ac] sm:$0xf]  ;;  %v14464_v62 = vld [vmem:[#allocation6 + $0x123c] sm:$0xf]  ;;  %v14363_v42 = vld [vmem:[#allocation6 + $0xf10] sm:$0xf0] }
 0x27f   :  { %8427 = vmatpush.bf16.msra.mxu2 %v13045_v2  ;;  %v12993_v39 = vor.u32 %v14478_v29, %v12990_v30  ;;  %v12769_v2 = vor.u32 %v14422_v59, %v12766_v31  ;;  %v12937_v9 = vor.u32 %v14464_v62, %v12934_v55  ;;  %v14450_v30 = vld [vmem:[#allocation6 + $0x11cc] sm:$0xf]  ;;  %v12596_v59 = vld [vmem:[#allocation6 + $0xf98] sm:$0xf] }
 0x280   :  { %8446 = vmatpush.bf16.msrb.mxu0 %v13101_v13  ;;  %v14457_v13 = vld [vmem:[#allocation6 + $0x1204] sm:$0xf]  ;;  %v12598_v31 = vld [vmem:[#allocation6 + $0xfb4] sm:$0xf0]  ;;  %v14394_v55 = vld [vmem:[#allocation6 + $0x100c] sm:$0xf] }
 0x282   :  { %8472 = vmatpush.bf16.msra.mxu3 %v11985_v44  ;;  %8337 = vmatpush.bf16.msra.mxu1 %v13013_v51  ;;  %v12957_v44 = vor.u32 %v14470_v35, %v12954_v38  ;;  %v12906_v51 = vld [vmem:[#allocation6 + $0x121c] sm:$0xf0]  ;;  %v12626_v35 = vld [vmem:[#allocation6 + $0xfec] sm:$0xf0]  ;;  %v12873_v38 = vor.u32 %v14449_v1, %v12870_v5  ;;  %v12577_v5 = vor.u32 %v14377_v56, %v12576_v10  ;;  %v14251_v10 = vld [vmem:[#allocation6 + $0xb90] sm:$0xf0] }
 0x283   :  { %8428 = vmatpush.bf16.msra.mxu2 %v13017_v22  ;;  %8447 = vmatmul.bf16.vlgmr.msrb.gmra.mxu0 %v14996_v45  ;;  %v12741_v22 = vor.u32 %v14415_v37, %v12738_v28  ;;  %v8203_v18 = vpop.f32.mrf.mxu0  ;;  %v12909_v29 = vor.u32 %v14457_v13, %v12906_v51  ;;  %v12568_v37 = vld [vmem:[#allocation6 + $0xf60] sm:$0xf]  ;;  %v14373_v28 = vld [vmem:[#allocation6 + $0xf64] sm:$0xf] }
 0x284   :  { %v15060_v4 = vpop.f32.mrf.mxu3  ;;  %8504 = vmatpush.bf16.msra.mxu0 %v12853_v14  ;;  %v12156_v1 = vld [vmem:[#allocation6 + $0xc20] sm:$0xf]  ;;  %v12548_v18 = vld [vmem:[#allocation6 + $0xf30] sm:$0xf] }
 0x285   :  { %8473 = vmatmul.bf16.vlgmr.msra.gmra.mxu3 %v14957_v23 }
 0x286   :  { %8517 = vmatpush.bf16.msrb.mxu3 %v13077_v54  ;;  %8338 = vmatpush.bf16.msra.mxu1 %v12985_v53  ;;  %v12926_v54 = vld [vmem:[#allocation6 + $0x124c] sm:$0xf0] }
 0x287   :  { %8429 = vmatpush.bf16.msra.mxu2 %v12989_v48  ;;  %v12929_v60 = vor.u32 %v14463_v50, %v12926_v54  ;;  %v12624_v53 = vld [vmem:[#allocation6 + $0xfd0] sm:$0xf]  ;;  %v14387_v48 = vld [vmem:[#allocation6 + $0xfd4] sm:$0xf]  ;;  %v14380_v54 = vld [vmem:[#allocation6 + $0xf9c] sm:$0xf] }
 0x288   :  { %8505 = vmatpush.bf16.msra.mxu0 %v12825_v34  ;;  %v14390_v34 = vld [vmem:[#allocation6 + $0xfe8] sm:$0xf0] }
 0x289   :  { %v12625_v11 = vor.u32 %v14390_v34, %v12624_v53  ;;  %v12541_v53 = vor.u32 %v14369_v25, %v12540_v24  ;;  %v14349_v24 = vld [vmem:[#allocation6 + $0xea0] sm:$0xf0] }
 0x28a   :  { %8518 = vmatpush.bf16.msrb.mxu3 %v13049_v8  ;;  %8339 = vmatpush.bf16.msra.mxu1 %v12957_v44  ;;  %v12898_v8 = vld [vmem:[#allocation6 + $0x1214] sm:$0xf0]  ;;  %v12881_v44 = vor.u32 %v14450_v30, %v12878_v19  ;;  %v12128_v19 = vld [vmem:[#allocation6 + $0xbe8] sm:$0xf] }
 0x28b   :  { %8430 = vmatpush.bf16.msra.mxu2 %v12961_v58  ;;  %v12901_v14 = vor.u32 %v14456_v7, %v12898_v8  ;;  %v14383_v58 = vld [vmem:[#allocation6 + $0xfb0] sm:$0xf0] }
 0x28c   :  { %v8229_v0 = vpop.f32.mrf.mxu3  ;;  %8506 = vmatpush.bf16.msra.mxu0 %v12797_v46  ;;  %v12629_v46 = vor.u32 %v14387_v48, %v12626_v35  ;;  %v12597_v62 = vor.u32 %v14383_v58, %v12596_v59  ;;  %v14279_v7 = vld [vmem:[#allocation6 + $0xc70] sm:$0xf0]  ;;  %v12512_v35 = vld [vmem:[#allocation6 + $0xef0] sm:$0xf]  ;;  %v12484_v58 = vld [vmem:[#allocation6 + $0xeb8] sm:$0xf] }
 0x28d   :  { %v12654_v0 = vld [vmem:[#allocation6 + $0x1024] sm:$0xf0] }
 0x28e   :  { %8519 = vmatpush.bf16.msrb.mxu3 %v13021_v63  ;;  %8340 = vmatpush.bf16.msra.mxu1 %v12929_v60  ;;  %v12876_v63 = vld [vmem:[#allocation6 + $0x11c8] sm:$0xf]  ;;  %v12184_v60 = vld [vmem:[#allocation6 + $0xc58] sm:$0xf]  ;;  %v12657_v13 = vor.u32 %v14394_v55, %v12654_v0  ;;  %v12492_v55 = vld [vmem:[#allocation6 + $0xec0] sm:$0xf] }
 0x28f   :  { %8431 = vmatpush.bf16.msra.mxu2 %v12933_v6  ;;  %v12877_v40 = vor.u32 %v14453_v41, %v12876_v63  ;;  %v14376_v6 = vld [vmem:[#allocation6 + $0xf78] sm:$0xf0]  ;;  %v14366_v63 = vld [vmem:[#allocation6 + $0xf2c] sm:$0xf]  ;;  %v12542_v41 = vld [vmem:[#allocation6 + $0xf44] sm:$0xf0] }
 0x290   :  { %8507 = vmatpush.bf16.msra.mxu0 %v12769_v2  ;;  %v12601_v2 = vor.u32 %v14380_v54, %v12598_v31  ;;  %v12569_v51 = vor.u32 %v14376_v6, %v12568_v37  ;;  %v12545_v48 = vor.u32 %v14366_v63, %v12542_v41  ;;  %v14258_v54 = vld [vmem:[#allocation6 + $0xbc8] sm:$0xf0]  ;;  %v14356_v0 = vld [vmem:[#allocation6 + $0xed8] sm:$0xf0]  ;;  %v12044_v63 = vld [vmem:[#allocation6 + $0xb40] sm:$0xf] }
 0x291   :  { %v12493_v56 = vor.u32 %v14356_v0, %v12492_v55  ;;  %v14244_v41 = vld [vmem:[#allocation6 + $0xb58] sm:$0xf0]  ;;  %v14331_v55 = vld [vmem:[#allocation6 + $0xe14] sm:$0xf]  ;;  %v12402_v0 = vld [vmem:[#allocation6 + $0xe2c] sm:$0xf0] }
 0x292   :  { %8520 = vmatpush.bf16.msrb.mxu3 %v12993_v39  ;;  %8341 = vmatpush.bf16.msra.mxu1 %v12901_v14  ;;  %v14391_v39 = vld [vmem:[#allocation6 + $0xff0] sm:$0xf0]  ;;  %v12185_v14 = vor.u32 %v14279_v7, %v12184_v60  ;;  %v12072_v7 = vld [vmem:[#allocation6 + $0xb78] sm:$0xf] }
 0x293   :  { %8432 = vmatpush.bf16.msra.mxu2 %v12905_v36  ;;  %v12633_v50 = vor.u32 %v14391_v39, %v12632_v20  ;;  %v14272_v36 = vld [vmem:[#allocation6 + $0xc38] sm:$0xf0]  ;;  %v14265_v20 = vld [vmem:[#allocation6 + $0xc00] sm:$0xf0] }
 0x294   :  { %8508 = vmatpush.bf16.msra.mxu0 %v12741_v22  ;;  %v12157_v34 = vor.u32 %v14272_v36, %v12156_v1  ;;  %v12428_v36 = vld [vmem:[#allocation6 + $0xe48] sm:$0xf] }
 0x296   :  { %8521 = vmatpush.bf16.msrb.mxu3 %v12965_v32  ;;  %8342 = vmatpush.bf16.msra.mxu1 %v12873_v38  ;;  %v12604_v32 = vld [vmem:[#allocation6 + $0xfa0] sm:$0xf]  ;;  %v15068_v30 = vpop.f32.mrf.mxu1  ;;  %v14362_v38 = vld [vmem:[#allocation6 + $0xf08] sm:$0xf0] }
 0x297   :  { %8433 = vmatpush.bf16.msra.mxu2 %v12877_v40  ;;  %v12605_v8 = vor.u32 %v14384_v16, %v12604_v32  ;;  %v12514_v40 = vld [vmem:[#allocation6 + $0xf0c] sm:$0xf0]  ;;  %v12513_v43 = vor.u32 %v14362_v38, %v12512_v35  ;;  %v14352_v16 = vld [vmem:[#allocation6 + $0xebc] sm:$0xf] }
 0x298   :  { %8509 = vmatpush.bf16.msra.mxu0 %v12713_v3  ;;  %v14359_v3 = vld [vmem:[#allocation6 + $0xef4] sm:$0xf]  ;;  %v12436_v35 = vld [vmem:[#allocation6 + $0xe50] sm:$0xf] }
 0x299   :  { %8343 = vmatmul.bf16.vlgmr.msra.gmra.mxu1 %v14994_v27  ;;  %v12517_v59 = vor.u32 %v14359_v3, %v12514_v40  ;;  %v14342_v40 = vld [vmem:[#allocation6 + $0xe68] sm:$0xf0] }
 0x29a   :  { %8522 = vmatpush.bf16.msrb.mxu3 %v12937_v9  ;;  %8400 = vmatpush.bf16.msrb.mxu1 %v12625_v11  ;;  %v12570_v9 = vld [vmem:[#allocation6 + $0xf7c] sm:$0xf0]  ;;  %v12520_v11 = vld [vmem:[#allocation6 + $0xef8] sm:$0xf] }
 0x29b   :  { %8491 = vmatpush.bf16.msrb.mxu2 %v12629_v46  ;;  %v12573_v22 = vor.u32 %v14373_v28, %v12570_v9  ;;  %v12100_v46 = vld [vmem:[#allocation6 + $0xbb0] sm:$0xf]  ;;  %v12521_v32 = vor.u32 %v14363_v42, %v12520_v11  ;;  %v12456_v28 = vld [vmem:[#allocation6 + $0xe80] sm:$0xf]  ;;  %v14348_v9 = vld [vmem:[#allocation6 + $0xe98] sm:$0xf0] }
 0x29c   :  { %8434 = vmatmul.bf16.vlgmr.msra.gmra.mxu2 %v14994_v27  ;;  %8510 = vmatpush.bf16.msra.mxu0 %v12685_v61  ;;  %v15071_v31 = vpop.f32.mrf.mxu2  ;;  %v12486_v61 = vld [vmem:[#allocation6 + $0xed4] sm:$0xf0]  ;;  %v12101_v6 = vor.u32 %v14258_v54, %v12100_v46  ;;  %v12457_v25 = vor.u32 %v14348_v9, %v12456_v28  ;;  %v14562_v11 = vld [vmem:[#allocation6 + $0x154c] sm:$0xf]  ;;  %v13326_v42 = vld [vmem:[#allocation6 + $0x1564] sm:$0xf0] }
 0x29d   :  { %v12016_v28 = vld [vmem:[#allocation6 + $0xb08] sm:$0xf]  ;;  %v14237_v9 = vld [vmem:[#allocation6 + $0xb20] sm:$0xf0] }
 0x29e   :  { %8523 = vmatpush.bf16.msrb.mxu3 %v12909_v29  ;;  %8401 = vmatpush.bf16.msrb.mxu1 %v12597_v62  ;;  %v14370_v29 = vld [vmem:[#allocation6 + $0xf48] sm:$0xf0]  ;;  %v15073_v62 = vpop.f32.mrf.mxu0  ;;  %v15075_v60 = vpop.f32.mrf.mxu3 }
 0x29f   :  { %8492 = vmatpush.bf16.msrb.mxu2 %v12601_v2  ;;  %v12549_v39 = vor.u32 %v14370_v29, %v12548_v18  ;;  %v8099_v2 = vpop.f32.mrf.mxu1  ;;  %v14341_v29 = vld [vmem:[#allocation6 + $0xe60] sm:$0xf0] }
 0x2a0   :  { %8511 = vmatpush.bf16.msra.mxu0 %v12657_v13  ;;  %v14345_v13 = vld [vmem:[#allocation6 + $0xe84] sm:$0xf]  ;;  %v12429_v46 = vor.u32 %v14341_v29, %v12428_v36  ;;  %v13329_v2 = vor.u32 %v14562_v11, %v13326_v42  ;;  %v14328_v36 = vld [vmem:[#allocation6 + $0xdf8] sm:$0xf0] }
 0x2a2   :  { %8524 = vmatpush.bf16.msrb.mxu3 %v12881_v44  ;;  %8402 = vmatpush.bf16.msrb.mxu1 %v12569_v51  ;;  %v12129_v44 = vor.u32 %v14265_v20, %v12128_v19  ;;  %v12458_v51 = vld [vmem:[#allocation6 + $0xe9c] sm:$0xf0]  ;;  %v13324_v20 = vld [vmem:[#allocation6 + $0x1548] sm:$0xf] }
 0x2a3   :  { %8493 = vmatpush.bf16.msrb.mxu2 %v12573_v22  ;;  %8512 = vmatmul.bf16.vlgmr.msra.gmra.mxu0 %v14972_v21  ;;  %v12464_v22 = vld [vmem:[#allocation6 + $0xe88] sm:$0xf]  ;;  %v12461_v18 = vor.u32 %v14345_v13, %v12458_v51  ;;  %v14324_v51 = vld [vmem:[#allocation6 + $0xddc] sm:$0xf] }
 0x2a4   :  { %8556 = vmatpush.bf16.msrb.mxu0 %v12185_v14  ;;  %v15077_v14 = vld [vmem:[#allocation8 + $0x7] sm:$0x7f]  ;;  %v8190_v19 = vpop.f32.mrf.mxu2 }
 0x2a5   :  { %8525 = vmatmul.bf16.vlgmr.msrb.gmra.mxu3 %v14994_v27  ;;  %v6205_v1 = vperm.slane %v15077_v14, 1  ;;  %v6206_v54 = vperm.slane %v15077_v14, 2  ;;  %v14503_v19 = vld [vmem:[#allocation6 + $0x1370] sm:$0xf0] }
 0x2a6   :  { %8582 = vmatpush.bf16.msra.mxu3 %v12633_v50  ;;  %8403 = vmatpush.bf16.msrb.mxu1 %v12541_v53  ;;  %v14355_v50 = vld [vmem:[#allocation6 + $0xed0] sm:$0xf0]  ;;  %v14338_v53 = vld [vmem:[#allocation6 + $0xe4c] sm:$0xf]  ;;  %v8255_v38 = vpop.f32.mrf.mxu0 }
 0x2a7   :  { %8494 = vmatpush.bf16.msrb.mxu2 %v12545_v48  ;;  %v12485_v37 = vor.u32 %v14355_v50, %v12484_v58  ;;  %v12465_v48 = vor.u32 %v14349_v24, %v12464_v22  ;;  %v8111_v3 = vadd.f32 %v15040_v47, %v6205_v1  ;;  %v14566_v58 = vld [vmem:[#allocation6 + $0x1568] sm:$0xf0]  ;;  %v12045_v50 = vor.u32 %v14244_v41, %v12044_v63  ;;  %v12374_v1 = vld [vmem:[#allocation6 + $0xdf4] sm:$0xf0]  ;;  %v11988_v41 = vld [vmem:[#allocation6 + $0xad0] sm:$0xf] }
 0x2a8   :  { %8557 = vmatpush.bf16.msrb.mxu0 %v12157_v34  ;;  %v12430_v34 = vld [vmem:[#allocation6 + $0xe64] sm:$0xf0]  ;;  %v12437_v47 = vor.u32 %v14342_v40, %v12436_v35  ;;  %v14317_v35 = vld [vmem:[#allocation6 + $0xda4] sm:$0xf]  ;;  %v12346_v38 = vld [vmem:[#allocation6 + $0xdbc] sm:$0xf0] }
 0x2a9   :  { %v12349_v42 = vor.u32 %v14317_v35, %v12346_v38  ;;  %v14289_v35 = vld [vmem:[#allocation6 + $0xcc4] sm:$0xf]  ;;  %v12234_v38 = vld [vmem:[#allocation6 + $0xcdc] sm:$0xf0] }
 0x2aa   :  { %8583 = vmatpush.bf16.msra.mxu3 %v12605_v8  ;;  %8404 = vmatpush.bf16.msrb.mxu1 %v12513_v43  ;;  %v12489_v8 = vor.u32 %v14352_v16, %v12486_v61  ;;  %v8281_v43 = vpop.f32.mrf.mxu3  ;;  %v12433_v16 = vor.u32 %v14338_v53, %v12430_v34  ;;  %v12377_v53 = vor.u32 %v14324_v51, %v12374_v1  ;;  %v13080_v34 = vld [vmem:[#allocation6 + $0x1358] sm:$0xf] }
 0x2ab   :  { %8495 = vmatpush.bf16.msrb.mxu2 %v12517_v59  ;;  %v13332_v59 = vld [vmem:[#allocation6 + $0x1550] sm:$0xf]  ;;  %v13081_v11 = vor.u32 %v14503_v19, %v13080_v34  ;;  %v13052_v43 = vld [vmem:[#allocation6 + $0x1320] sm:$0xf]  ;;  %v12968_v34 = vld [vmem:[#allocation6 + $0x1278] sm:$0xf] }
 0x2ac   :  { %8558 = vmatpush.bf16.msrb.mxu0 %v12129_v44  ;;  %v8123_v44 = vpop.f32.mrf.mxu1  ;;  %v8214_v24 = vpop.f32.mrf.mxu2  ;;  %v14475_v19 = vld [vmem:[#allocation6 + $0x1290] sm:$0xf0] }
 0x2ae   :  { %8584 = vmatpush.bf16.msra.mxu3 %v12577_v5  ;;  %8405 = vmatpush.bf16.msrb.mxu1 %v12485_v37  ;;  %v12073_v5 = vor.u32 %v14251_v10, %v12072_v7  ;;  %v12408_v37 = vld [vmem:[#allocation6 + $0xe18] sm:$0xf]  ;;  %v12405_v10 = vor.u32 %v14331_v55, %v12402_v0  ;;  %v13024_v0 = vld [vmem:[#allocation6 + $0x12e8] sm:$0xf] }
 0x2af   :  { %8496 = vmatpush.bf16.msrb.mxu2 %v12489_v8  ;;  %v13333_v8 = vor.u32 %v14566_v58, %v13332_v59  ;;  %v12318_v59 = vld [vmem:[#allocation6 + $0xd84] sm:$0xf0] }
 0x2b0   :  { %8559 = vmatpush.bf16.msrb.mxu0 %v12101_v6  ;;  %v14335_v6 = vld [vmem:[#allocation6 + $0xe30] sm:$0xf0] }
 0x2b1   :  { %v12409_v13 = vor.u32 %v14335_v6, %v12408_v37 }
 0x2b2   :  { %8585 = vmatpush.bf16.msra.mxu3 %v12549_v39  ;;  %v14565_v39 = vld [vmem:[#allocation6 + $0x1560] sm:$0xf0]  ;;  %8406 = vmatpush.bf16.msrb.mxu1 %v12457_v25  ;;  %v14582_v25 = vld [vmem:[#allocation9 + $0x78] sm:$0xff]  ;;  %v15087_v29 = vpop.f32.mrf.mxu3 }
 0x2b3   :  { %8497 = vmatpush.bf16.msrb.mxu2 %v12461_v18  ;;  %v13325_v61 = vor.u32 %v14565_v39, %v13324_v20  ;;  %v14230_v18 = vld [vmem:[#allocation6 + $0xae8] sm:$0xf0]  ;;  %v12352_v39 = vld [vmem:[#allocation6 + $0xda8] sm:$0xf] }
 0x2b4   :  { %8560 = vmatpush.bf16.msrb.mxu0 %v12073_v5  ;;  %v12017_v5 = vor.u32 %v14237_v9, %v12016_v28  ;;  %v11989_v40 = vor.u32 %v14230_v18, %v11988_v41  ;;  %v8216_v58 = vpop.f32.mrf.mxu2  ;;  %v14579_v28 = vld [vmem:[#allocation9 + $0x60] sm:$0xff]  ;;  %v12296_v9 = vld [vmem:[#allocation6 + $0xd38] sm:$0xf] }
 0x2b5   :  { %v12212_v58 = vld [vmem:[#allocation6 + $0xc90] sm:$0xf] }
 0x2b6   :  { %8586 = vmatpush.bf16.msra.mxu3 %v12521_v32  ;;  %v8124_v32 = vadd.f32 %v8123_v44, %v8111_v3  ;;  %8407 = vmatpush.bf16.msrb.mxu1 %v12429_v46  ;;  %v14321_v3 = vld [vmem:[#allocation6 + $0xdc0] sm:$0xf0]  ;;  %v14496_v44 = vld [vmem:[#allocation6 + $0x1338] sm:$0xf0]  ;;  %v14310_v46 = vld [vmem:[#allocation6 + $0xd6c] sm:$0xf] }
 0x2b7   :  { %8498 = vmatpush.bf16.msrb.mxu2 %v12433_v16  ;;  %v12321_v55 = vor.u32 %v14310_v46, %v12318_v59  ;;  %v14282_v59 = vld [vmem:[#allocation6 + $0xc8c] sm:$0xf] }
 0x2b8   :  { %v8137_v7 = vadd.f32 %v15057_v12, %v8124_v32  ;;  %8561 = vmatpush.bf16.msrb.mxu0 %v12045_v50  ;;  %v12380_v12 = vld [vmem:[#allocation6 + $0xde0] sm:$0xf]  ;;  %v14580_v50 = vld [vmem:[#allocation9 + $0x68] sm:$0xff]  ;;  %v13053_v32 = vor.u32 %v14496_v44, %v13052_v43 }
 0x2b9   :  { %8408 = vmatmul.bf16.vlgmr.msrb.gmra.mxu1 %v14970_v15  ;;  %v14576_v43 = vld [vmem:[#allocation9 + $0x48] sm:$0xff]  ;;  %v12940_v44 = vld [vmem:[#allocation6 + $0x1240] sm:$0xf] }
 0x2ba   :  { %8587 = vmatpush.bf16.msra.mxu3 %v12493_v56  ;;  %v8202_v56 = vadd.f32 %v15063_v57, %v6206_v54  ;;  %8459 = vmatpush.bf16.msra.mxu1 %v13325_v61  ;;  %v8150_v22 = vadd.f32 %v15053_v52, %v8137_v7  ;;  %v8125_v52 = vpop.f32.mrf.mxu1  ;;  %v14314_v54 = vld [vmem:[#allocation6 + $0xd88] sm:$0xf0]  ;;  %v8307_v16 = vpop.f32.mrf.mxu3  ;;  %v14303_v7 = vld [vmem:[#allocation6 + $0xd34] sm:$0xf] }
 0x2bb   :  { %8550 = vmatpush.bf16.msra.mxu2 %v13329_v2  ;;  %v8098_v2 = vadd.f32 %v15068_v30, %v15051_v17  ;;  %v12996_v17 = vld [vmem:[#allocation6 + $0x12b0] sm:$0xf]  ;;  %v14482_v30 = vld [vmem:[#allocation6 + $0x12c8] sm:$0xf0]  ;;  %v13304_v16 = vld [vmem:[#allocation6 + $0x1518] sm:$0xf] }
 0x2bc   :  { %v8215_v63 = vadd.f32 %v8214_v24, %v8202_v56  ;;  %v8163_v57 = vadd.f32 %v15049_v49, %v8150_v22  ;;  %8499 = vmatmul.bf16.vlgmr.msrb.gmra.mxu2 %v14970_v15  ;;  %v14581_v49 = vld [vmem:[#allocation9 + $0x70] sm:$0xff]  ;;  %8562 = vmatpush.bf16.msrb.mxu0 %v12017_v5  ;;  %v12268_v5 = vld [vmem:[#allocation6 + $0xd00] sm:$0xf]  ;;  %v12997_v41 = vor.u32 %v14482_v30, %v12996_v17 }
 0x2bd   :  { %v8647_v22 = vmax.f32 %v8098_v2, 0.0  ;;  %v12912_v2 = vld [vmem:[#allocation6 + $0x1208] sm:$0xf] }
 0x2be   :  { %8588 = vmatpush.bf16.msra.mxu3 %v12465_v48  ;;  %8478 = vmatpush.bf16.msrb.mxu1 %v12405_v10  ;;  %v12381_v48 = vor.u32 %v14328_v36, %v12380_v12  ;;  %v15092_v20 = vadd.f32 %v15060_v4, %v8215_v63  ;;  %v12324_v4 = vld [vmem:[#allocation6 + $0xd70] sm:$0xf]  ;;  %v14307_v10 = vld [vmem:[#allocation6 + $0xd50] sm:$0xf0]  ;;  %v12262_v12 = vld [vmem:[#allocation6 + $0xd14] sm:$0xf0] }
 0x2bf   :  { %8569 = vmatpush.bf16.msrb.mxu2 %v12409_v13  ;;  %v12325_v6 = vor.u32 %v14314_v54, %v12324_v4  ;;  %v15098_v13 = vpop.f32.mrf.mxu0  ;;  %v14578_v36 = vld [vmem:[#allocation9 + $0x58] sm:$0xff]  ;;  %v13298_v54 = vld [vmem:[#allocation6 + $0x152c] sm:$0xf0] }
 0x2c0   :  { %8563 = vmatpush.bf16.msrb.mxu0 %v11989_v40  ;;  %v14300_v63 = vld [vmem:[#allocation6 + $0xd18] sm:$0xf0]  ;;  %v14555_v4 = vld [vmem:[#allocation6 + $0x1514] sm:$0xf] }
 0x2c2   :  { %8589 = vmatpush.bf16.msra.mxu3 %v12437_v47  ;;  %8479 = vmatpush.bf16.msrb.mxu1 %v12377_v53  ;;  %v8175_v61 = vpop.f32.mrf.mxu1  ;;  %v14489_v47 = vld [vmem:[#allocation6 + $0x1300] sm:$0xf0] }
 0x2c3   :  { %8570 = vmatpush.bf16.msrb.mxu2 %v12381_v48  ;;  %v8176_v37 = vadd.f32 %v8175_v61, %v8163_v57  ;;  %8564 = vmatmul.bf16.vlgmr.msrb.gmra.mxu0 %v14957_v23  ;;  %v13025_v51 = vor.u32 %v14489_v47, %v13024_v0  ;;  %v12297_v23 = vor.u32 %v14307_v10, %v12296_v9  ;;  %v14559_v61 = vld [vmem:[#allocation6 + $0x1530] sm:$0xf0]  ;;  %v14548_v9 = vld [vmem:[#allocation6 + $0x14dc] sm:$0xf]  ;;  %v13270_v10 = vld [vmem:[#allocation6 + $0x14f4] sm:$0xf0] }
 0x2c4   :  { %8608 = vmatpush.bf16.msra.mxu0 %v13081_v11  ;;  %v12269_v48 = vor.u32 %v14300_v63, %v12268_v5  ;;  %v12969_v11 = vor.u32 %v14475_v19, %v12968_v34  ;;  %v13248_v63 = vld [vmem:[#allocation6 + $0x14a8] sm:$0xf]  ;;  %v14534_v19 = vld [vmem:[#allocation6 + $0x146c] sm:$0xf] }
 0x2c5   :  { %8590 = vmatmul.bf16.vlgmr.msra.gmra.mxu3 %v14970_v15  ;;  %v12353_v15 = vor.u32 %v14321_v3, %v12352_v39  ;;  %v8189_v56 = vadd.f32 %v15071_v31, %v8176_v37  ;;  %v15102_v31 = vpop.f32.mrf.mxu2  ;;  %v12240_v39 = vld [vmem:[#allocation6 + $0xcc8] sm:$0xf]  ;;  %v14293_v3 = vld [vmem:[#allocation6 + $0xce0] sm:$0xf0] }
 0x2c6   :  { %8641 = vmatpush.bf16.msrb.mxu3 %v13333_v8  ;;  %8480 = vmatpush.bf16.msrb.mxu1 %v12349_v42  ;;  %v12290_v8 = vld [vmem:[#allocation6 + $0xd4c] sm:$0xf0]  ;;  %v12237_v42 = vor.u32 %v14289_v35, %v12234_v38  ;;  %v12241_v46 = vor.u32 %v14293_v3, %v12240_v39  ;;  %v14461_v37 = vld [vmem:[#allocation6 + $0x1220] sm:$0xf0]  ;;  %v14538_v38 = vld [vmem:[#allocation6 + $0x1488] sm:$0xf0] }
 0x2c7   :  { %8571 = vmatpush.bf16.msrb.mxu2 %v12353_v15  ;;  %v12293_v1 = vor.u32 %v14303_v7, %v12290_v8  ;;  %v8648_v24 = vmax.f32 %v8189_v56, 0.0  ;;  %v8320_v40 = vpop.f32.mrf.mxu0  ;;  %v14468_v15 = vld [vmem:[#allocation6 + $0x1258] sm:$0xf0]  ;;  %v13301_v7 = vor.u32 %v14555_v4, %v13298_v54  ;;  %v12913_v30 = vor.u32 %v14461_v37, %v12912_v2  ;;  %v13220_v35 = vld [vmem:[#allocation6 + $0x1470] sm:$0xf] }
 0x2c8   :  { %8609 = vmatpush.bf16.msra.mxu0 %v13053_v32  ;;  %v15106_v18 = vpop.f32.mrf.mxu3  ;;  %v14575_v8 = vld [vmem:[#allocation9 + $0x40] sm:$0xff] }
 0x2c9   :  { %v15100_v57 = vpack.c.bf16 %v8648_v24, %v8647_v22  ;;  %13338 = vmatmul.msk.bf16.vlgmr.msra.gmra.mxu1 %vm2287_vm0, %v15022_v26  ;;  %v12884_v22 = vld [vmem:[#allocation6 + $0x11d0] sm:$0xf]  ;;  %v14454_v24 = vld [vmem:[#allocation6 + $0x11e8] sm:$0xf0]  ;;  %v13164_v4 = vld [vmem:[#allocation6 + $0x1400] sm:$0xf] }
 0x2ca   :  { %9106 = vmatpush.bf16.msra.mxu3 %v14582_v25  ;;  %8481 = vmatpush.bf16.msrb.mxu1 %v12321_v55  ;;  %v14296_v25 = vld [vmem:[#allocation6 + $0xcfc] sm:$0xf]  ;;  %v8177_v52 = vpop.f32.mrf.mxu1  ;;  %v12941_v55 = vor.u32 %v14468_v15, %v12940_v44  ;;  %v14531_v44 = vld [vmem:[#allocation6 + $0x1450] sm:$0xf0]  ;;  %v14517_v2 = vld [vmem:[#allocation6 + $0x13e0] sm:$0xf0] }
 0x2cb   :  { %8572 = vmatpush.bf16.msrb.mxu2 %v12325_v6  ;;  %v12265_v53 = vor.u32 %v14296_v25, %v12262_v12  ;;  %v8777_v56 = vunpack.c.h.b16 %v15100_v57  ;;  %v14541_v12 = vld [vmem:[#allocation6 + $0x14a4] sm:$0xf]  ;;  %v12885_v52 = vor.u32 %v14454_v24, %v12884_v22  ;;  %v14589_v22 = vld [vmem:[#allocation9 + $0xb0] sm:$0xff] }
 0x2cc   :  { %8610 = vmatpush.bf16.msra.mxu0 %v13025_v51  ;;  %13339 = vmatmul.msk.bf16.vlgmr.msra.gmra.mxu2 %vm2287_vm0, %v15022_v26  ;;  %v13276_v51 = vld [vmem:[#allocation6 + $0x14e0] sm:$0xf] }
 0x2cd   :  { %v8268_v32 = vpop.f32.mrf.mxu2  ;;  %v8784_v5 = vpack.c.b16 %v8777_v56, %v8777_v56  ;;  %v14447_v56 = vld [vmem:[#allocation6 + $0x11b0] sm:$0xf0] }
 0x2ce   :  { %9107 = vmatpush.bf16.msra.mxu3 %v14581_v49  ;;  %8482 = vmatpush.bf16.msrb.mxu1 %v12293_v1  ;;  %v14577_v49 = vld [vmem:[#allocation9 + $0x50] sm:$0xff]  ;;  %v14552_v1 = vld [vmem:[#allocation6 + $0x14f8] sm:$0xf0] }
 0x2cf   :  { %8573 = vmatpush.bf16.msrb.mxu2 %v12297_v23  ;;  %v15113_v17 = vpop.f32.mrf.mxu0  ;;  %v13273_v23 = vor.u32 %v14548_v9, %v13270_v10  ;;  %v13277_v25 = vor.u32 %v14552_v1, %v13276_v51  ;;  %v14510_v9 = vld [vmem:[#allocation6 + $0x13a8] sm:$0xf0]  ;;  %v12856_v10 = vld [vmem:[#allocation6 + $0x1198] sm:$0xf] }
 0x2d0   :  { %8611 = vmatpush.bf16.msra.mxu0 %v12997_v41  ;;  %v8359_v0 = vpop.f32.mrf.mxu3  ;;  %v14545_v41 = vld [vmem:[#allocation6 + $0x14c0] sm:$0xf0] }
 0x2d1   :  { %v13249_v34 = vor.u32 %v14545_v41, %v13248_v63  ;;  %v13130_v0 = vld [vmem:[#allocation6 + $0x13dc] sm:$0xf0]  ;;  %v14588_v63 = vld [vmem:[#allocation9 + $0xa8] sm:$0xff] }
 0x2d2   :  { %9108 = vmatpush.bf16.msra.mxu3 %v14580_v50  ;;  %8483 = vmatpush.bf16.msrb.mxu1 %v12265_v53  ;;  %v14286_v50 = vld [vmem:[#allocation6 + $0xca8] sm:$0xf0] }
 0x2d3   :  { %8574 = vmatpush.bf16.msrb.mxu2 %v12269_v48  ;;  %v12213_v6 = vor.u32 %v14286_v50, %v12212_v58  ;;  %v13214_v48 = vld [vmem:[#allocation6 + $0x1484] sm:$0xf0]  ;;  %v14520_v58 = vld [vmem:[#allocation6 + $0x13fc] sm:$0xf]  ;;  %v13158_v50 = vld [vmem:[#allocation6 + $0x1414] sm:$0xf0] }
 0x2d4   :  { %8612 = vmatpush.bf16.msra.mxu0 %v12969_v11  ;;  %v13217_v3 = vor.u32 %v14534_v19, %v13214_v48  ;;  %v13221_v11 = vor.u32 %v14538_v38, %v13220_v35  ;;  %v14587_v19 = vld [vmem:[#allocation9 + $0xa0] sm:$0xff]  ;;  %v6207_v35 = vperm.slane %v15077_v14, 3  ;;  %v12772_v38 = vld [vmem:[#allocation6 + $0x10f0] sm:$0xf] }
 0x2d5   :  { %13340 = vmatmul.msk.bf16.vlgmr.msrb.gmra.mxu3 %vm2287_vm0, %v15022_v26  ;;  %v12206_v26 = vld [vmem:[#allocation6 + $0xca4] sm:$0xf0] }
 0x2d6   :  { %9109 = vmatpush.bf16.msra.mxu3 %v14579_v28  ;;  %8484 = vmatpush.bf16.msrb.mxu1 %v12237_v42  ;;  %v12209_v47 = vor.u32 %v14282_v59, %v12206_v26  ;;  %v13305_v28 = vor.u32 %v14559_v61, %v13304_v16  ;;  %v8240_v39 = vpop.f32.mrf.mxu1  ;;  %v13186_v42 = vld [vmem:[#allocation6 + $0x144c] sm:$0xf0] }
 0x2d7   :  { %8575 = vmatpush.bf16.msrb.mxu2 %v12241_v46  ;;  %v8241_v40 = vadd.f32 %v8240_v39, %v15092_v20  ;;  %v14524_v20 = vld [vmem:[#allocation6 + $0x1418] sm:$0xf0]  ;;  %v14596_v39 = vld [vmem:[#allocation9 + $0xe8] sm:$0xff] }
 0x2d8   :  { %8613 = vmatpush.bf16.msra.mxu0 %v12941_v55  ;;  %v13165_v61 = vor.u32 %v14524_v20, %v13164_v4  ;;  %v14594_v4 = vld [vmem:[#allocation9 + $0xd8] sm:$0xff] }
 0x2d9   :  { %v8254_v15 = vadd.f32 %v15073_v62, %v8241_v40  ;;  %v13161_v62 = vor.u32 %v14520_v58, %v13158_v50  ;;  %v14412_v58 = vld [vmem:[#allocation6 + $0x1098] sm:$0xf0] }
 0x2da   :  { %9110 = vmatpush.bf16.msra.mxu3 %v14578_v36  ;;  %8485 = vmatpush.bf16.msrb.mxu1 %v12209_v47  ;;  %v13242_v36 = vld [vmem:[#allocation6 + $0x14bc] sm:$0xf0]  ;;  %v13136_v47 = vld [vmem:[#allocation6 + $0x13c8] sm:$0xf] }
 0x2db   :  { %8576 = vmatpush.bf16.msrb.mxu2 %v12213_v6  ;;  %v13245_v53 = vor.u32 %v14541_v12, %v13242_v36  ;;  %v8267_v59 = vadd.f32 %v15102_v31, %v8254_v15  ;;  %v14513_v31 = vld [vmem:[#allocation6 + $0x13c4] sm:$0xf]  ;;  %v14590_v6 = vld [vmem:[#allocation9 + $0xb8] sm:$0xff]  ;;  %v12828_v12 = vld [vmem:[#allocation6 + $0x1160] sm:$0xf] }
 0x2dc   :  { %8614 = vmatpush.bf16.msra.mxu0 %v12913_v30  ;;  %v13133_v37 = vor.u32 %v14513_v31, %v13130_v0  ;;  %v14440_v36 = vld [vmem:[#allocation6 + $0x1178] sm:$0xf0]  ;;  %v14585_v15 = vld [vmem:[#allocation9 + $0x90] sm:$0xff] }
 0x2dd   :  { %8486 = vmatmul.bf16.vlgmr.msrb.gmra.mxu1 %v14960_v33  ;;  %v15122_v54 = vadd.f32 %v15075_v60, %v8267_v59  ;;  %v13137_v60 = vor.u32 %v14517_v2, %v13136_v47  ;;  %v12829_v41 = vor.u32 %v14440_v36, %v12828_v12  ;;  %v12688_v47 = vld [vmem:[#allocation6 + $0x1048] sm:$0xf]  ;;  %v14405_v2 = vld [vmem:[#allocation6 + $0x1060] sm:$0xf0] }
 0x2de   :  { %9111 = vmatpush.bf16.msra.mxu3 %v14577_v49  ;;  %8530 = vmatpush.bf16.msra.mxu1 %v13301_v7  ;;  %v8372_v49 = vpop.f32.mrf.mxu0  ;;  %v8242_v16 = vpop.f32.mrf.mxu1  ;;  %v14506_v7 = vld [vmem:[#allocation6 + $0x138c] sm:$0xf] }
 0x2df   :  { %8621 = vmatpush.bf16.msra.mxu2 %v13305_v28  ;;  %v13108_v28 = vld [vmem:[#allocation6 + $0x1390] sm:$0xf]  ;;  %v14426_v49 = vld [vmem:[#allocation6 + $0x1108] sm:$0xf0] }
 0x2e0   :  { %8577 = vmatmul.bf16.vlgmr.msrb.gmra.mxu2 %v14960_v33  ;;  %8615 = vmatpush.bf16.msra.mxu0 %v12885_v52  ;;  %v14527_v33 = vld [vmem:[#allocation6 + $0x1434] sm:$0xf]  ;;  %v13109_v24 = vor.u32 %v14510_v9, %v13108_v28  ;;  %v12800_v52 = vld [vmem:[#allocation6 + $0x1128] sm:$0xf] }
 0x2e1   :  { %v13189_v46 = vor.u32 %v14527_v33, %v13186_v42  ;;  %v12744_v42 = vld [vmem:[#allocation6 + $0x10b8] sm:$0xf]  ;;  %v14584_v16 = vld [vmem:[#allocation9 + $0x88] sm:$0xff] }
 0x2e2   :  { %9112 = vmatpush.bf16.msra.mxu3 %v14576_v43  ;;  %8531 = vmatpush.bf16.msra.mxu1 %v13273_v23  ;;  %v13192_v43 = vld [vmem:[#allocation6 + $0x1438] sm:$0xf]  ;;  %v12857_v23 = vor.u32 %v14447_v56, %v12856_v10  ;;  %v14592_v28 = vld [vmem:[#allocation9 + $0xc8] sm:$0xff] }
 0x2e3   :  { %8622 = vmatpush.bf16.msra.mxu2 %v13277_v25  ;;  %8616 = vmatmul.bf16.vlgmr.msra.gmra.mxu0 %v14994_v27  ;;  %v13193_v26 = vor.u32 %v14531_v44, %v13192_v43  ;;  %v15124_v27 = vpop.f32.mrf.mxu2  ;;  %v14419_v43 = vld [vmem:[#allocation6 + $0x10d0] sm:$0xf0]  ;;  %v14595_v44 = vld [vmem:[#allocation9 + $0xe0] sm:$0xff] }
 0x2e4   :  { %9119 = vmatpush.bf16.msrb.mxu0 %v14590_v6  ;;  %v12745_v59 = vor.u32 %v14419_v43, %v12744_v42  ;;  %v14583_v6 = vld [vmem:[#allocation9 + $0x80] sm:$0xff] }
 0x2e6   :  { %9113 = vmatpush.bf16.msra.mxu3 %v14575_v8  ;;  %8532 = vmatpush.bf16.msra.mxu1 %v13245_v53  ;;  %v15128_v55 = vpop.f32.mrf.mxu0  ;;  %v13102_v8 = vld [vmem:[#allocation6 + $0x13a4] sm:$0xf0]  ;;  %v14433_v53 = vld [vmem:[#allocation6 + $0x1140] sm:$0xf0] }
 0x2e7   :  { %8623 = vmatpush.bf16.msra.mxu2 %v13249_v34  ;;  %v13105_v30 = vor.u32 %v14506_v7, %v13102_v8  ;;  %v14597_v34 = vld [vmem:[#allocation9 + $0xf0] sm:$0xff]  ;;  %v12801_v48 = vor.u32 %v14433_v53, %v12800_v52 }
 0x2e8   :  { %v15126_v32 = vpop.f32.mrf.mxu3  ;;  %9120 = vmatpush.bf16.msrb.mxu0 %v14589_v22  ;;  %v12660_v7 = vld [vmem:[#allocation6 + $0x1010] sm:$0xf]  ;;  %v14398_v8 = vld [vmem:[#allocation6 + $0x1028] sm:$0xf0] }
 0x2e9   :  { %9114 = vmatmul.bf16.vlgmr.msra.gmra.mxu3 %v8784_v5  ;;  %v14598_v5 = vld [vmem:[#allocation9 + $0xf8] sm:$0xff]  ;;  %v12661_v56 = vor.u32 %v14398_v8, %v12660_v7  ;;  %v14573_v22 = vld [vmem:[#allocation9 + $0x30] sm:$0xff] }
 0x2ea   :  { %8533 = vmatpush.bf16.msra.mxu1 %v13217_v3  ;;  %v14586_v3 = vld [vmem:[#allocation9 + $0x98] sm:$0xff] }
 0x2eb   :  { %8624 = vmatpush.bf16.msra.mxu2 %v13221_v11  ;;  %v8333_v51 = vpop.f32.mrf.mxu2  ;;  %v12773_v11 = vor.u32 %v14426_v49, %v12772_v38  ;;  %v14602_v7 = vld [vmem:[#allocation9 + $0x118] sm:$0xff] }
 0x2ec   :  { %9121 = vmatpush.bf16.msrb.mxu0 %v14588_v63  ;;  %v14574_v51 = vld [vmem:[#allocation9 + $0x38] sm:$0xff] }
 0x2ed   :  { %v14610_v8 = vld [vmem:[#allocation9 + $0x158] sm:$0xff] }
 0x2ee   :  { %8534 = vmatpush.bf16.msra.mxu1 %v13189_v46  ;;  %v8398_v25 = vpop.f32.mrf.mxu0  ;;  %v6208_v46 = vperm.slane %v15077_v14, 4 }
 0x2ef   :  { %8625 = vmatpush.bf16.msra.mxu2 %v13193_v26  ;;  %v12716_v26 = vld [vmem:[#allocation6 + $0x1080] sm:$0xf] }
 0x2f0   :  { %v8424_v1 = vpop.f32.mrf.mxu3  ;;  %9122 = vmatpush.bf16.msrb.mxu0 %v14587_v19  ;;  %v14571_v25 = vld [vmem:[#allocation9 + $0x20] sm:$0xff]  ;;  %v14569_v19 = vld [vmem:[#allocation9 + $0x10] sm:$0xff] }
 0x2f2   :  { %8535 = vmatpush.bf16.msra.mxu1 %v13161_v62 }
 0x2f3   :  { %8626 = vmatpush.bf16.msra.mxu2 %v13165_v61 }
 0x2f4   :  { %9123 = vmatpush.bf16.msrb.mxu0 %v14586_v3 }
 0x2f6   :  { %8536 = vmatpush.bf16.msra.mxu1 %v13133_v37  ;;  %v8292_v40 = vpop.f32.mrf.mxu1  ;;  %v14593_v37 = vld [vmem:[#allocation9 + $0xd0] sm:$0xff] }
 0x2f7   :  { %8627 = vmatpush.bf16.msra.mxu2 %v13137_v60  ;;  %v8293_v33 = vadd.f32 %v8292_v40, %v6207_v35  ;;  %v12689_v60 = vor.u32 %v14405_v2, %v12688_v47  ;;  %v14612_v47 = vld [vmem:[#allocation9 + $0x168] sm:$0xff] }
 0x2f8   :  { %9124 = vmatpush.bf16.msrb.mxu0 %v14585_v15 }
 0x2fa   :  { %8537 = vmatpush.bf16.msra.mxu1 %v13105_v30  ;;  %v14591_v30 = vld [vmem:[#allocation9 + $0xc0] sm:$0xff] }
 0x2fb   :  { %8628 = vmatpush.bf16.msra.mxu2 %v13109_v24 }
 0x2fc   :  { %9125 = vmatpush.bf16.msrb.mxu0 %v14584_v16 }
 0x2fd   :  { %8538 = vmatmul.bf16.vlgmr.msra.gmra.mxu1 %v14996_v45 }
 0x2fe   :  { %8595 = vmatpush.bf16.msrb.mxu1 %v12857_v23  ;;  %8629 = vmatmul.bf16.vlgmr.msra.gmra.mxu2 %v14996_v45  ;;  %v8306_v45 = vadd.f32 %v15087_v29, %v8293_v33  ;;  %v8294_v31 = vpop.f32.mrf.mxu1  ;;  %v12717_v29 = vor.u32 %v14412_v58, %v12716_v26 }
 0x2ff   :  { %9132 = vmatpush.bf16.msrb.mxu2 %v14598_v5  ;;  %v8383_v20 = vpop.f32.mrf.mxu2  ;;  %v14570_v5 = vld [vmem:[#allocation9 + $0x18] sm:$0xff]  ;;  %v14613_v31 = vld [vmem:[#allocation9 + $0x170] sm:$0xff] }
 0x300   :  { %v8319_v50 = vadd.f32 %v15098_v13, %v8306_v45  ;;  %v8384_v62 = vadd.f32 %v8383_v20, %v6208_v46  ;;  %v15138_v0 = vpop.f32.mrf.mxu0  ;;  %9126 = vmatpush.bf16.msrb.mxu0 %v14583_v6  ;;  %v14611_v6 = vld [vmem:[#allocation9 + $0x160] sm:$0xff] }
 0x302   :  { %8596 = vmatpush.bf16.msrb.mxu1 %v12829_v41  ;;  %v8397_v13 = vadd.f32 %v15128_v55, %v8384_v62  ;;  %v14572_v55 = vld [vmem:[#allocation9 + $0x28] sm:$0xff]  ;;  %v8332_v24 = vadd.f32 %v15124_v27, %v8319_v50  ;;  %v8649_v41 = vmax.f32 %v15122_v54, 0.0  ;;  %v14567_v54 = vld [vmem:[#allocation9] sm:$0xff]  ;;  %v14606_v50 = vld [vmem:[#allocation9 + $0x138] sm:$0xff] }
 0x303   :  { %9133 = vmatpush.bf16.msrb.mxu2 %v14597_v34  ;;  %v14605_v62 = vld [vmem:[#allocation9 + $0x130] sm:$0xff] }
 0x306   :  { %8597 = vmatpush.bf16.msrb.mxu1 %v12801_v48 }
 0x307   :  { %9134 = vmatpush.bf16.msrb.mxu2 %v14596_v39  ;;  %v8385_v9 = vpop.f32.mrf.mxu2 }
 0x308   :  { %v15136_v61 = vpop.f32.mrf.mxu3  ;;  %v8450_v1 = vpop.f32.mrf.mxu0 }
 0x309   :  { %v14601_v1 = vld [vmem:[#allocation9 + $0x110] sm:$0xff] }
 0x30a   :  { %8598 = vmatpush.bf16.msrb.mxu1 %v12773_v11  ;;  %v8776_v11 = vunpack.c.l.b16 %v15100_v57 }
 0x30b   :  { %9135 = vmatpush.bf16.msrb.mxu2 %v14595_v44 }
 0x30c   :  { %v8783_v33 = vpack.c.b16 %v8776_v11, %v8776_v11 }
 0x30e   :  { %8599 = vmatpush.bf16.msrb.mxu1 %v12745_v59 }
 0x30f   :  { %9136 = vmatpush.bf16.msrb.mxu2 %v14594_v4  ;;  %v14614_v4 = vld [vmem:[#allocation9 + $0x178] sm:$0xff] }
 0x310   :  { %v8476_v10 = vpop.f32.mrf.mxu3  ;;  %9158 = vmatpush.bf16.msrb.mxu3 %v14614_v4 }
 0x312   :  { %8600 = vmatpush.bf16.msrb.mxu1 %v12717_v29 }
 0x313   :  { %9137 = vmatpush.bf16.msrb.mxu2 %v14593_v37 }
 0x314   :  { %9159 = vmatpush.bf16.msrb.mxu3 %v14613_v31  ;;  %v14628_v31 = vld [vmem:[#allocation11] ss:$0 sm:$0xff] }
 0x316   :  { %8601 = vmatpush.bf16.msrb.mxu1 %v12689_v60  ;;  %v8344_v23 = vpop.f32.mrf.mxu1  ;;  %v6209_v60 = vperm.slane %v15077_v14, 5 }
 0x317   :  { %9138 = vmatpush.bf16.msrb.mxu2 %v14592_v28  ;;  %v8345_v12 = vadd.f32 %v8344_v23, %v8332_v24  ;;  %v14600_v23 = vld [vmem:[#allocation9 + $0x108] sm:$0xff] }
 0x318   :  { %9160 = vmatpush.bf16.msrb.mxu3 %v14612_v47  ;;  %v8475_v28 = vadd.f32 %v15136_v61, %v6209_v60 }
 0x319   :  { %v8358_v36 = vadd.f32 %v15106_v18, %v8345_v12  ;;  %v14568_v18 = vld [vmem:[#allocation9 + $0x8] sm:$0xff] }
 0x31a   :  { %8602 = vmatpush.bf16.msrb.mxu1 %v12661_v56 }
 0x31b   :  { %9139 = vmatpush.bf16.msrb.mxu2 %v14591_v30  ;;  %v8371_v63 = vadd.f32 %v15113_v17, %v8358_v36  ;;  %v14609_v30 = vld [vmem:[#allocation9 + $0x150] sm:$0xff] }
 0x31c   :  { %9161 = vmatpush.bf16.msrb.mxu3 %v14611_v6 }
 0x31d   :  { %8603 = vmatmul.bf16.vlgmr.msrb.gmra.mxu1 %v14972_v21  ;;  %v8650_v52 = vmax.f32 %v8371_v63, 0.0 }
 0x31e   :  { %9093 = vmatpush.bf16.msra.mxu1 %v14574_v51  ;;  %v8346_v21 = vpop.f32.mrf.mxu1 }
 0x31f   :  { %v8435_v53 = vpop.f32.mrf.mxu2  ;;  %v8655_v27 = vpack.c.bf16 %v8650_v52, %v8649_v41  ;;  %v14607_v21 = vld [vmem:[#allocation9 + $0x140] sm:$0xff] }
 0x320   :  { %v15148_v48 = vpop.f32.mrf.mxu0  ;;  %9162 = vmatpush.bf16.msrb.mxu3 %v14610_v8 }
 0x321   :  { %v8778_v35 = vunpack.c.l.b16 %v8655_v27  ;;  %v8779_v38 = vunpack.c.h.b16 %v8655_v27 }
 0x322   :  { %9094 = vmatpush.bf16.msra.mxu1 %v14573_v22  ;;  %v6210_v22 = vperm.slane %v15077_v14, 6 }
 0x323   :  { %v8785_v49 = vpack.c.b16 %v8778_v35, %v8778_v35  ;;  %v8786_v39 = vpack.c.b16 %v8779_v38, %v8779_v38 }
 0x324   :  { %9163 = vmatpush.bf16.msrb.mxu3 %v14609_v30 }
 0x325   :  { %9127 = vmatmul.bf16.vlgmr.msrb.gmra.mxu0 %v8785_v49  ;;  %9140 = vmatmul.bf16.vlgmr.msrb.gmra.mxu2 %v8786_v39 }
 0x326   :  { %9095 = vmatpush.bf16.msra.mxu1 %v14572_v55 }
 0x327   :  { %v8437_v3 = vpop.f32.mrf.mxu2 }
 0x328   :  { %v15146_v34 = vpop.f32.mrf.mxu3  ;;  %v8515_v40 = vpop.f32.mrf.mxu0 }
 0x32a   :  { %9096 = vmatpush.bf16.msra.mxu1 %v14571_v25  ;;  %v14608_v25 = vld [vmem:[#allocation9 + $0x148] sm:$0xff] }
 0x32b   :  { %9164 = vmatpush.bf16.msrb.mxu3 %v14608_v25 }
 0x32e   :  { %9097 = vmatpush.bf16.msra.mxu1 %v14570_v5 }
 0x32f   :  { %9165 = vmatpush.bf16.msrb.mxu3 %v14607_v21 }
 0x330   :  { %v8528_v17 = vpop.f32.mrf.mxu3 }
 0x332   :  { %9098 = vmatpush.bf16.msra.mxu1 %v14569_v19 }
 0x336   :  { %9099 = vmatpush.bf16.msra.mxu1 %v14568_v18  ;;  %v8409_v42 = vpop.f32.mrf.mxu1 }
 0x337   :  { %v8410_v43 = vadd.f32 %v8409_v42, %v8397_v13  ;;  %v14603_v13 = vld [vmem:[#allocation9 + $0x120] sm:$0xff] }
 0x339   :  { %v8423_v44 = vadd.f32 %v15126_v32, %v8410_v43  ;;  %v14604_v32 = vld [vmem:[#allocation9 + $0x128] sm:$0xff] }
 0x33a   :  { %9100 = vmatpush.bf16.msra.mxu1 %v14567_v54 }
 0x33b   :  { %v8436_v45 = vadd.f32 %v8435_v53, %v8423_v44  ;;  %v14599_v53 = vld [vmem:[#allocation9 + $0x100] sm:$0xff] }
 0x33d   :  { %9101 = vmatmul.bf16.vlgmr.msra.gmra.mxu1 %v8783_v33  ;;  %v15153_v46 = vadd.f32 %v15138_v0, %v8436_v45  ;;  %v14615_v33 = vld [vmem:[#allocation9 + $0x180] sm:$0xff] }
 0x33e   :  { %v8411_v26 = vpop.f32.mrf.mxu1  ;;  %9145 = vmatpush.bf16.msrb.mxu1 %v14606_v50  ;;  %9178 = vmatpush.bf16.msra.mxu0 %v14615_v33 }
 0x33f   :  { %v8500_v15 = vpop.f32.mrf.mxu2 }
 0x340   :  { %v8565_v58 = vpop.f32.mrf.mxu0 }
 0x341   :  { %v8566_v12 = vadd.f32 %v8565_v58, %v6210_v22 }
 0x342   :  { %9146 = vmatpush.bf16.msrb.mxu1 %v14605_v62 }
 0x346   :  { %v8461_v16 = vpop.f32.mrf.mxu1  ;;  %9147 = vmatpush.bf16.msrb.mxu1 %v14604_v32 }
 0x347   :  { %v8502_v20 = vpop.f32.mrf.mxu2  ;;  %v8462_v38 = vadd.f32 %v8461_v16, %v15153_v46 }
 0x348   :  { %v8591_v59 = vpop.f32.mrf.mxu3  ;;  %v8567_v29 = vpop.f32.mrf.mxu0 }
 0x349   :  { %v8651_v39 = vmax.f32 %v8462_v38, 0.0 }
 0x34a   :  { %9148 = vmatpush.bf16.msrb.mxu1 %v14603_v13 }
 0x34e   :  { %v8463_v37 = vpop.f32.mrf.mxu1  ;;  %9149 = vmatpush.bf16.msrb.mxu1 %v14602_v7 }
 0x34f   :  { %v8552_v2 = vpop.f32.mrf.mxu2 }
 0x350   :  { %v8593_v57 = vpop.f32.mrf.mxu3 }
 0x352   :  { %9150 = vmatpush.bf16.msrb.mxu1 %v14601_v1 }
 0x356   :  { %9151 = vmatpush.bf16.msrb.mxu1 %v14600_v23 }
 0x357   :  { %v8554_v9 = vpop.f32.mrf.mxu2 }
 0x358   :  { %v15155_v0 = vpop.f32.mrf.mxu3 }
 0x35a   :  { %v8487_v56 = vpop.f32.mrf.mxu1  ;;  %9152 = vmatpush.bf16.msrb.mxu1 %v14599_v53 }
 0x35b   :  { %v8488_v51 = vadd.f32 %v8487_v56, %v8475_v28 }
 0x35d   :  { %v8501_v55 = vadd.f32 %v8500_v15, %v8488_v51 }
 0x35f   :  { %v8514_v24 = vadd.f32 %v15148_v48, %v8501_v55 }
 0x360   :  { %v8645_v10 = vpop.f32.mrf.mxu3  ;;  %v8617_v61 = vpop.f32.mrf.mxu0 }
 0x361   :  { %v8527_v5 = vadd.f32 %v15146_v34, %v8514_v24 }
 0x362   :  { %v8489_v52 = vpop.f32.mrf.mxu1 }
 0x363   :  { %v8578_v36 = vpop.f32.mrf.mxu2 }
 0x364   :  { %v8579_v63 = vadd.f32 %v8578_v36, %v8566_v12 }
 0x366   :  { %v8592_v14 = vadd.f32 %v8591_v59, %v8579_v63 }
 0x368   :  { %v8619_v27 = vpop.f32.mrf.mxu0 }
 0x36b   :  { %v8580_v19 = vpop.f32.mrf.mxu2 }
 0x36c   :  { %v9115_v41 = vpop.f32.mrf.mxu3 }
 0x374   :  { %v9117_v48 = vpop.f32.mrf.mxu3 }
 0x37a   :  { %v8539_v35 = vpop.f32.mrf.mxu1 }
 0x37b   :  { %v8540_v18 = vadd.f32 %v8539_v35, %v8527_v5 }
 0x37d   :  { %v8553_v49 = vadd.f32 %v8552_v2, %v8540_v18 }
 0x37f   :  { %v8652_v34 = vmax.f32 %v8553_v49, 0.0 }
 0x381   :  { %v8656_v3 = vpack.c.bf16 %v8652_v34, %v8651_v39  ;;  %v8630_v17 = vpop.f32.mrf.mxu2 }
 0x382   :  { %v8541_v54 = vpop.f32.mrf.mxu1 }
 0x383   :  { %v8780_v40 = vunpack.c.l.b16 %v8656_v3  ;;  %v8781_v11 = vunpack.c.h.b16 %v8656_v3 }
 0x385   :  { %v8787_v42 = vpack.c.b16 %v8780_v40, %v8780_v40  ;;  %v8788_v43 = vpack.c.b16 %v8781_v11, %v8781_v11 }
 0x387   :  { %9153 = vmatmul.bf16.vlgmr.msrb.gmra.mxu1 %v8787_v42  ;;  %9166 = vmatmul.bf16.vlgmr.msrb.gmra.mxu3 %v8788_v43 }
 0x389   :  { %v8632_v44 = vpop.f32.mrf.mxu2 }
 0x39a   :  { %v8604_v45 = vpop.f32.mrf.mxu1 }
 0x39b   :  { %v8605_v15 = vadd.f32 %v8604_v45, %v8592_v14 }
 0x39d   :  { %v8618_v59 = vadd.f32 %v8617_v61, %v8605_v15 }
 0x39f   :  { %v8631_v46 = vadd.f32 %v8630_v17, %v8618_v59 }
 0x3a1   :  { %v8644_v26 = vadd.f32 %v15155_v0, %v8631_v46 }
 0x3a2   :  { %v8606_v58 = vpop.f32.mrf.mxu1  ;;  %v9128_v16 = vpop.f32.mrf.mxu0 }
 0x3a3   :  { %v8653_v50 = vmax.f32 %v8644_v26, 0.0 }
 0x3a5   :  { %v8657_v4 = vpack.c.bf16 %v8653_v50, %v8653_v50 }
 0x3a7   :  { %8662 = vst.msk [vmem:[#allocation2 + $0x18] sm:$0xf] %vm2942_vm1, %v8657_v4 }
 0x3a8   :  { %v9141_v29 = vpop.f32.mrf.mxu2 }
 0x3aa   :  { %v9130_v47 = vpop.f32.mrf.mxu0 }
 0x3ae   :  { %v8669_v20 = vld [vmem:[#allocation2 + $0x18] sm:$0xf] }
 0x3af   :  { %v8782_v57 = vunpack.c.l.b16 %v8669_v20 }
 0x3b0   :  { %v9143_v6 = vpop.f32.mrf.mxu2 }
 0x3b1   :  { %v8789_v62 = vpack.c.b16 %v8782_v57, %v8782_v57 }
 0x3b3   :  { %13537 = vmatmul.msk.bf16.vlgmr.msra.gmra.mxu0 %vm2287_vm0, %v8789_v62 }
 0x3ba   :  { %v9102_v32 = vpop.f32.mrf.mxu1 }
 0x3bb   :  { %v9103_v2 = vadd.f32 %v14628_v31, %v9102_v32 }
 0x3bd   :  { %v9116_v37 = vadd.f32 %v9115_v41, %v9103_v2 }
 0x3bf   :  { %v9129_v13 = vadd.f32 %v9128_v16, %v9116_v37 }
 0x3c1   :  { %v9142_v0 = vadd.f32 %v9141_v29, %v9129_v13 }
 0x3c2   :  { %v9104_v60 = vpop.f32.mrf.mxu1 }
 0x404   :  { %v9154_v7 = vpop.f32.mrf.mxu1 }
 0x405   :  { %v9155_v10 = vadd.f32 %v9154_v7, %v9142_v0 }
 0x40a   :  { %v9167_v8 = vpop.f32.mrf.mxu3 }
 0x40b   :  { %v9168_v56 = vadd.f32 %v9167_v8, %v9155_v10 }
 0x40c   :  { %v9156_v28 = vpop.f32.mrf.mxu1 }
 0x412   :  { %v9169_v9 = vpop.f32.mrf.mxu3 }
 0x430   :  { %v9180_v51 = vpop.f32.mrf.mxu0 }
 0x431   :  { %v9181_v1 = vadd.f32 %v9180_v51, %v9168_v56 }
 0x433   :  { %9184 = vst [vmem:[#allocation12] sm:$0xff] %v9181_v1 }
 0x434   :  { %9195 = dma.vmem_to_hbm [thread:$0]  %s9191_s4, 128, %s9193_s23, [#allocation5]  }
 0x438   :  { %v9182_v30 = vpop.f32.mrf.mxu0 }
 0x439   :  { %14781 = dma.done.wait [#allocation5], 128  }
 0x43a   :  { %14782 = vsyncadd [#allocation5], 4294967168 }
 0x43b   :  { %9200 = vsyncpa [#allocation4], 1 }
 0x43c   :  { %9201 = vsyncpa [#allocation7], 1 }
 0x43d   :  { %9202 = vsyncpa [#allocation10], 1 }
 0x43e   :  { %9203 = vsyncpa [#allocation5], 1 }

</bundles_post_ra>
